<compile_context>
chip_gen: v7x
topology: tpu7x:2x2x1
jax: 0.10.0
libtpu: 0.0.40
codegen_flags: <defaults>
</compile_context>

<pallas_src>
import jax
import jax.numpy as jnp
from jax import lax
from jax.experimental import pallas as pl
from jax.experimental.pallas import tpu as pltpu


# ----------------------------- fused Pallas kernel ---------------------------

def _pool_max4(y):
    # y: [TB, 512] = 4 pool-parity blocks of 128 lanes -> elementwise max.
    return jnp.maximum(jnp.maximum(y[:, 0:128], y[:, 128:256]),
                       jnp.maximum(y[:, 256:384], y[:, 384:512]))


def _net_kernel(x_ref, w1a_ref, w1b_ref, w1c_ref, w1d_ref, b1_ref,
                w2a_ref, w2b_ref, b2_ref,
                wf1_ref, bf1_ref, wf2_ref, bf2_ref, o_ref):
    # x:    [TB, 1024] bf16, hi-major; each input row (ci*8+wi, 120 used) in a
    #       128-lane slot -> conv bands read contiguous 128-aligned slices.
    # w1_*: conv1 band weights [384/512, 512], columns = parity*128 + w2*32 + co
    # w2_*: conv2 band weights [384, 512],     columns = parity*128 + w4*64 + co
    # wf1:  [256, 128] f32 fc1, rows permuted to absorb the NCHW flatten
    # wf2:  [1, 128]   f32 fc2 as VPU mul + cross-lane sum (avoids N=1 matmul)
    b1 = b1_ref[...]                                   # [1, 128]

    def conv1_band(xs, w_ref):
        y = jnp.dot(xs, w_ref[...], preferred_element_type=jnp.float32)
        return jnp.maximum(_pool_max4(y) + b1, 0.0)    # [TB, 128]

    # ---- conv1 -> pool -> bias -> ReLU, one matmul per pooled output row ----
    p1 = jnp.concatenate([
        conv1_band(x_ref[:, 0:384],    w1a_ref),       # pooled row 0: hi 0..2
        conv1_band(x_ref[:, 128:640],  w1b_ref),       # pooled row 1: hi 1..4
        conv1_band(x_ref[:, 384:896],  w1c_ref),       # pooled row 2: hi 3..6
        conv1_band(x_ref[:, 640:1024], w1d_ref),       # pooled row 3: hi 5..7
    ], axis=1).astype(jnp.bfloat16)                    # [TB, 512]

    b2 = b2_ref[...]                                   # [1, 128]

    def conv2_band(xs, w_ref):
        y = jnp.dot(xs, w_ref[...], preferred_element_type=jnp.float32)
        return jnp.maximum(_pool_max4(y) + b2, 0.0)    # [TB, 128]

    # ---- conv2 -> pool -> bias -> ReLU, band-split the same way ----
    p2 = jnp.concatenate([
        conv2_band(p1[:, 0:384],   w2a_ref),           # pooled row 0: rows 0..2
        conv2_band(p1[:, 128:512], w2b_ref),           # pooled row 1: rows 1..3
    ], axis=1)                                         # [TB, 256] f32

    # ---- fc1 + ReLU (tiny matmul, kept f32 for accuracy) ----
    h1 = jnp.dot(p2, wf1_ref[...], preferred_element_type=jnp.float32)
    h1 = jnp.maximum(h1 + bf1_ref[...], 0.0)           # [TB, 128]

    # ---- fc2 (N=1) as VPU mul + lane reduction, then sigmoid ----
    logit = jnp.sum(h1 * wf2_ref[...], axis=1, keepdims=True) + bf2_ref[...]
    o_ref[...] = (1.0 / (1.0 + jnp.exp(-logit))).astype(o_ref.dtype)


# ------------------------- one-time weight packing ----------------------------
# Packs PyTorch-layout weights ([Cout, Cin, kh, kw] / [out, in]) into the
# band-structured, lane-dense matrices consumed by the fused kernel.

def pack_params(params):
    f32, bf16 = jnp.float32, jnp.bfloat16
    w1, b1 = params["w1"], params["b1"]        # [32,15,3,3], [32]
    w2, b2 = params["w2"], params["b2"]        # [64,32,3,3], [64]
    wf1, bf1 = params["wf1"], params["bf1"]    # [128,256],   [128]
    wf2, bf2 = params["wf2"], params["bf2"]    # [1,128],     [1]

    # conv1 band for pooled output row h2: rows = (hi - hi_start)*128 + ci*8 + wi,
    # cols = (dh*2+dw)*128 + w2*32 + co, output pos (2*h2+dh, 2*w2+dw).
    def conv1_band(h2):
        hi_start = max(0, 2 * h2 - 1)
        hi_end = min(7, 2 * h2 + 2)
        n_rows = hi_end - hi_start + 1                  # 3, 4, 4, 3
        r = jnp.arange(n_rows * 128)
        hi = (hi_start + r // 128)[:, None]
        q = (r % 128)[:, None]
        ci = jnp.minimum(q // 8, 14)                    # lanes 120..127 are pad
        wi = q % 8
        c = jnp.arange(512)
        dd = (c // 128)[None, :]
        rem = (c % 128)[None, :]
        dh, dw = dd // 2, dd % 2
        w2q, co = rem // 32, rem % 32
        kh = hi - (2 * h2 + dh) + 1
        kw = wi - (2 * w2q + dw) + 1
        valid = (q < 120) & (kh >= 0) & (kh < 3) & (kw >= 0) & (kw < 3)
        vals = w1[co, ci, jnp.clip(kh, 0, 2), jnp.clip(kw, 0, 2)]
        return jnp.where(valid, vals, 0.0).astype(bf16)

    # conv2 band for pooled output row h4: rows = (h2p - s)*128 + w2p*32 + ci,
    # cols = (dh*2+dw)*128 + w4*64 + co, output pos (2*h4+dh, 2*w4+dw).
    def conv2_band(h4):
        s = max(0, 2 * h4 - 1)                          # 0 or 1 (3 rows each)
        r = jnp.arange(3 * 128)
        h2p = (s + r // 128)[:, None]
        rr = (r % 128)[:, None]
        w2p, ci2 = rr // 32, rr % 32
        c = jnp.arange(512)
        dd = (c // 128)[None, :]
        rem = (c % 128)[None, :]
        dh, dw = dd // 2, dd % 2
        w4q, co2 = rem // 64, rem % 64
        kh = h2p - (2 * h4 + dh) + 1
        kw = w2p - (2 * w4q + dw) + 1
        valid = (kh >= 0) & (kh < 3) & (kw >= 0) & (kw < 3)
        vals = w2[co2, ci2, jnp.clip(kh, 0, 2), jnp.clip(kw, 0, 2)]
        return jnp.where(valid, vals, 0.0).astype(bf16)

    # fc1: p2 lane l = h4*128 + w4*64 + c  ->  PyTorch flatten feature c*4 + h4*2 + w4
    l = jnp.arange(256)
    h4l, w4l, cl = l // 128, (l % 128) // 64, l % 64
    feat = cl * 4 + h4l * 2 + w4l
    wf1p = wf1[:, feat].T                               # [256, 128]

    return {
        "w1_0": conv1_band(0), "w1_1": conv1_band(1),
        "w1_2": conv1_band(2), "w1_3": conv1_band(3),
        "b1": b1[jnp.arange(128) % 32].reshape(1, 128).astype(f32),
        "w2_0": conv2_band(0), "w2_1": conv2_band(1),
        "b2": b2[jnp.arange(128) % 64].reshape(1, 128).astype(f32),
        "wf1": wf1p.astype(f32),
        "bf1": bf1.reshape(1, 128).astype(f32),
        "wf2": wf2.reshape(1, 128).astype(f32),
        "bf2": bf2.reshape(1, 1).astype(f32),
    }


# ------------------------------ forward wrapper -------------------------------

def _round_up(v, m):
    return ((v + m - 1) // m) * m


def net_forward(packed, x_nchw):
    B = x_nchw.shape[0]

    # hi-major layout, each spatial row (ci*8+wi, 120 values) padded to 128 lanes.
    xr = jnp.transpose(x_nchw, (0, 2, 1, 3)).reshape(B, 8, 15 * 8)
    xr = jnp.pad(xr, ((0, 0), (0, 0), (0, 8)))
    xf = xr.reshape(B, 8 * 128).astype(jnp.bfloat16)    # [B, 1024]

    # Batch tiling: >=2 grid steps for v7x's two TensorCores, tiles up to 256
    # rows for full MXU occupancy on v6e/v7x, minimum 16 (bf16 sublane pack).
    if B <= 16:
        tile_b = 16
    else:
        tile_b = min(256, _round_up((B + 1) // 2, 16))
    b_pad = _round_up(B, tile_b)
    if b_pad != B:
        xf = jnp.pad(xf, ((0, b_pad - B), (0, 0)))

    const = lambda i: (0, 0)
    out = pl.pallas_call(
        _net_kernel,
        out_shape=jax.ShapeDtypeStruct((b_pad, 1), jnp.float32),
        grid=(b_pad // tile_b,),
        in_specs=[
            pl.BlockSpec((tile_b, 1024), lambda i: (i, 0)),  # x (batch tiled)
            pl.BlockSpec((384, 512), const),                 # conv1 band 0
            pl.BlockSpec((512, 512), const),                 # conv1 band 1
            pl.BlockSpec((512, 512), const),                 # conv1 band 2
            pl.BlockSpec((384, 512), const),                 # conv1 band 3
            pl.BlockSpec((1, 128), const),                   # conv1 bias (tiled)
            pl.BlockSpec((384, 512), const),                 # conv2 band 0
            pl.BlockSpec((384, 512), const),                 # conv2 band 1
            pl.BlockSpec((1, 128), const),                   # conv2 bias (tiled)
            pl.BlockSpec((256, 128), const),                 # fc1 (permuted, f32)
            pl.BlockSpec((1, 128), const),                   # fc1 bias
            pl.BlockSpec((1, 128), const),                   # fc2 weight row
            pl.BlockSpec((1, 1), const),                     # fc2 bias
        ],
        out_specs=pl.BlockSpec((tile_b, 1), lambda i: (i, 0)),
        compiler_params=pltpu.CompilerParams(
            dimension_semantics=("parallel",),               # megacore over batch tiles
            vmem_limit_bytes=32 * 1024 * 1024,               # ample; fits v7x 64 MiB
        ),
    )(xf, packed["w1_0"], packed["w1_1"], packed["w1_2"], packed["w1_3"],
      packed["b1"], packed["w2_0"], packed["w2_1"], packed["b2"],
      packed["wf1"], packed["bf1"], packed["wf2"], packed["bf2"])

    return out[:B]


# -------------------------- params + pure-JAX reference ------------------------

def init_params(key):
    ks = jax.random.split(key, 8)
    s = 0.05
    return {
        "w1": s * jax.random.normal(ks[0], (32, 15, 3, 3), jnp.float32),   # [Cout, Cin, kh, kw]
        "b1": s * jax.random.normal(ks[1], (32,), jnp.float32),
        "w2": s * jax.random.normal(ks[2], (64, 32, 3, 3), jnp.float32),
        "b2": s * jax.random.normal(ks[3], (64,), jnp.float32),
        "wf1": s * jax.random.normal(ks[4], (128, 256), jnp.float32),      # [out, in]
        "bf1": s * jax.random.normal(ks[5], (128,), jnp.float32),
        "wf2": s * jax.random.normal(ks[6], (1, 128), jnp.float32),
        "bf2": s * jax.random.normal(ks[7], (1,), jnp.float32),
    }


def reference_forward(params, x):
    # f32 reference matching the PyTorch module exactly.
    B = x.shape[0]
    x = x.astype(jnp.float32)
    dn = ("NCHW", "OIHW", "NCHW")
    y = lax.conv_general_dilated(x, params["w1"], (1, 1), ((1, 1), (1, 1)),
                                 dimension_numbers=dn)
    y = jnp.maximum(y + params["b1"][None, :, None, None], 0.0)
    y = y.reshape(B, 32, 4, 2, 4, 2).max(axis=(3, 5))
    y = lax.conv_general_dilated(y, params["w2"], (1, 1), ((1, 1), (1, 1)),
                                 dimension_numbers=dn)
    y = jnp.maximum(y + params["b2"][None, :, None, None], 0.0)
    y = y.reshape(B, 64, 2, 2, 2, 2).max(axis=(3, 5))
    f = y.reshape(B, 256)                                   # NCHW flatten (c, h, w)
    h = jnp.maximum(f @ params["wf1"].T + params["bf1"], 0.0)
    logit = h @ params["wf2"].T + params["bf2"]
    return jax.nn.sigmoid(logit)


# ------------------------------------ main -------------------------------------

if __name__ == "__main__":
    key = jax.random.PRNGKey(0)
    pkey, xkey, xkey2 = jax.random.split(key, 3)
    params = init_params(pkey)
    packed = pack_params(params)

    fwd = jax.jit(net_forward)

    # Small batch (exercises batch padding, single grid step).
    # Spatial 8x8 so that two 2x2 pools give 2x2, matching fc1 = 64*2*2.
    x_small = jax.random.normal(xkey, (2, 15, 8, 8), jnp.float32)
    out_small = jax.block_until_ready(fwd(packed, x_small))
    ref_small = jax.block_until_ready(reference_forward(params, x_small))

    # Larger batch (exercises the 2-step batch-tiled "parallel" grid).
    x_large = jax.random.normal(xkey2, (256, 15, 8, 8), jnp.float32)
    out_large = jax.block_until_ready(fwd(packed, x_large))
    ref_large = jax.block_until_ready(reference_forward(params, x_large))

    assert out_small.shape == (2, 1) and out_large.shape == (256, 1)
    assert bool(jnp.all((out_small >= 0.0) & (out_small <= 1.0)))
    err = max(float(jnp.max(jnp.abs(out_small - ref_small))),
              float(jnp.max(jnp.abs(out_large - ref_large))))
    assert err < 2e-2, f"max abs error vs reference too large: {err}"
    print("KERNEL_OK")
</pallas_src>

<mosaic_0001>
module attributes {stable_mosaic.version = 11 : i64} {
  func.func @_net_kernel(%arg0: i32, %arg1: memref<16x1024xbf16, #tpu.memory_space<vmem>>, %arg2: memref<384x512xbf16, #tpu.memory_space<vmem>>, %arg3: memref<512x512xbf16, #tpu.memory_space<vmem>>, %arg4: memref<512x512xbf16, #tpu.memory_space<vmem>>, %arg5: memref<384x512xbf16, #tpu.memory_space<vmem>>, %arg6: memref<1x128xf32, #tpu.memory_space<vmem>>, %arg7: memref<384x512xbf16, #tpu.memory_space<vmem>>, %arg8: memref<384x512xbf16, #tpu.memory_space<vmem>>, %arg9: memref<1x128xf32, #tpu.memory_space<vmem>>, %arg10: memref<256x128xf32, #tpu.memory_space<vmem>>, %arg11: memref<1x128xf32, #tpu.memory_space<vmem>>, %arg12: memref<1x128xf32, #tpu.memory_space<vmem>>, %arg13: memref<1x1xf32, #tpu.memory_space<vmem>>, %arg14: memref<16x1xf32, #tpu.memory_space<vmem>>) attributes {dimension_semantics = [#tpu.dimension_semantics<parallel>], iteration_bounds = array<i64: 1>, scalar_prefetch = 0 : i64, scratch_operands = 0 : i64, tpu.core_type = #tpu.core_type<tc>, window_params = [{transform_indices = @transform_0, window_bounds = array<i64: 16, 1024>}, {pipeline_mode = #tpu.pipeline_mode<synchronous>, transform_indices = @transform_1, window_bounds = array<i64: 384, 512>}, {pipeline_mode = #tpu.pipeline_mode<synchronous>, transform_indices = @transform_2, window_bounds = array<i64: 512, 512>}, {pipeline_mode = #tpu.pipeline_mode<synchronous>, transform_indices = @transform_3, window_bounds = array<i64: 512, 512>}, {pipeline_mode = #tpu.pipeline_mode<synchronous>, transform_indices = @transform_4, window_bounds = array<i64: 384, 512>}, {pipeline_mode = #tpu.pipeline_mode<synchronous>, transform_indices = @transform_5, window_bounds = array<i64: 1, 128>}, {pipeline_mode = #tpu.pipeline_mode<synchronous>, transform_indices = @transform_6, window_bounds = array<i64: 384, 512>}, {pipeline_mode = #tpu.pipeline_mode<synchronous>, transform_indices = @transform_7, window_bounds = array<i64: 384, 512>}, {pipeline_mode = #tpu.pipeline_mode<synchronous>, transform_indices = @transform_8, window_bounds = array<i64: 1, 128>}, {pipeline_mode = #tpu.pipeline_mode<synchronous>, transform_indices = @transform_9, window_bounds = array<i64: 256, 128>}, {pipeline_mode = #tpu.pipeline_mode<synchronous>, transform_indices = @transform_10, window_bounds = array<i64: 1, 128>}, {pipeline_mode = #tpu.pipeline_mode<synchronous>, transform_indices = @transform_11, window_bounds = array<i64: 1, 128>}, {pipeline_mode = #tpu.pipeline_mode<synchronous>, transform_indices = @transform_12, window_bounds = array<i64: 1, 1>}, {transform_indices = @transform_13, window_bounds = array<i64: 16, 1>}]} {
    %c0 = arith.constant 0 : index
    %c0_0 = arith.constant 0 : index
    %0 = vector.load %arg6[%c0, %c0_0] : memref<1x128xf32, #tpu.memory_space<vmem>>, vector<1x128xf32>
    %c0_1 = arith.constant 0 : index
    %c0_2 = arith.constant 0 : index
    %1 = vector.load %arg1[%c0_1, %c0_2] : memref<16x1024xbf16, #tpu.memory_space<vmem>>, vector<16x384xbf16>
    %c0_3 = arith.constant 0 : index
    %c0_4 = arith.constant 0 : index
    %2 = vector.load %arg2[%c0_3, %c0_4] : memref<384x512xbf16, #tpu.memory_space<vmem>>, vector<384x512xbf16>
    %cst = arith.constant dense<0.000000e+00> : vector<16x512xf32>
    %3 = tpu.matmul %1, %2, %cst {dimension_numbers = #tpu.dot_dimension_numbers<[1], [0], [0], [1], [0, 0, 1, 1], [], []>} : vector<16x384xbf16>, vector<384x512xbf16>, vector<16x512xf32> -> vector<16x512xf32>
    %4 = vector.extract_strided_slice %3 {offsets = [0, 0], sizes = [16, 128], strides = [1, 1]} : vector<16x512xf32> to vector<16x128xf32>
    %5 = vector.extract_strided_slice %3 {offsets = [0, 128], sizes = [16, 128], strides = [1, 1]} : vector<16x512xf32> to vector<16x128xf32>
    %6 = arith.maximumf %4, %5 : vector<16x128xf32>
    %7 = vector.extract_strided_slice %3 {offsets = [0, 256], sizes = [16, 128], strides = [1, 1]} : vector<16x512xf32> to vector<16x128xf32>
    %8 = vector.extract_strided_slice %3 {offsets = [0, 384], sizes = [16, 128], strides = [1, 1]} : vector<16x512xf32> to vector<16x128xf32>
    %9 = arith.maximumf %7, %8 : vector<16x128xf32>
    %10 = arith.maximumf %6, %9 : vector<16x128xf32>
    %11 = vector.broadcast %0 : vector<1x128xf32> to vector<16x128xf32>
    %12 = arith.addf %10, %11 : vector<16x128xf32>
    %cst_5 = arith.constant 0.000000e+00 : f32
    %13 = vector.broadcast %cst_5 : f32 to vector<16x128xf32>
    %14 = arith.maximumf %12, %13 : vector<16x128xf32>
    %c0_6 = arith.constant 0 : index
    %c128 = arith.constant 128 : index
    %15 = vector.load %arg1[%c0_6, %c128] : memref<16x1024xbf16, #tpu.memory_space<vmem>>, vector<16x512xbf16>
    %c0_7 = arith.constant 0 : index
    %c0_8 = arith.constant 0 : index
    %16 = vector.load %arg3[%c0_7, %c0_8] : memref<512x512xbf16, #tpu.memory_space<vmem>>, vector<512x512xbf16>
    %cst_9 = arith.constant dense<0.000000e+00> : vector<16x512xf32>
    %17 = tpu.matmul %15, %16, %cst_9 {dimension_numbers = #tpu.dot_dimension_numbers<[1], [0], [0], [1], [0, 0, 1, 1], [], []>} : vector<16x512xbf16>, vector<512x512xbf16>, vector<16x512xf32> -> vector<16x512xf32>
    %18 = vector.extract_strided_slice %17 {offsets = [0, 0], sizes = [16, 128], strides = [1, 1]} : vector<16x512xf32> to vector<16x128xf32>
    %19 = vector.extract_strided_slice %17 {offsets = [0, 128], sizes = [16, 128], strides = [1, 1]} : vector<16x512xf32> to vector<16x128xf32>
    %20 = arith.maximumf %18, %19 : vector<16x128xf32>
    %21 = vector.extract_strided_slice %17 {offsets = [0, 256], sizes = [16, 128], strides = [1, 1]} : vector<16x512xf32> to vector<16x128xf32>
    %22 = vector.extract_strided_slice %17 {offsets = [0, 384], sizes = [16, 128], strides = [1, 1]} : vector<16x512xf32> to vector<16x128xf32>
    %23 = arith.maximumf %21, %22 : vector<16x128xf32>
    %24 = arith.maximumf %20, %23 : vector<16x128xf32>
    %25 = vector.broadcast %0 : vector<1x128xf32> to vector<16x128xf32>
    %26 = arith.addf %24, %25 : vector<16x128xf32>
    %cst_10 = arith.constant 0.000000e+00 : f32
    %27 = vector.broadcast %cst_10 : f32 to vector<16x128xf32>
    %28 = arith.maximumf %26, %27 : vector<16x128xf32>
    %c0_11 = arith.constant 0 : index
    %c384 = arith.constant 384 : index
    %29 = vector.load %arg1[%c0_11, %c384] : memref<16x1024xbf16, #tpu.memory_space<vmem>>, vector<16x512xbf16>
    %c0_12 = arith.constant 0 : index
    %c0_13 = arith.constant 0 : index
    %30 = vector.load %arg4[%c0_12, %c0_13] : memref<512x512xbf16, #tpu.memory_space<vmem>>, vector<512x512xbf16>
    %cst_14 = arith.constant dense<0.000000e+00> : vector<16x512xf32>
    %31 = tpu.matmul %29, %30, %cst_14 {dimension_numbers = #tpu.dot_dimension_numbers<[1], [0], [0], [1], [0, 0, 1, 1], [], []>} : vector<16x512xbf16>, vector<512x512xbf16>, vector<16x512xf32> -> vector<16x512xf32>
    %32 = vector.extract_strided_slice %31 {offsets = [0, 0], sizes = [16, 128], strides = [1, 1]} : vector<16x512xf32> to vector<16x128xf32>
    %33 = vector.extract_strided_slice %31 {offsets = [0, 128], sizes = [16, 128], strides = [1, 1]} : vector<16x512xf32> to vector<16x128xf32>
    %34 = arith.maximumf %32, %33 : vector<16x128xf32>
    %35 = vector.extract_strided_slice %31 {offsets = [0, 256], sizes = [16, 128], strides = [1, 1]} : vector<16x512xf32> to vector<16x128xf32>
    %36 = vector.extract_strided_slice %31 {offsets = [0, 384], sizes = [16, 128], strides = [1, 1]} : vector<16x512xf32> to vector<16x128xf32>
    %37 = arith.maximumf %35, %36 : vector<16x128xf32>
    %38 = arith.maximumf %34, %37 : vector<16x128xf32>
    %39 = vector.broadcast %0 : vector<1x128xf32> to vector<16x128xf32>
    %40 = arith.addf %38, %39 : vector<16x128xf32>
    %cst_15 = arith.constant 0.000000e+00 : f32
    %41 = vector.broadcast %cst_15 : f32 to vector<16x128xf32>
    %42 = arith.maximumf %40, %41 : vector<16x128xf32>
    %c0_16 = arith.constant 0 : index
    %c640 = arith.constant 640 : index
    %43 = vector.load %arg1[%c0_16, %c640] : memref<16x1024xbf16, #tpu.memory_space<vmem>>, vector<16x384xbf16>
    %c0_17 = arith.constant 0 : index
    %c0_18 = arith.constant 0 : index
    %44 = vector.load %arg5[%c0_17, %c0_18] : memref<384x512xbf16, #tpu.memory_space<vmem>>, vector<384x512xbf16>
    %cst_19 = arith.constant dense<0.000000e+00> : vector<16x512xf32>
    %45 = tpu.matmul %43, %44, %cst_19 {dimension_numbers = #tpu.dot_dimension_numbers<[1], [0], [0], [1], [0, 0, 1, 1], [], []>} : vector<16x384xbf16>, vector<384x512xbf16>, vector<16x512xf32> -> vector<16x512xf32>
    %46 = vector.extract_strided_slice %45 {offsets = [0, 0], sizes = [16, 128], strides = [1, 1]} : vector<16x512xf32> to vector<16x128xf32>
    %47 = vector.extract_strided_slice %45 {offsets = [0, 128], sizes = [16, 128], strides = [1, 1]} : vector<16x512xf32> to vector<16x128xf32>
    %48 = arith.maximumf %46, %47 : vector<16x128xf32>
    %49 = vector.extract_strided_slice %45 {offsets = [0, 256], sizes = [16, 128], strides = [1, 1]} : vector<16x512xf32> to vector<16x128xf32>
    %50 = vector.extract_strided_slice %45 {offsets = [0, 384], sizes = [16, 128], strides = [1, 1]} : vector<16x512xf32> to vector<16x128xf32>
    %51 = arith.maximumf %49, %50 : vector<16x128xf32>
    %52 = arith.maximumf %48, %51 : vector<16x128xf32>
    %53 = vector.broadcast %0 : vector<1x128xf32> to vector<16x128xf32>
    %54 = arith.addf %52, %53 : vector<16x128xf32>
    %cst_20 = arith.constant 0.000000e+00 : f32
    %55 = vector.broadcast %cst_20 : f32 to vector<16x128xf32>
    %56 = arith.maximumf %54, %55 : vector<16x128xf32>
    %57 = tpu.concatenate %14, %28, %42, %56 in 1 : vector<16x128xf32>, vector<16x128xf32>, vector<16x128xf32>, vector<16x128xf32> -> vector<16x512xf32>
    %58 = arith.truncf %57 : vector<16x512xf32> to vector<16x512xbf16>
    %c0_21 = arith.constant 0 : index
    %c0_22 = arith.constant 0 : index
    %59 = vector.load %arg9[%c0_21, %c0_22] : memref<1x128xf32, #tpu.memory_space<vmem>>, vector<1x128xf32>
    %60 = vector.extract_strided_slice %58 {offsets = [0, 0], sizes = [16, 384], strides = [1, 1]} : vector<16x512xbf16> to vector<16x384xbf16>
    %c0_23 = arith.constant 0 : index
    %c0_24 = arith.constant 0 : index
    %61 = vector.load %arg7[%c0_23, %c0_24] : memref<384x512xbf16, #tpu.memory_space<vmem>>, vector<384x512xbf16>
    %cst_25 = arith.constant dense<0.000000e+00> : vector<16x512xf32>
    %62 = tpu.matmul %60, %61, %cst_25 {dimension_numbers = #tpu.dot_dimension_numbers<[1], [0], [0], [1], [0, 0, 1, 1], [], []>} : vector<16x384xbf16>, vector<384x512xbf16>, vector<16x512xf32> -> vector<16x512xf32>
    %63 = vector.extract_strided_slice %62 {offsets = [0, 0], sizes = [16, 128], strides = [1, 1]} : vector<16x512xf32> to vector<16x128xf32>
    %64 = vector.extract_strided_slice %62 {offsets = [0, 128], sizes = [16, 128], strides = [1, 1]} : vector<16x512xf32> to vector<16x128xf32>
    %65 = arith.maximumf %63, %64 : vector<16x128xf32>
    %66 = vector.extract_strided_slice %62 {offsets = [0, 256], sizes = [16, 128], strides = [1, 1]} : vector<16x512xf32> to vector<16x128xf32>
    %67 = vector.extract_strided_slice %62 {offsets = [0, 384], sizes = [16, 128], strides = [1, 1]} : vector<16x512xf32> to vector<16x128xf32>
    %68 = arith.maximumf %66, %67 : vector<16x128xf32>
    %69 = arith.maximumf %65, %68 : vector<16x128xf32>
    %70 = vector.broadcast %59 : vector<1x128xf32> to vector<16x128xf32>
    %71 = arith.addf %69, %70 : vector<16x128xf32>
    %cst_26 = arith.constant 0.000000e+00 : f32
    %72 = vector.broadcast %cst_26 : f32 to vector<16x128xf32>
    %73 = arith.maximumf %71, %72 : vector<16x128xf32>
    %74 = vector.extract_strided_slice %58 {offsets = [0, 128], sizes = [16, 384], strides = [1, 1]} : vector<16x512xbf16> to vector<16x384xbf16>
    %c0_27 = arith.constant 0 : index
    %c0_28 = arith.constant 0 : index
    %75 = vector.load %arg8[%c0_27, %c0_28] : memref<384x512xbf16, #tpu.memory_space<vmem>>, vector<384x512xbf16>
    %cst_29 = arith.constant dense<0.000000e+00> : vector<16x512xf32>
    %76 = tpu.matmul %74, %75, %cst_29 {dimension_numbers = #tpu.dot_dimension_numbers<[1], [0], [0], [1], [0, 0, 1, 1], [], []>} : vector<16x384xbf16>, vector<384x512xbf16>, vector<16x512xf32> -> vector<16x512xf32>
    %77 = vector.extract_strided_slice %76 {offsets = [0, 0], sizes = [16, 128], strides = [1, 1]} : vector<16x512xf32> to vector<16x128xf32>
    %78 = vector.extract_strided_slice %76 {offsets = [0, 128], sizes = [16, 128], strides = [1, 1]} : vector<16x512xf32> to vector<16x128xf32>
    %79 = arith.maximumf %77, %78 : vector<16x128xf32>
    %80 = vector.extract_strided_slice %76 {offsets = [0, 256], sizes = [16, 128], strides = [1, 1]} : vector<16x512xf32> to vector<16x128xf32>
    %81 = vector.extract_strided_slice %76 {offsets = [0, 384], sizes = [16, 128], strides = [1, 1]} : vector<16x512xf32> to vector<16x128xf32>
    %82 = arith.maximumf %80, %81 : vector<16x128xf32>
    %83 = arith.maximumf %79, %82 : vector<16x128xf32>
    %84 = vector.broadcast %59 : vector<1x128xf32> to vector<16x128xf32>
    %85 = arith.addf %83, %84 : vector<16x128xf32>
    %cst_30 = arith.constant 0.000000e+00 : f32
    %86 = vector.broadcast %cst_30 : f32 to vector<16x128xf32>
    %87 = arith.maximumf %85, %86 : vector<16x128xf32>
    %88 = tpu.concatenate %73, %87 in 1 : vector<16x128xf32>, vector<16x128xf32> -> vector<16x256xf32>
    %c0_31 = arith.constant 0 : index
    %c0_32 = arith.constant 0 : index
    %89 = vector.load %arg10[%c0_31, %c0_32] : memref<256x128xf32, #tpu.memory_space<vmem>>, vector<256x128xf32>
    %cst_33 = arith.constant dense<0.000000e+00> : vector<16x128xf32>
    %90 = tpu.matmul %88, %89, %cst_33 {dimension_numbers = #tpu.dot_dimension_numbers<[1], [0], [0], [1], [0, 0, 1, 1], [], []>} : vector<16x256xf32>, vector<256x128xf32>, vector<16x128xf32> -> vector<16x128xf32>
    %c0_34 = arith.constant 0 : index
    %c0_35 = arith.constant 0 : index
    %91 = vector.load %arg11[%c0_34, %c0_35] : memref<1x128xf32, #tpu.memory_space<vmem>>, vector<1x128xf32>
    %92 = vector.broadcast %91 : vector<1x128xf32> to vector<16x128xf32>
    %93 = arith.addf %90, %92 : vector<16x128xf32>
    %cst_36 = arith.constant 0.000000e+00 : f32
    %94 = vector.broadcast %cst_36 : f32 to vector<16x128xf32>
    %95 = arith.maximumf %93, %94 : vector<16x128xf32>
    %c0_37 = arith.constant 0 : index
    %c0_38 = arith.constant 0 : index
    %96 = vector.load %arg12[%c0_37, %c0_38] : memref<1x128xf32, #tpu.memory_space<vmem>>, vector<1x128xf32>
    %97 = vector.broadcast %96 : vector<1x128xf32> to vector<16x128xf32>
    %98 = arith.mulf %95, %97 : vector<16x128xf32>
    %cst_39 = arith.constant dense<0.000000e+00> : vector<16xf32>
    %99 = vector.multi_reduction <add>, %98, %cst_39 [1] : vector<16x128xf32> to vector<16xf32>
    %100 = vector.shape_cast %99 : vector<16xf32> to vector<16x1xf32>
    %c0_40 = arith.constant 0 : index
    %c0_41 = arith.constant 0 : index
    %101 = vector.load %arg13[%c0_40, %c0_41] : memref<1x1xf32, #tpu.memory_space<vmem>>, vector<1x1xf32>
    %102 = vector.broadcast %101 : vector<1x1xf32> to vector<16x1xf32>
    %103 = arith.addf %100, %102 : vector<16x1xf32>
    %cst_42 = arith.constant 0.000000e+00 : f32
    %104 = vector.broadcast %cst_42 : f32 to vector<16x1xf32>
    %105 = arith.subf %104, %103 : vector<16x1xf32>
    %106 = math.exp %105 : vector<16x1xf32>
    %cst_43 = arith.constant 1.000000e+00 : f32
    %107 = vector.broadcast %cst_43 : f32 to vector<16x1xf32>
    %108 = arith.addf %107, %106 : vector<16x1xf32>
    %cst_44 = arith.constant 1.000000e+00 : f32
    %109 = vector.broadcast %cst_44 : f32 to vector<16x1xf32>
    %110 = arith.divf %109, %108 : vector<16x1xf32>
    %c0_45 = arith.constant 0 : index
    %c0_46 = arith.constant 0 : index
    %111 = vector.load %arg14[%c0_45, %c0_46] : memref<16x1xf32, #tpu.memory_space<vmem>>, vector<16x1xf32>
    tpu.vector_store %arg14[%c0_45, %c0_46], %110 {strides = array<i32>} : memref<16x1xf32, #tpu.memory_space<vmem>>, vector<16x1xf32>,
    return
  }
  func.func @transform_0(%arg0: i32) -> (i32, i32) {
    %c0_i32 = arith.constant 0 : i32
    %c0_i32_0 = arith.constant 0 : i32
    return %arg0, %c0_i32 : i32, i32
  }
  func.func @transform_1(%arg0: i32) -> (i32, i32) {
    %c0_i32 = arith.constant 0 : i32
    %c0_i32_0 = arith.constant 0 : i32
    %c0_i32_1 = arith.constant 0 : i32
    return %c0_i32, %c0_i32_0 : i32, i32
  }
  func.func @transform_2(%arg0: i32) -> (i32, i32) {
    %c0_i32 = arith.constant 0 : i32
    %c0_i32_0 = arith.constant 0 : i32
    %c0_i32_1 = arith.constant 0 : i32
    return %c0_i32, %c0_i32_0 : i32, i32
  }
  func.func @transform_3(%arg0: i32) -> (i32, i32) {
    %c0_i32 = arith.constant 0 : i32
    %c0_i32_0 = arith.constant 0 : i32
    %c0_i32_1 = arith.constant 0 : i32
    return %c0_i32, %c0_i32_0 : i32, i32
  }
  func.func @transform_4(%arg0: i32) -> (i32, i32) {
    %c0_i32 = arith.constant 0 : i32
    %c0_i32_0 = arith.constant 0 : i32
    %c0_i32_1 = arith.constant 0 : i32
    return %c0_i32, %c0_i32_0 : i32, i32
  }
  func.func @transform_5(%arg0: i32) -> (i32, i32) {
    %c0_i32 = arith.constant 0 : i32
    %c0_i32_0 = arith.constant 0 : i32
    %c0_i32_1 = arith.constant 0 : i32
    return %c0_i32, %c0_i32_0 : i32, i32
  }
  func.func @transform_6(%arg0: i32) -> (i32, i32) {
    %c0_i32 = arith.constant 0 : i32
    %c0_i32_0 = arith.constant 0 : i32
    %c0_i32_1 = arith.constant 0 : i32
    return %c0_i32, %c0_i32_0 : i32, i32
  }
  func.func @transform_7(%arg0: i32) -> (i32, i32) {
    %c0_i32 = arith.constant 0 : i32
    %c0_i32_0 = arith.constant 0 : i32
    %c0_i32_1 = arith.constant 0 : i32
    return %c0_i32, %c0_i32_0 : i32, i32
  }
  func.func @transform_8(%arg0: i32) -> (i32, i32) {
    %c0_i32 = arith.constant 0 : i32
    %c0_i32_0 = arith.constant 0 : i32
    %c0_i32_1 = arith.constant 0 : i32
    return %c0_i32, %c0_i32_0 : i32, i32
  }
  func.func @transform_9(%arg0: i32) -> (i32, i32) {
    %c0_i32 = arith.constant 0 : i32
    %c0_i32_0 = arith.constant 0 : i32
    %c0_i32_1 = arith.constant 0 : i32
    return %c0_i32, %c0_i32_0 : i32, i32
  }
  func.func @transform_10(%arg0: i32) -> (i32, i32) {
    %c0_i32 = arith.constant 0 : i32
    %c0_i32_0 = arith.constant 0 : i32
    %c0_i32_1 = arith.constant 0 : i32
    return %c0_i32, %c0_i32_0 : i32, i32
  }
  func.func @transform_11(%arg0: i32) -> (i32, i32) {
    %c0_i32 = arith.constant 0 : i32
    %c0_i32_0 = arith.constant 0 : i32
    %c0_i32_1 = arith.constant 0 : i32
    return %c0_i32, %c0_i32_0 : i32, i32
  }
  func.func @transform_12(%arg0: i32) -> (i32, i32) {
    %c0_i32 = arith.constant 0 : i32
    %c0_i32_0 = arith.constant 0 : i32
    %c0_i32_1 = arith.constant 0 : i32
    return %c0_i32, %c0_i32_0 : i32, i32
  }
  func.func @transform_13(%arg0: i32) -> (i32, i32) {
    %c0_i32 = arith.constant 0 : i32
    %c0_i32_0 = arith.constant 0 : i32
    return %arg0, %c0_i32 : i32, i32
  }
}

</mosaic_0001>

<bundles_post_ra>
// kernel: net_forward.1
= control target key start
LH: loop header
LB: loop body
LE: loop exit
PB: predicated region body
PF: predicated region fallthrough
CT: control target
= control target key end

     0   :  { %s7663_s0 = inlined_call_operand.vmem [shape: bf16[16,1024], index: 0, kind: input, shape index: {}]   ;;  %s7664_s1 = inlined_call_operand.hbm [shape: bf16[384,512], index: 1, kind: input, shape index: {}]   ;;  %s7665_s2 = inlined_call_operand.hbm [shape: bf16[512,512], index: 2, kind: input, shape index: {}]   ;;  %s7666_s3 = inlined_call_operand.hbm [shape: bf16[512,512], index: 3, kind: input, shape index: {}]   ;;  %s7667_s4 = inlined_call_operand.hbm [shape: bf16[384,512], index: 4, kind: input, shape index: {}]   ;;  %s7668_s5 = inlined_call_operand.vmem [shape: f32[1,128], index: 5, kind: input, shape index: {}]   ;;  %s7669_s6 = inlined_call_operand.hbm [shape: bf16[384,512], index: 6, kind: input, shape index: {}]   ;;  %s7670_s7 = inlined_call_operand.hbm [shape: bf16[384,512], index: 7, kind: input, shape index: {}]   ;;  %s7671_s8 = inlined_call_operand.vmem [shape: f32[1,128], index: 8, kind: input, shape index: {}]   ;;  %s7672_s9 = inlined_call_operand.vmem [shape: f32[256,128], index: 9, kind: input, shape index: {}]   ;;  %s7673_s10 = inlined_call_operand.vmem [shape: f32[1,128], index: 10, kind: input, shape index: {}]   ;;  %s7674_s11 = inlined_call_operand.vmem [shape: f32[1,128], index: 11, kind: input, shape index: {}]   ;;  %s7675_s12 = inlined_call_operand.<no memory space> [shape: f32[1,1], index: 12, kind: input, shape index: {}]   ;;  %s7676_s13 = inlined_call_operand.vmem [shape: f32[16,1], index: 13, kind: output, shape index: {}]  }
   0x1   :  { %v18_v0 = vstv %s7675_s12 }
   0x2   :  { %19 = vst [vmem:[#allocation2] sm:$0x1] %v18_v0 }
   0x3   :  { %20 = vsyncpa [#allocation4], 0 }
   0x4   :  { %21 = vsyncpa [#allocation6], 0 }
   0x5   :  { %22 = vsyncpa [#allocation9], 0 }
   0x6   :  { %23 = vsyncpa [#allocation12], 0  ;;  %s7239_s27 = smov [#allocation5]   ;;  %s7240_s29 = smov [#allocation8]  }
   0x7   :  { %s43_s28 = sshll.u32 %s7239_s27, 4  ;;  %s67_s30 = sshll.u32 %s7240_s29, 4  ;;  %s44_s28 = int_to_ptr.vmem [resolvable:$true] %s43_s28  ;;  %s7321_s30 = int_to_ptr.vmem [resolvable:$true] %s67_s30 }
   0x8   :  { %s7099_s16 = scalar_lea.hbm %s7665_s2, 16384 }
   0x9   :  { %p7100_p0 = scmp.ne.s32.totalorder %s7665_s2, %s7099_s16  ;;  %p7103_p1 = scmp.lt.u32.totalorder %s7099_s16, %s7665_s2 }
   0xb   :  { %p7105_p2 = pnand %p7103_p1, %p7100_p0 }
   0xd   :  { %7108 = shalt.err (!%p7105_p2)
}
   0xe   :  { %s7109_s20 = scalar_lea.vmem %s44_s28, 16384  ;;  %p7114_p4 = scmp.lt.s32.totalorder %s44_s28, %s44_s28 }
   0xf   :  { %p7110_p3 = scmp.ne.s32.totalorder %s44_s28, %s7109_s20  ;;  %p7115_p5 = scmp.lt.s32.totalorder %s7109_s20, %s7109_s20 }
  0x11   :  { %p7116_p6 = por %p7115_p5, %p7114_p4 }
  0x13   :  { %p7117_p7 = pnand %p7116_p6, %p7110_p3 }
  0x15   :  { %7120 = shalt.err (!%p7117_p7)
}
  0x16   :  { %s7241_s21 = smov 256   ;;  %s7242_s22 = smov 16  }
  0x17   :  { %49 = dma.hbm_to_vmem [thread:$0]  %s7665_s2, 16384, %s44_s28, [#allocation6], %s7241_s21, %s7241_s21, %s7242_s22  }
  0x18   :  { %s7121_s27 = scalar_lea.hbm %s7667_s4, 12288 }
  0x19   :  { %p7122_p8 = scmp.ne.s32.totalorder %s7667_s4, %s7121_s27  ;;  %p7125_p9 = scmp.lt.u32.totalorder %s7121_s27, %s7667_s4 }
  0x1b   :  { %p7127_p10 = pnand %p7125_p9, %p7122_p8 }
  0x1d   :  { %7130 = shalt.err (!%p7127_p10)
}
  0x1e   :  { %s7131_s17 = scalar_lea.vmem %s7321_s30, 12288  ;;  %p7136_p12 = scmp.lt.s32.totalorder %s7321_s30, %s7321_s30 }
  0x1f   :  { %p7132_p11 = scmp.ne.s32.totalorder %s7321_s30, %s7131_s17  ;;  %p7137_p13 = scmp.lt.s32.totalorder %s7131_s17, %s7131_s17 }
  0x21   :  { %p7138_p0 = por %p7137_p13, %p7136_p12 }
  0x23   :  { %p7139_p1 = pnand %p7138_p0, %p7132_p11 }
  0x25   :  { %7142 = shalt.err (!%p7139_p1)
}
  0x26   :  { %73 = dma.hbm_to_vmem [thread:$0]  %s7667_s4, 12288, %s7321_s30, [#allocation9], %s7241_s21, %s7241_s21, %s7242_s22  }
  0x27   :  { %s7243_s18 = smov [#allocation3]   ;;  %s7244_s19 = smov [#allocation7]  }
  0x28   :  { %s31_s12 = sshll.u32 %s7243_s18, 4  ;;  %s55_s20 = sshll.u32 %s7244_s19, 4  ;;  %s32_s12 = int_to_ptr.vmem [resolvable:$true] %s31_s12  ;;  %s7358_s20 = int_to_ptr.vmem [resolvable:$true] %s55_s20 }
  0x29   :  { %s7143_s25 = scalar_lea.hbm %s7664_s1, 12288 }
  0x2a   :  { %p7144_p2 = scmp.ne.s32.totalorder %s7664_s1, %s7143_s25  ;;  %p7147_p3 = scmp.lt.u32.totalorder %s7143_s25, %s7664_s1 }
  0x2c   :  { %p7149_p4 = pnand %p7147_p3, %p7144_p2 }
  0x2e   :  { %7152 = shalt.err (!%p7149_p4)
}
  0x2f   :  { %s7153_s4 = scalar_lea.vmem %s32_s12, 12288  ;;  %p7158_p6 = scmp.lt.s32.totalorder %s32_s12, %s32_s12 }
  0x30   :  { %p7154_p5 = scmp.ne.s32.totalorder %s32_s12, %s7153_s4  ;;  %p7159_p7 = scmp.lt.s32.totalorder %s7153_s4, %s7153_s4 }
  0x32   :  { %p7160_p8 = por %p7159_p7, %p7158_p6 }
  0x34   :  { %p7161_p9 = pnand %p7160_p8, %p7154_p5 }
  0x36   :  { %7164 = shalt.err (!%p7161_p9)
}
  0x37   :  { %37 = dma.hbm_to_vmem [thread:$0]  %s7664_s1, 12288, %s32_s12, [#allocation4], %s7241_s21, %s7241_s21, %s7242_s22  }
  0x38   :  { %s7165_s2 = scalar_lea.hbm %s7666_s3, 16384 }
  0x39   :  { %p7166_p10 = scmp.ne.s32.totalorder %s7666_s3, %s7165_s2  ;;  %p7169_p11 = scmp.lt.u32.totalorder %s7165_s2, %s7666_s3 }
  0x3b   :  { %p7171_p12 = pnand %p7169_p11, %p7166_p10 }
  0x3d   :  { %7174 = shalt.err (!%p7171_p12)
}
  0x3e   :  { %s7175_s24 = scalar_lea.vmem %s7358_s20, 16384  ;;  %p7180_p0 = scmp.lt.s32.totalorder %s7358_s20, %s7358_s20 }
  0x3f   :  { %p7176_p13 = scmp.ne.s32.totalorder %s7358_s20, %s7175_s24  ;;  %p7181_p1 = scmp.lt.s32.totalorder %s7175_s24, %s7175_s24 }
  0x41   :  { %p7182_p2 = por %p7181_p1, %p7180_p0 }
  0x43   :  { %p7183_p3 = pnand %p7182_p2, %p7176_p13 }
  0x45   :  { %7186 = shalt.err (!%p7183_p3)
}
  0x46   :  { %61 = dma.hbm_to_vmem [thread:$0]  %s7666_s3, 16384, %s7358_s20, [#allocation6], %s7241_s21, %s7241_s21, %s7242_s22  }
  0x47   :  { %s7245_s25 = smov [#allocation10]   ;;  %s7246_s27 = smov [#allocation11]  }
  0x48   :  { %s81_s26 = sshll.u32 %s7245_s25, 4  ;;  %s93_s29 = sshll.u32 %s7246_s27, 4  ;;  %s82_s26 = int_to_ptr.vmem [resolvable:$true] %s81_s26  ;;  %s7395_s29 = int_to_ptr.vmem [resolvable:$true] %s93_s29 }
  0x49   :  { %s7187_s30 = scalar_lea.hbm %s7669_s6, 12288 }
  0x4a   :  { %p7188_p4 = scmp.ne.s32.totalorder %s7669_s6, %s7187_s30  ;;  %p7191_p5 = scmp.lt.u32.totalorder %s7187_s30, %s7669_s6 }
  0x4c   :  { %p7193_p6 = pnand %p7191_p5, %p7188_p4 }
  0x4e   :  { %7196 = shalt.err (!%p7193_p6)
}
  0x4f   :  { %s7197_s3 = scalar_lea.vmem %s82_s26, 12288  ;;  %p7202_p8 = scmp.lt.s32.totalorder %s82_s26, %s82_s26 }
  0x50   :  { %p7198_p7 = scmp.ne.s32.totalorder %s82_s26, %s7197_s3  ;;  %p7203_p9 = scmp.lt.s32.totalorder %s7197_s3, %s7197_s3 }
  0x52   :  { %p7204_p10 = por %p7203_p9, %p7202_p8 }
  0x54   :  { %p7205_p11 = pnand %p7204_p10, %p7198_p7 }
  0x56   :  { %7208 = shalt.err (!%p7205_p11)
}
  0x57   :  { %87 = dma.hbm_to_vmem [thread:$0]  %s7669_s6, 12288, %s82_s26, [#allocation9], %s7241_s21, %s7241_s21, %s7242_s22  }
  0x58   :  { %s7209_s23 = scalar_lea.hbm %s7670_s7, 12288 }
  0x59   :  { %p7210_p12 = scmp.ne.s32.totalorder %s7670_s7, %s7209_s23  ;;  %p7213_p13 = scmp.lt.u32.totalorder %s7209_s23, %s7670_s7 }
  0x5b   :  { %p7215_p0 = pnand %p7213_p13, %p7210_p12 }
  0x5d   :  { %7218 = shalt.err (!%p7215_p0)
}
  0x5e   :  { %s7219_s27 = scalar_lea.vmem %s7395_s29, 12288  ;;  %p7224_p2 = scmp.lt.s32.totalorder %s7395_s29, %s7395_s29 }
  0x5f   :  { %p7220_p1 = scmp.ne.s32.totalorder %s7395_s29, %s7219_s27  ;;  %p7225_p3 = scmp.lt.s32.totalorder %s7219_s27, %s7219_s27 }
  0x61   :  { %p7226_p4 = por %p7225_p3, %p7224_p2 }
  0x63   :  { %p7227_p5 = pnand %p7226_p4, %p7220_p1 }
  0x65   :  { %7230 = shalt.err (!%p7227_p5)
}
  0x66   :  { %99 = dma.hbm_to_vmem [thread:$0]  %s7670_s7, 12288, %s7395_s29, [#allocation12], %s7241_s21, %s7241_s21, %s7242_s22  }
  0x67   :  { %7231 = dma.done.wait [#allocation4], 12288  }
  0x68   :  { %7232 = vsyncadd [#allocation4], 4294955008 }
  0x69   :  { %7233 = dma.done.wait [#allocation6], 32768  }
  0x6a   :  { %7234 = vsyncadd [#allocation6], 4294934528 }
  0x6b   :  { %7235 = dma.done.wait [#allocation9], 24576  }
  0x6c   :  { %7236 = vsyncadd [#allocation9], 4294942720 }
  0x6d   :  { %7237 = dma.done.wait [#allocation12], 12288  }
  0x6e   :  { %7238 = vsyncadd [#allocation12], 4294955008  ;;  %v6130_v1 = vld [vmem:[#allocation3 + $0x4] ss:$16 sps:$4 sm:$0xff]   ;;  %v6132_v2 = vld [vmem:[#allocation3 + $0xc] ss:$16 sps:$4 sm:$0xff]  }
  0x6f   :  { %726 = vmatprep.subr.bf16.mxu0 %v6130_v1  ;;  %v6134_v3 = vld [vmem:[#allocation3] ss:$16 sps:$4 sm:$0xff]   ;;  %v6135_v4 = vld [vmem:[#allocation3 + $0x8] ss:$16 sps:$4 sm:$0xff]   ;;  %812 = vmatprep.subr.bf16.mxu1 %v6132_v2  ;;  %v6136_v5 = vld [vmem:[#allocation3 + $0x24] ss:$16 sps:$4 sm:$0xff]  }
  0x70   :  { %727 = vmatpush1.bf16.msra.mxu0 %v6134_v3  ;;  %813 = vmatpush1.bf16.msra.mxu1 %v6135_v4  ;;  %v6138_v6 = vld [vmem:[#allocation3 + $0x2c] ss:$16 sps:$4 sm:$0xff]   ;;  %v6140_v7 = vld [vmem:[#allocation3 + $0x20] ss:$16 sps:$4 sm:$0xff]   ;;  %v6141_v8 = vld [vmem:[#allocation3 + $0x28] ss:$16 sps:$4 sm:$0xff]  }
  0x71   :  { %728 = vmatprep.subr.bf16.mxu0 %v6136_v5  ;;  %814 = vmatprep.subr.bf16.mxu1 %v6138_v6  ;;  %v6142_v9 = vld [vmem:[#allocation3 + $0x44] ss:$16 sps:$4 sm:$0xff]   ;;  %v6144_v10 = vld [vmem:[#allocation3 + $0x4c] ss:$16 sps:$4 sm:$0xff]   ;;  %v6146_v11 = vld [vmem:[#allocation3 + $0x40] ss:$16 sps:$4 sm:$0xff]  }
  0x72   :  { %v6147_v12 = vld [vmem:[#allocation3 + $0x48] ss:$16 sps:$4 sm:$0xff]   ;;  %v6148_v13 = vld [vmem:[#allocation3 + $0x64] ss:$16 sps:$4 sm:$0xff]   ;;  %v6150_v14 = vld [vmem:[#allocation3 + $0x6c] ss:$16 sps:$4 sm:$0xff]  }
  0x73   :  { %v6152_v15 = vld [vmem:[#allocation3 + $0x60] ss:$16 sps:$4 sm:$0xff]   ;;  %v6153_v16 = vld [vmem:[#allocation3 + $0x68] ss:$16 sps:$4 sm:$0xff]   ;;  %v6154_v17 = vld [vmem:[#allocation3 + $0x84] ss:$16 sps:$4 sm:$0xff]  }
  0x74   :  { %729 = vmatpush1.bf16.msra.mxu0 %v6140_v7  ;;  %815 = vmatpush1.bf16.msra.mxu1 %v6141_v8  ;;  %v6156_v18 = vld [vmem:[#allocation3 + $0x8c] ss:$16 sps:$4 sm:$0xff]   ;;  %v6158_v19 = vld [vmem:[#allocation3 + $0x80] ss:$16 sps:$4 sm:$0xff]   ;;  %v6159_v20 = vld [vmem:[#allocation3 + $0x88] ss:$16 sps:$4 sm:$0xff]  }
  0x75   :  { %730 = vmatprep.subr.bf16.mxu0 %v6142_v9  ;;  %816 = vmatprep.subr.bf16.mxu1 %v6144_v10  ;;  %v6160_v21 = vld [vmem:[#allocation3 + $0xa4] ss:$16 sps:$4 sm:$0xff]   ;;  %v6162_v22 = vld [vmem:[#allocation3 + $0xac] ss:$16 sps:$4 sm:$0xff]   ;;  %v6164_v23 = vld [vmem:[#allocation3 + $0xa0] ss:$16 sps:$4 sm:$0xff]  }
  0x76   :  { %v6165_v24 = vld [vmem:[#allocation3 + $0xa8] ss:$16 sps:$4 sm:$0xff]   ;;  %v6166_v25 = vld [vmem:[#allocation3 + $0xc4] ss:$16 sps:$4 sm:$0xff]   ;;  %v6168_v26 = vld [vmem:[#allocation3 + $0xcc] ss:$16 sps:$4 sm:$0xff]  }
  0x77   :  { %v6170_v27 = vld [vmem:[#allocation3 + $0xc0] ss:$16 sps:$4 sm:$0xff]   ;;  %v6171_v28 = vld [vmem:[#allocation3 + $0xc8] ss:$16 sps:$4 sm:$0xff]   ;;  %v6172_v29 = vld [vmem:[#allocation3 + $0xe4] ss:$16 sps:$4 sm:$0xff]  }
  0x78   :  { %731 = vmatpush1.bf16.msra.mxu0 %v6146_v11  ;;  %817 = vmatpush1.bf16.msra.mxu1 %v6147_v12  ;;  %v6174_v30 = vld [vmem:[#allocation3 + $0xec] ss:$16 sps:$4 sm:$0xff]   ;;  %v6176_v31 = vld [vmem:[#allocation3 + $0xe0] ss:$16 sps:$4 sm:$0xff]   ;;  %v6177_v32 = vld [vmem:[#allocation3 + $0xe8] ss:$16 sps:$4 sm:$0xff]  }
  0x79   :  { %732 = vmatprep.subr.bf16.mxu0 %v6148_v13  ;;  %818 = vmatprep.subr.bf16.mxu1 %v6150_v14  ;;  %v6178_v33 = vld [vmem:[#allocation3 + $0x104] ss:$16 sps:$4 sm:$0xff]   ;;  %v6180_v34 = vld [vmem:[#allocation3 + $0x10c] ss:$16 sps:$4 sm:$0xff]   ;;  %v6182_v35 = vld [vmem:[#allocation3 + $0x100] ss:$16 sps:$4 sm:$0xff]  }
  0x7a   :  { %v6183_v36 = vld [vmem:[#allocation3 + $0x108] ss:$16 sps:$4 sm:$0xff]   ;;  %v6184_v37 = vld [vmem:[#allocation3 + $0x124] ss:$16 sps:$4 sm:$0xff]   ;;  %v6186_v38 = vld [vmem:[#allocation3 + $0x12c] ss:$16 sps:$4 sm:$0xff]  }
  0x7b   :  { %v6188_v39 = vld [vmem:[#allocation3 + $0x120] ss:$16 sps:$4 sm:$0xff]   ;;  %v6189_v40 = vld [vmem:[#allocation3 + $0x128] ss:$16 sps:$4 sm:$0xff]   ;;  %v6190_v41 = vld [vmem:[#allocation3 + $0x144] ss:$16 sps:$4 sm:$0xff]  }
  0x7c   :  { %733 = vmatpush1.bf16.msra.mxu0 %v6152_v15  ;;  %819 = vmatpush1.bf16.msra.mxu1 %v6153_v16  ;;  %v6192_v42 = vld [vmem:[#allocation3 + $0x14c] ss:$16 sps:$4 sm:$0xff]   ;;  %v6194_v43 = vld [vmem:[#allocation3 + $0x140] ss:$16 sps:$4 sm:$0xff]   ;;  %v6195_v44 = vld [vmem:[#allocation3 + $0x148] ss:$16 sps:$4 sm:$0xff]  }
  0x7d   :  { %734 = vmatprep.subr.bf16.mxu0 %v6154_v17  ;;  %820 = vmatprep.subr.bf16.mxu1 %v6156_v18  ;;  %v6196_v45 = vld [vmem:[#allocation3 + $0x164] ss:$16 sps:$4 sm:$0xff]   ;;  %v6198_v46 = vld [vmem:[#allocation3 + $0x16c] ss:$16 sps:$4 sm:$0xff]   ;;  %v6200_v49 = vld [vmem:[#allocation3 + $0x160] ss:$16 sps:$4 sm:$0xff]  }
  0x7e   :  { %v130_v47 = vld [vmem:[%s7663_s0] sm:$0xff]  ;;  %v6201_v50 = vld [vmem:[#allocation3 + $0x168] ss:$16 sps:$4 sm:$0xff]   ;;  %v7247_v15 = vmov 0   ;;  %vm5317_vm0 = vcmask 7168  }
  0x7f   :  { %v132_v48 = vld [vmem:[%s7663_s0 + $0x20] sm:$0xff]  ;;  %v6207_v55 = vld [vmem:[#allocation3 + $0x188] ss:$16 sps:$4 sm:$0xff]  }
  0x80   :  { %735 = vmatpush1.bf16.msra.mxu0 %v6158_v19  ;;  %821 = vmatpush1.bf16.msra.mxu1 %v6159_v20  ;;  %v5329_v51 = vcombine.high %v130_v47, %v132_v48  ;;  %v6202_v52 = vld [vmem:[#allocation3 + $0x184] ss:$16 sps:$4 sm:$0xff]   ;;  %v6204_v53 = vld [vmem:[#allocation3 + $0x18c] ss:$16 sps:$4 sm:$0xff]   ;;  %v6206_v54 = vld [vmem:[#allocation3 + $0x180] ss:$16 sps:$4 sm:$0xff]   ;;  %v5328_v6 = vcombine.low %v130_v47, %v132_v48 }
  0x81   :  { %736 = vmatprep.subr.bf16.mxu0 %v6160_v21  ;;  %822 = vmatprep.subr.bf16.mxu1 %v6162_v22  ;;  %v6208_v56 = vld [vmem:[#allocation3 + $0x1a4] ss:$16 sps:$4 sm:$0xff]   ;;  %v6210_v57 = vld [vmem:[#allocation3 + $0x1ac] ss:$16 sps:$4 sm:$0xff]   ;;  %v6212_v58 = vld [vmem:[#allocation3 + $0x1a0] ss:$16 sps:$4 sm:$0xff]  }
  0x82   :  { %758 = vmatprep.mubr.bf16.mxu0 %v5329_v51  ;;  %844 = vmatprep.mubr.bf16.mxu1 %v5329_v51  ;;  %v6213_v59 = vld [vmem:[#allocation3 + $0x1a8] ss:$16 sps:$4 sm:$0xff]   ;;  %v6214_v60 = vld [vmem:[#allocation3 + $0x1c4] ss:$16 sps:$4 sm:$0xff]   ;;  %v6216_v61 = vld [vmem:[#allocation3 + $0x1cc] ss:$16 sps:$4 sm:$0xff]  }
  0x83   :  { %v6218_v62 = vld [vmem:[#allocation3 + $0x1c0] ss:$16 sps:$4 sm:$0xff]   ;;  %v6219_v63 = vld [vmem:[#allocation3 + $0x1c8] ss:$16 sps:$4 sm:$0xff]   ;;  %v6220_v0 = vld [vmem:[#allocation3 + $0x1e4] ss:$16 sps:$4 sm:$0xff]  }
  0x84   :  { %737 = vmatpush1.bf16.msra.mxu0 %v6164_v23  ;;  %823 = vmatpush1.bf16.msra.mxu1 %v6165_v24  ;;  %v6222_v1 = vld [vmem:[#allocation3 + $0x1ec] ss:$16 sps:$4 sm:$0xff]   ;;  %v6224_v2 = vld [vmem:[#allocation3 + $0x1e0] ss:$16 sps:$4 sm:$0xff]   ;;  %v6225_v3 = vld [vmem:[#allocation3 + $0x1e8] ss:$16 sps:$4 sm:$0xff]  }
  0x85   :  { %738 = vmatprep.subr.bf16.mxu0 %v6166_v25  ;;  %824 = vmatprep.subr.bf16.mxu1 %v6168_v26  ;;  %v6228_v4 = vld [vmem:[#allocation3 + $0x204] ss:$16 sps:$4 sm:$0xff]   ;;  %v6231_v5 = vld [vmem:[#allocation3 + $0x20c] ss:$16 sps:$4 sm:$0xff]   ;;  %v6226_v7 = vld [vmem:[#allocation3 + $0x200] ss:$16 sps:$4 sm:$0xff]  }
  0x86   :  { %v6229_v8 = vld [vmem:[#allocation3 + $0x208] ss:$16 sps:$4 sm:$0xff]   ;;  %v6234_v9 = vld [vmem:[#allocation3 + $0x224] ss:$16 sps:$4 sm:$0xff]   ;;  %v6237_v10 = vld [vmem:[#allocation3 + $0x22c] ss:$16 sps:$4 sm:$0xff]  }
  0x87   :  { %v6232_v11 = vld [vmem:[#allocation3 + $0x220] ss:$16 sps:$4 sm:$0xff]   ;;  %v6235_v12 = vld [vmem:[#allocation3 + $0x228] ss:$16 sps:$4 sm:$0xff]   ;;  %v6240_v13 = vld [vmem:[#allocation3 + $0x244] ss:$16 sps:$4 sm:$0xff]  }
  0x88   :  { %739 = vmatpush1.bf16.msra.mxu0 %v6170_v27  ;;  %825 = vmatpush1.bf16.msra.mxu1 %v6171_v28  ;;  %v6243_v14 = vld [vmem:[#allocation3 + $0x24c] ss:$16 sps:$4 sm:$0xff]   ;;  %v6238_v16 = vld [vmem:[#allocation3 + $0x240] ss:$16 sps:$4 sm:$0xff]   ;;  %v6241_v17 = vld [vmem:[#allocation3 + $0x248] ss:$16 sps:$4 sm:$0xff]  }
  0x89   :  { %740 = vmatprep.subr.bf16.mxu0 %v6172_v29  ;;  %826 = vmatprep.subr.bf16.mxu1 %v6174_v30  ;;  %v6246_v18 = vld [vmem:[#allocation3 + $0x264] ss:$16 sps:$4 sm:$0xff]   ;;  %v6249_v19 = vld [vmem:[#allocation3 + $0x26c] ss:$16 sps:$4 sm:$0xff]   ;;  %v6244_v20 = vld [vmem:[#allocation3 + $0x260] ss:$16 sps:$4 sm:$0xff]  }
  0x8a   :  { %v6247_v21 = vld [vmem:[#allocation3 + $0x268] ss:$16 sps:$4 sm:$0xff]   ;;  %v6252_v22 = vld [vmem:[#allocation3 + $0x284] ss:$16 sps:$4 sm:$0xff]   ;;  %v6255_v23 = vld [vmem:[#allocation3 + $0x28c] ss:$16 sps:$4 sm:$0xff]  }
  0x8b   :  { %v6250_v24 = vld [vmem:[#allocation3 + $0x280] ss:$16 sps:$4 sm:$0xff]   ;;  %v6253_v25 = vld [vmem:[#allocation3 + $0x288] ss:$16 sps:$4 sm:$0xff]   ;;  %v6258_v26 = vld [vmem:[#allocation3 + $0x2a4] ss:$16 sps:$4 sm:$0xff]  }
  0x8c   :  { %741 = vmatpush1.bf16.msra.mxu0 %v6176_v31  ;;  %827 = vmatpush1.bf16.msra.mxu1 %v6177_v32  ;;  %v6261_v27 = vld [vmem:[#allocation3 + $0x2ac] ss:$16 sps:$4 sm:$0xff]   ;;  %v6256_v28 = vld [vmem:[#allocation3 + $0x2a0] ss:$16 sps:$4 sm:$0xff]   ;;  %v6259_v29 = vld [vmem:[#allocation3 + $0x2a8] ss:$16 sps:$4 sm:$0xff]  }
  0x8d   :  { %742 = vmatprep.subr.bf16.mxu0 %v6178_v33  ;;  %828 = vmatprep.subr.bf16.mxu1 %v6180_v34  ;;  %v6264_v30 = vld [vmem:[#allocation3 + $0x2c4] ss:$16 sps:$4 sm:$0xff]   ;;  %v6267_v31 = vld [vmem:[#allocation3 + $0x2cc] ss:$16 sps:$4 sm:$0xff]   ;;  %v6262_v32 = vld [vmem:[#allocation3 + $0x2c0] ss:$16 sps:$4 sm:$0xff]  }
  0x8e   :  { %v6265_v33 = vld [vmem:[#allocation3 + $0x2c8] ss:$16 sps:$4 sm:$0xff]   ;;  %v6270_v34 = vld [vmem:[#allocation3 + $0x2e4] ss:$16 sps:$4 sm:$0xff]   ;;  %v6280_v47 = vld [vmem:[#allocation5 + $0x20] ss:$16 sps:$4 sm:$0xff]  }
  0x8f   :  { %v6283_v48 = vld [vmem:[#allocation5 + $0x28] ss:$16 sps:$4 sm:$0xff]   ;;  %v6286_v51 = vld [vmem:[#allocation5 + $0x40] ss:$16 sps:$4 sm:$0xff]  }
  0x90   :  { %743 = vmatpush1.bf16.msra.mxu0 %v6182_v35  ;;  %829 = vmatpush1.bf16.msra.mxu1 %v6183_v36  ;;  %v6273_v35 = vld [vmem:[#allocation3 + $0x2ec] ss:$16 sps:$4 sm:$0xff]   ;;  %v6268_v36 = vld [vmem:[#allocation3 + $0x2e0] ss:$16 sps:$4 sm:$0xff]  }
  0x91   :  { %744 = vmatprep.subr.bf16.mxu0 %v6184_v37  ;;  %830 = vmatprep.subr.bf16.mxu1 %v6186_v38  ;;  %v6271_v37 = vld [vmem:[#allocation3 + $0x2e8] ss:$16 sps:$4 sm:$0xff]  }
  0x92   :  { %v131_v38 = vld [vmem:[%s7663_s0 + $0x8] sm:$0xf] }
  0x94   :  { %745 = vmatpush1.bf16.msra.mxu0 %v6188_v39  ;;  %831 = vmatpush1.bf16.msra.mxu1 %v6189_v40  ;;  %v133_v39 = vld [vmem:[%s7663_s0 + $0x28] sm:$0xf] }
  0x95   :  { %746 = vmatprep.subr.bf16.mxu0 %v6190_v41  ;;  %832 = vmatprep.subr.bf16.mxu1 %v6192_v42  ;;  %v6276_v40 = vld [vmem:[#allocation5 + $0x4] ss:$16 sps:$4 sm:$0xff]   ;;  %v6279_v41 = vld [vmem:[#allocation5 + $0xc] ss:$16 sps:$4 sm:$0xff]   ;;  %v5330_v42 = vcombine.low %v131_v38, %v133_v39  ;;  %v6358_v39 = vld [vmem:[#allocation5 + $0x1c0] ss:$16 sps:$4 sm:$0xff]  }
  0x96   :  { %v6363_v38 = vld [vmem:[#allocation5 + $0x1cc] ss:$16 sps:$4 sm:$0xff]  }
  0x98   :  { %747 = vmatpush1.bf16.msra.mxu0 %v6194_v43  ;;  %833 = vmatpush1.bf16.msra.mxu1 %v6195_v44  ;;  %v6274_v43 = vld [vmem:[#allocation5] ss:$16 sps:$4 sm:$0xff]   ;;  %v6277_v44 = vld [vmem:[#allocation5 + $0x8] ss:$16 sps:$4 sm:$0xff]  }
  0x99   :  { %748 = vmatprep.subr.bf16.mxu0 %v6196_v45  ;;  %834 = vmatprep.subr.bf16.mxu1 %v6198_v46  ;;  %v6282_v45 = vld [vmem:[#allocation5 + $0x24] ss:$16 sps:$4 sm:$0xff]   ;;  %v6285_v46 = vld [vmem:[#allocation5 + $0x2c] ss:$16 sps:$4 sm:$0xff]  }
  0x9c   :  { %749 = vmatpush1.bf16.msra.mxu0 %v6200_v49  ;;  %835 = vmatpush1.bf16.msra.mxu1 %v6201_v50  ;;  %v6288_v49 = vld [vmem:[#allocation5 + $0x44] ss:$16 sps:$4 sm:$0xff]   ;;  %v6291_v50 = vld [vmem:[#allocation5 + $0x4c] ss:$16 sps:$4 sm:$0xff]  }
  0x9d   :  { %750 = vmatprep.subr.bf16.mxu0 %v6202_v52  ;;  %836 = vmatprep.subr.bf16.mxu1 %v6204_v53  ;;  %v6289_v52 = vld [vmem:[#allocation5 + $0x48] ss:$16 sps:$4 sm:$0xff]   ;;  %v6294_v53 = vld [vmem:[#allocation5 + $0x64] ss:$16 sps:$4 sm:$0xff]  }
  0xa0   :  { %751 = vmatpush1.bf16.msra.mxu0 %v6206_v54  ;;  %837 = vmatpush1.bf16.msra.mxu1 %v6207_v55  ;;  %v6297_v54 = vld [vmem:[#allocation5 + $0x6c] ss:$16 sps:$4 sm:$0xff]   ;;  %v6292_v55 = vld [vmem:[#allocation5 + $0x60] ss:$16 sps:$4 sm:$0xff]  }
  0xa1   :  { %752 = vmatprep.subr.bf16.mxu0 %v6208_v56  ;;  %838 = vmatprep.subr.bf16.mxu1 %v6210_v57  ;;  %v6295_v56 = vld [vmem:[#allocation5 + $0x68] ss:$16 sps:$4 sm:$0xff]  }
  0xa2   :  { %v7449_v57 = vld [vmem:[%s7663_s0 + $0x4] sm:$0xff] }
  0xa4   :  { %753 = vmatpush1.bf16.msra.mxu0 %v6212_v58  ;;  %839 = vmatpush1.bf16.msra.mxu1 %v6213_v59  ;;  %v7454_v58 = vld [vmem:[%s7663_s0 + $0x24] sm:$0xff] }
  0xa5   :  { %754 = vmatprep.subr.bf16.mxu0 %v6214_v60  ;;  %840 = vmatprep.subr.bf16.mxu1 %v6216_v61  ;;  %v6300_v59 = vld [vmem:[#allocation5 + $0x84] ss:$16 sps:$4 sm:$0xff]   ;;  %v6303_v60 = vld [vmem:[#allocation5 + $0x8c] ss:$16 sps:$4 sm:$0xff]   ;;  %v5429_v61 = vcombine.high %v7449_v57, %v7454_v58 }
  0xa8   :  { %755 = vmatpush1.bf16.msra.mxu0 %v6218_v62  ;;  %841 = vmatpush1.bf16.msra.mxu1 %v6219_v63  ;;  %v6298_v62 = vld [vmem:[#allocation5 + $0x80] ss:$16 sps:$4 sm:$0xff]   ;;  %v6301_v63 = vld [vmem:[#allocation5 + $0x88] ss:$16 sps:$4 sm:$0xff]  }
  0xa9   :  { %756 = vmatprep.subr.bf16.mxu0 %v6220_v0  ;;  %842 = vmatprep.subr.bf16.mxu1 %v6222_v1  ;;  %v6306_v0 = vld [vmem:[#allocation5 + $0xa4] ss:$16 sps:$4 sm:$0xff]   ;;  %v6309_v1 = vld [vmem:[#allocation5 + $0xac] ss:$16 sps:$4 sm:$0xff]  }
  0xac   :  { %757 = vmatpush1.bf16.msra.mxu0 %v6224_v2  ;;  %843 = vmatpush1.bf16.msra.mxu1 %v6225_v3  ;;  %v6304_v2 = vld [vmem:[#allocation5 + $0xa0] ss:$16 sps:$4 sm:$0xff]   ;;  %v6307_v3 = vld [vmem:[#allocation5 + $0xa8] ss:$16 sps:$4 sm:$0xff]  }
  0xad   :  { %769 = vmatprep.subr.bf16.mxu0 %v6228_v4  ;;  %855 = vmatprep.subr.bf16.mxu1 %v6231_v5  ;;  %v6312_v4 = vld [vmem:[#allocation5 + $0xc4] ss:$16 sps:$4 sm:$0xff]   ;;  %v6315_v5 = vld [vmem:[#allocation5 + $0xcc] ss:$16 sps:$4 sm:$0xff]  }
  0xaf   :  { %759 = vmatmul.mubr.bf16.vlgmr.msra.gmra.mrb[0].mxu0 %v5328_v6  ;;  %845 = vmatmul.mubr.bf16.vlgmr.msra.gmra.mrb[0].mxu1 %v5328_v6  ;;  %v6310_v6 = vld [vmem:[#allocation5 + $0xc0] ss:$16 sps:$4 sm:$0xff]  }
  0xb0   :  { %770 = vmatpush1.bf16.msra.mxu0 %v6226_v7  ;;  %856 = vmatpush1.bf16.msra.mxu1 %v6229_v8  ;;  %v6313_v7 = vld [vmem:[#allocation5 + $0xc8] ss:$16 sps:$4 sm:$0xff]   ;;  %v6318_v8 = vld [vmem:[#allocation5 + $0xe4] ss:$16 sps:$4 sm:$0xff]  }
  0xb1   :  { %771 = vmatprep.subr.bf16.mxu0 %v6234_v9  ;;  %857 = vmatprep.subr.bf16.mxu1 %v6237_v10  ;;  %v6321_v9 = vld [vmem:[#allocation5 + $0xec] ss:$16 sps:$4 sm:$0xff]   ;;  %v6316_v10 = vld [vmem:[#allocation5 + $0xe0] ss:$16 sps:$4 sm:$0xff]  }
  0xb2   :  { %801 = vmatprep.mubr.bf16.mxu0 %v7247_v15  ;;  %887 = vmatprep.mubr.bf16.mxu1 %v7247_v15 }
  0xb4   :  { %772 = vmatpush1.bf16.msra.mxu0 %v6232_v11  ;;  %858 = vmatpush1.bf16.msra.mxu1 %v6235_v12  ;;  %v6319_v11 = vld [vmem:[#allocation5 + $0xe8] ss:$16 sps:$4 sm:$0xff]   ;;  %v6324_v12 = vld [vmem:[#allocation5 + $0x104] ss:$16 sps:$4 sm:$0xff]  }
  0xb5   :  { %773 = vmatprep.subr.bf16.mxu0 %v6240_v13  ;;  %859 = vmatprep.subr.bf16.mxu1 %v6243_v14  ;;  %v6327_v13 = vld [vmem:[#allocation5 + $0x10c] ss:$16 sps:$4 sm:$0xff]   ;;  %v6322_v14 = vld [vmem:[#allocation5 + $0x100] ss:$16 sps:$4 sm:$0xff]  }
  0xb8   :  { %774 = vmatpush1.bf16.msra.mxu0 %v6238_v16  ;;  %860 = vmatpush1.bf16.msra.mxu1 %v6241_v17  ;;  %v6325_v16 = vld [vmem:[#allocation5 + $0x108] ss:$16 sps:$4 sm:$0xff]   ;;  %v6330_v17 = vld [vmem:[#allocation5 + $0x124] ss:$16 sps:$4 sm:$0xff]  }
  0xb9   :  { %775 = vmatprep.subr.bf16.mxu0 %v6246_v18  ;;  %861 = vmatprep.subr.bf16.mxu1 %v6249_v19  ;;  %v6333_v18 = vld [vmem:[#allocation5 + $0x12c] ss:$16 sps:$4 sm:$0xff]   ;;  %v6328_v19 = vld [vmem:[#allocation5 + $0x120] ss:$16 sps:$4 sm:$0xff]  }
  0xbc   :  { %776 = vmatpush1.bf16.msra.mxu0 %v6244_v20  ;;  %862 = vmatpush1.bf16.msra.mxu1 %v6247_v21  ;;  %v6331_v20 = vld [vmem:[#allocation5 + $0x128] ss:$16 sps:$4 sm:$0xff]   ;;  %v6336_v21 = vld [vmem:[#allocation5 + $0x144] ss:$16 sps:$4 sm:$0xff]  }
  0xbd   :  { %777 = vmatprep.subr.bf16.mxu0 %v6252_v22  ;;  %863 = vmatprep.subr.bf16.mxu1 %v6255_v23  ;;  %v6339_v22 = vld [vmem:[#allocation5 + $0x14c] ss:$16 sps:$4 sm:$0xff]   ;;  %v6334_v23 = vld [vmem:[#allocation5 + $0x140] ss:$16 sps:$4 sm:$0xff]  }
  0xc0   :  { %778 = vmatpush1.bf16.msra.mxu0 %v6250_v24  ;;  %864 = vmatpush1.bf16.msra.mxu1 %v6253_v25  ;;  %v6337_v24 = vld [vmem:[#allocation5 + $0x148] ss:$16 sps:$4 sm:$0xff]   ;;  %v6342_v25 = vld [vmem:[#allocation5 + $0x164] ss:$16 sps:$4 sm:$0xff]  }
  0xc1   :  { %779 = vmatprep.subr.bf16.mxu0 %v6258_v26  ;;  %865 = vmatprep.subr.bf16.mxu1 %v6261_v27  ;;  %v6345_v26 = vld [vmem:[#allocation5 + $0x16c] ss:$16 sps:$4 sm:$0xff]   ;;  %v6340_v27 = vld [vmem:[#allocation5 + $0x160] ss:$16 sps:$4 sm:$0xff]  }
  0xc4   :  { %780 = vmatpush1.bf16.msra.mxu0 %v6256_v28  ;;  %866 = vmatpush1.bf16.msra.mxu1 %v6259_v29  ;;  %v6343_v28 = vld [vmem:[#allocation5 + $0x168] ss:$16 sps:$4 sm:$0xff]   ;;  %v6348_v29 = vld [vmem:[#allocation5 + $0x184] ss:$16 sps:$4 sm:$0xff]  }
  0xc5   :  { %781 = vmatprep.subr.bf16.mxu0 %v6264_v30  ;;  %867 = vmatprep.subr.bf16.mxu1 %v6267_v31  ;;  %v6351_v30 = vld [vmem:[#allocation5 + $0x18c] ss:$16 sps:$4 sm:$0xff]   ;;  %v6346_v31 = vld [vmem:[#allocation5 + $0x180] ss:$16 sps:$4 sm:$0xff]  }
  0xc8   :  { %782 = vmatpush1.bf16.msra.mxu0 %v6262_v32  ;;  %868 = vmatpush1.bf16.msra.mxu1 %v6265_v33  ;;  %v6349_v32 = vld [vmem:[#allocation5 + $0x188] ss:$16 sps:$4 sm:$0xff]   ;;  %v6354_v33 = vld [vmem:[#allocation5 + $0x1a4] ss:$16 sps:$4 sm:$0xff]  }
  0xc9   :  { %783 = vmatprep.subr.bf16.mxu0 %v6270_v34  ;;  %869 = vmatprep.subr.bf16.mxu1 %v6273_v35  ;;  %v6357_v34 = vld [vmem:[#allocation5 + $0x1ac] ss:$16 sps:$4 sm:$0xff]   ;;  %v6352_v35 = vld [vmem:[#allocation5 + $0x1a0] ss:$16 sps:$4 sm:$0xff]  }
  0xcc   :  { %784 = vmatpush1.bf16.msra.mxu0 %v6268_v36  ;;  %870 = vmatpush1.bf16.msra.mxu1 %v6271_v37  ;;  %v6355_v36 = vld [vmem:[#allocation5 + $0x1a8] ss:$16 sps:$4 sm:$0xff]   ;;  %v6360_v37 = vld [vmem:[#allocation5 + $0x1c4] ss:$16 sps:$4 sm:$0xff]  }
  0xcd   :  { %1706 = vmatprep.subr.bf16.mxu0 %v6276_v40  ;;  %1792 = vmatprep.subr.bf16.mxu1 %v6279_v41  ;;  %v6361_v40 = vld [vmem:[#allocation5 + $0x1c8] ss:$16 sps:$4 sm:$0xff]   ;;  %v6366_v41 = vld [vmem:[#allocation5 + $0x1e4] ss:$16 sps:$4 sm:$0xff]  }
  0xcf   :  { %802 = vmatmul.mubr.bf16.vlgmr.msra.gmra.mrb[0].mxu0 %v5330_v42  ;;  %888 = vmatmul.mubr.bf16.vlgmr.msra.gmra.mrb[0].mxu1 %v5330_v42  ;;  %v6369_v42 = vld [vmem:[#allocation5 + $0x1ec] ss:$16 sps:$4 sm:$0xff]  }
  0xd0   :  { %1707 = vmatpush1.bf16.msra.mxu0 %v6274_v43  ;;  %1793 = vmatpush1.bf16.msra.mxu1 %v6277_v44  ;;  %v6364_v43 = vld [vmem:[#allocation5 + $0x1e0] ss:$16 sps:$4 sm:$0xff]   ;;  %v6367_v44 = vld [vmem:[#allocation5 + $0x1e8] ss:$16 sps:$4 sm:$0xff]  }
  0xd1   :  { %1708 = vmatprep.subr.bf16.mxu0 %v6282_v45  ;;  %1794 = vmatprep.subr.bf16.mxu1 %v6285_v46  ;;  %v6372_v45 = vld [vmem:[#allocation5 + $0x204] ss:$16 sps:$4 sm:$0xff]   ;;  %v6375_v46 = vld [vmem:[#allocation5 + $0x20c] ss:$16 sps:$4 sm:$0xff]  }
  0xd2   :  { %1738 = vmatprep.mubr.bf16.mxu0 %v5429_v61  ;;  %1824 = vmatprep.mubr.bf16.mxu1 %v5429_v61  ;;  %v6390_v61 = vld [vmem:[#allocation5 + $0x264] ss:$16 sps:$4 sm:$0xff]  }
  0xd4   :  { %1709 = vmatpush1.bf16.msra.mxu0 %v6280_v47  ;;  %1795 = vmatpush1.bf16.msra.mxu1 %v6283_v48  ;;  %v6370_v47 = vld [vmem:[#allocation5 + $0x200] ss:$16 sps:$4 sm:$0xff]   ;;  %v6373_v48 = vld [vmem:[#allocation5 + $0x208] ss:$16 sps:$4 sm:$0xff]  }
  0xd5   :  { %1710 = vmatprep.subr.bf16.mxu0 %v6288_v49  ;;  %1796 = vmatprep.subr.bf16.mxu1 %v6291_v50  ;;  %v5428_v49 = vcombine.low %v7449_v57, %v7454_v58  ;;  %v7463_v50 = vld [vmem:[%s7663_s0 + $0xc] sm:$0xff]  ;;  %v6384_v57 = vld [vmem:[#allocation5 + $0x244] ss:$16 sps:$4 sm:$0xff]  }
  0xd6   :  { %v6387_v58 = vld [vmem:[#allocation5 + $0x24c] ss:$16 sps:$4 sm:$0xff]  }
  0xd8   :  { %1711 = vmatpush1.bf16.msra.mxu0 %v6286_v51  ;;  %1797 = vmatpush1.bf16.msra.mxu1 %v6289_v52  ;;  %v7468_v51 = vld [vmem:[%s7663_s0 + $0x2c] sm:$0xff]  ;;  %v6378_v52 = vld [vmem:[#allocation5 + $0x224] ss:$16 sps:$4 sm:$0xff]  }
  0xd9   :  { %1712 = vmatprep.subr.bf16.mxu0 %v6294_v53  ;;  %1798 = vmatprep.subr.bf16.mxu1 %v6297_v54  ;;  %v6381_v53 = vld [vmem:[#allocation5 + $0x22c] ss:$16 sps:$4 sm:$0xff]   ;;  %v7472_v54 = vcombine.high %v7463_v50, %v7468_v51 }
  0xdc   :  { %1713 = vmatpush1.bf16.msra.mxu0 %v6292_v55  ;;  %1799 = vmatpush1.bf16.msra.mxu1 %v6295_v56  ;;  %v6376_v55 = vld [vmem:[#allocation5 + $0x220] ss:$16 sps:$4 sm:$0xff]   ;;  %v6379_v56 = vld [vmem:[#allocation5 + $0x228] ss:$16 sps:$4 sm:$0xff]  }
  0xdd   :  { %1714 = vmatprep.subr.bf16.mxu0 %v6300_v59  ;;  %1800 = vmatprep.subr.bf16.mxu1 %v6303_v60  ;;  %v6382_v59 = vld [vmem:[#allocation5 + $0x240] ss:$16 sps:$4 sm:$0xff]   ;;  %v6385_v60 = vld [vmem:[#allocation5 + $0x248] ss:$16 sps:$4 sm:$0xff]  }
  0xe0   :  { %1715 = vmatpush1.bf16.msra.mxu0 %v6298_v62  ;;  %1801 = vmatpush1.bf16.msra.mxu1 %v6301_v63  ;;  %v6393_v62 = vld [vmem:[#allocation5 + $0x26c] ss:$16 sps:$4 sm:$0xff]   ;;  %v6388_v63 = vld [vmem:[#allocation5 + $0x260] ss:$16 sps:$4 sm:$0xff]  }
  0xe1   :  { %1716 = vmatprep.subr.bf16.mxu0 %v6306_v0  ;;  %1802 = vmatprep.subr.bf16.mxu1 %v6309_v1  ;;  %v6391_v0 = vld [vmem:[#allocation5 + $0x268] ss:$16 sps:$4 sm:$0xff]   ;;  %v6396_v1 = vld [vmem:[#allocation5 + $0x284] ss:$16 sps:$4 sm:$0xff]  }
  0xe4   :  { %1717 = vmatpush1.bf16.msra.mxu0 %v6304_v2  ;;  %1803 = vmatpush1.bf16.msra.mxu1 %v6307_v3  ;;  %v6399_v2 = vld [vmem:[#allocation5 + $0x28c] ss:$16 sps:$4 sm:$0xff]   ;;  %v6394_v3 = vld [vmem:[#allocation5 + $0x280] ss:$16 sps:$4 sm:$0xff]  }
  0xe5   :  { %1718 = vmatprep.subr.bf16.mxu0 %v6312_v4  ;;  %1804 = vmatprep.subr.bf16.mxu1 %v6315_v5  ;;  %v6397_v4 = vld [vmem:[#allocation5 + $0x288] ss:$16 sps:$4 sm:$0xff]   ;;  %v6402_v5 = vld [vmem:[#allocation5 + $0x2a4] ss:$16 sps:$4 sm:$0xff]  }
  0xe8   :  { %1719 = vmatpush1.bf16.msra.mxu0 %v6310_v6  ;;  %1805 = vmatpush1.bf16.msra.mxu1 %v6313_v7  ;;  %v6405_v6 = vld [vmem:[#allocation5 + $0x2ac] ss:$16 sps:$4 sm:$0xff]   ;;  %v6400_v7 = vld [vmem:[#allocation5 + $0x2a0] ss:$16 sps:$4 sm:$0xff]  }
  0xe9   :  { %1720 = vmatprep.subr.bf16.mxu0 %v6318_v8  ;;  %1806 = vmatprep.subr.bf16.mxu1 %v6321_v9  ;;  %v6403_v8 = vld [vmem:[#allocation5 + $0x2a8] ss:$16 sps:$4 sm:$0xff]   ;;  %v6408_v9 = vld [vmem:[#allocation5 + $0x2c4] ss:$16 sps:$4 sm:$0xff]  }
  0xec   :  { %1721 = vmatpush1.bf16.msra.mxu0 %v6316_v10  ;;  %1807 = vmatpush1.bf16.msra.mxu1 %v6319_v11  ;;  %v6411_v10 = vld [vmem:[#allocation5 + $0x2cc] ss:$16 sps:$4 sm:$0xff]   ;;  %v6406_v11 = vld [vmem:[#allocation5 + $0x2c0] ss:$16 sps:$4 sm:$0xff]  }
  0xed   :  { %1722 = vmatprep.subr.bf16.mxu0 %v6324_v12  ;;  %1808 = vmatprep.subr.bf16.mxu1 %v6327_v13  ;;  %v6409_v12 = vld [vmem:[#allocation5 + $0x2c8] ss:$16 sps:$4 sm:$0xff]   ;;  %v6414_v13 = vld [vmem:[#allocation5 + $0x2e4] ss:$16 sps:$4 sm:$0xff]  }
  0xf0   :  { %1723 = vmatpush1.bf16.msra.mxu0 %v6322_v14  ;;  %1809 = vmatpush1.bf16.msra.mxu1 %v6325_v16  ;;  %v6417_v14 = vld [vmem:[#allocation5 + $0x2ec] ss:$16 sps:$4 sm:$0xff]   ;;  %v6412_v16 = vld [vmem:[#allocation5 + $0x2e0] ss:$16 sps:$4 sm:$0xff]  }
  0xf1   :  { %1724 = vmatprep.subr.bf16.mxu0 %v6330_v17  ;;  %1810 = vmatprep.subr.bf16.mxu1 %v6333_v18  ;;  %v6415_v17 = vld [vmem:[#allocation5 + $0x2e8] ss:$16 sps:$4 sm:$0xff]   ;;  %v6420_v18 = vld [vmem:[#allocation5 + $0x304] ss:$16 sps:$4 sm:$0xff]  }
  0xf4   :  { %1725 = vmatpush1.bf16.msra.mxu0 %v6328_v19  ;;  %1811 = vmatpush1.bf16.msra.mxu1 %v6331_v20  ;;  %v6423_v19 = vld [vmem:[#allocation5 + $0x30c] ss:$16 sps:$4 sm:$0xff]   ;;  %v6418_v20 = vld [vmem:[#allocation5 + $0x300] ss:$16 sps:$4 sm:$0xff]  }
  0xf5   :  { %1726 = vmatprep.subr.bf16.mxu0 %v6336_v21  ;;  %1812 = vmatprep.subr.bf16.mxu1 %v6339_v22  ;;  %v6421_v21 = vld [vmem:[#allocation5 + $0x308] ss:$16 sps:$4 sm:$0xff]   ;;  %v6426_v22 = vld [vmem:[#allocation5 + $0x324] ss:$16 sps:$4 sm:$0xff]  }
  0xf8   :  { %1727 = vmatpush1.bf16.msra.mxu0 %v6334_v23  ;;  %1813 = vmatpush1.bf16.msra.mxu1 %v6337_v24  ;;  %v6429_v23 = vld [vmem:[#allocation5 + $0x32c] ss:$16 sps:$4 sm:$0xff]   ;;  %v6424_v24 = vld [vmem:[#allocation5 + $0x320] ss:$16 sps:$4 sm:$0xff]  }
  0xf9   :  { %1728 = vmatprep.subr.bf16.mxu0 %v6342_v25  ;;  %1814 = vmatprep.subr.bf16.mxu1 %v6345_v26  ;;  %v6427_v25 = vld [vmem:[#allocation5 + $0x328] ss:$16 sps:$4 sm:$0xff]   ;;  %v6432_v26 = vld [vmem:[#allocation5 + $0x344] ss:$16 sps:$4 sm:$0xff]  }
  0xfc   :  { %1729 = vmatpush1.bf16.msra.mxu0 %v6340_v27  ;;  %1815 = vmatpush1.bf16.msra.mxu1 %v6343_v28  ;;  %v6435_v27 = vld [vmem:[#allocation5 + $0x34c] ss:$16 sps:$4 sm:$0xff]   ;;  %v6430_v28 = vld [vmem:[#allocation5 + $0x340] ss:$16 sps:$4 sm:$0xff]  }
  0xfd   :  { %1730 = vmatprep.subr.bf16.mxu0 %v6348_v29  ;;  %1816 = vmatprep.subr.bf16.mxu1 %v6351_v30  ;;  %v6433_v29 = vld [vmem:[#allocation5 + $0x348] ss:$16 sps:$4 sm:$0xff]   ;;  %v6438_v30 = vld [vmem:[#allocation5 + $0x364] ss:$16 sps:$4 sm:$0xff]  }
 0x100   :  { %1731 = vmatpush1.bf16.msra.mxu0 %v6346_v31  ;;  %1817 = vmatpush1.bf16.msra.mxu1 %v6349_v32  ;;  %v6441_v31 = vld [vmem:[#allocation5 + $0x36c] ss:$16 sps:$4 sm:$0xff]   ;;  %v6436_v32 = vld [vmem:[#allocation5 + $0x360] ss:$16 sps:$4 sm:$0xff]  }
 0x101   :  { %1732 = vmatprep.subr.bf16.mxu0 %v6354_v33  ;;  %1818 = vmatprep.subr.bf16.mxu1 %v6357_v34  ;;  %v6439_v33 = vld [vmem:[#allocation5 + $0x368] ss:$16 sps:$4 sm:$0xff]   ;;  %v6444_v34 = vld [vmem:[#allocation5 + $0x384] ss:$16 sps:$4 sm:$0xff]  }
 0x104   :  { %1733 = vmatpush1.bf16.msra.mxu0 %v6352_v35  ;;  %1819 = vmatpush1.bf16.msra.mxu1 %v6355_v36  ;;  %v6447_v35 = vld [vmem:[#allocation5 + $0x38c] ss:$16 sps:$4 sm:$0xff]   ;;  %v6442_v36 = vld [vmem:[#allocation5 + $0x380] ss:$16 sps:$4 sm:$0xff]  }
 0x105   :  { %1734 = vmatprep.subr.bf16.mxu0 %v6360_v37  ;;  %1820 = vmatprep.subr.bf16.mxu1 %v6363_v38  ;;  %v6445_v37 = vld [vmem:[#allocation5 + $0x388] ss:$16 sps:$4 sm:$0xff]   ;;  %v6450_v38 = vld [vmem:[#allocation5 + $0x3a4] ss:$16 sps:$4 sm:$0xff]  }
 0x108   :  { %1735 = vmatpush1.bf16.msra.mxu0 %v6358_v39  ;;  %1821 = vmatpush1.bf16.msra.mxu1 %v6361_v40  ;;  %v6453_v39 = vld [vmem:[#allocation5 + $0x3ac] ss:$16 sps:$4 sm:$0xff]   ;;  %v6448_v40 = vld [vmem:[#allocation5 + $0x3a0] ss:$16 sps:$4 sm:$0xff]  }
 0x109   :  { %1736 = vmatprep.subr.bf16.mxu0 %v6366_v41  ;;  %1822 = vmatprep.subr.bf16.mxu1 %v6369_v42  ;;  %v6451_v41 = vld [vmem:[#allocation5 + $0x3a8] ss:$16 sps:$4 sm:$0xff]   ;;  %v6456_v42 = vld [vmem:[#allocation5 + $0x3c4] ss:$16 sps:$4 sm:$0xff]  }
 0x10c   :  { %1737 = vmatpush1.bf16.msra.mxu0 %v6364_v43  ;;  %1823 = vmatpush1.bf16.msra.mxu1 %v6367_v44  ;;  %v6459_v43 = vld [vmem:[#allocation5 + $0x3cc] ss:$16 sps:$4 sm:$0xff]   ;;  %v6454_v44 = vld [vmem:[#allocation5 + $0x3c0] ss:$16 sps:$4 sm:$0xff]  }
 0x10d   :  { %1749 = vmatprep.subr.bf16.mxu0 %v6372_v45  ;;  %1835 = vmatprep.subr.bf16.mxu1 %v6375_v46  ;;  %v6457_v45 = vld [vmem:[#allocation5 + $0x3c8] ss:$16 sps:$4 sm:$0xff]   ;;  %v6462_v46 = vld [vmem:[#allocation5 + $0x3e4] ss:$16 sps:$4 sm:$0xff]  }
 0x10f   :  { %1739 = vmatmul.mubr.bf16.vlgmr.msra.gmra.mrb[4].mxu0 %v5428_v49  ;;  %1825 = vmatmul.mubr.bf16.vlgmr.msra.gmra.mrb[4].mxu1 %v5428_v49  ;;  %v6463_v49 = vld [vmem:[#allocation5 + $0x3e8] ss:$16 sps:$4 sm:$0xff]  }
 0x110   :  { %1750 = vmatpush1.bf16.msra.mxu0 %v6370_v47  ;;  %1836 = vmatpush1.bf16.msra.mxu1 %v6373_v48  ;;  %v6465_v47 = vld [vmem:[#allocation5 + $0x3ec] ss:$16 sps:$4 sm:$0xff]   ;;  %v6460_v48 = vld [vmem:[#allocation5 + $0x3e0] ss:$16 sps:$4 sm:$0xff]  }
 0x111   :  { %1751 = vmatprep.subr.bf16.mxu0 %v6378_v52  ;;  %1837 = vmatprep.subr.bf16.mxu1 %v6381_v53  ;;  %v6468_v52 = vld [vmem:[#allocation7 + $0x4] ss:$16 sps:$4 sm:$0xff]   ;;  %v6471_v53 = vld [vmem:[#allocation7 + $0xc] ss:$16 sps:$4 sm:$0xff]  }
 0x112   :  { %1781 = vmatprep.mubr.bf16.mxu0 %v7472_v54  ;;  %1867 = vmatprep.mubr.bf16.mxu1 %v7472_v54 }
 0x114   :  { %1752 = vmatpush1.bf16.msra.mxu0 %v6376_v55  ;;  %1838 = vmatpush1.bf16.msra.mxu1 %v6379_v56  ;;  %v7478_v55 = vcombine.low %v7463_v50, %v7468_v51  ;;  %v6466_v56 = vld [vmem:[#allocation7] ss:$16 sps:$4 sm:$0xff]   ;;  %v6480_v50 = vld [vmem:[#allocation7 + $0x44] ss:$16 sps:$4 sm:$0xff]   ;;  %v6483_v51 = vld [vmem:[#allocation7 + $0x4c] ss:$16 sps:$4 sm:$0xff]  }
 0x115   :  { %1753 = vmatprep.subr.bf16.mxu0 %v6384_v57  ;;  %1839 = vmatprep.subr.bf16.mxu1 %v6387_v58  ;;  %v6469_v57 = vld [vmem:[#allocation7 + $0x8] ss:$16 sps:$4 sm:$0xff]   ;;  %v6474_v58 = vld [vmem:[#allocation7 + $0x24] ss:$16 sps:$4 sm:$0xff]  }
 0x118   :  { %1754 = vmatpush1.bf16.msra.mxu0 %v6382_v59  ;;  %1840 = vmatpush1.bf16.msra.mxu1 %v6385_v60  ;;  %v6477_v59 = vld [vmem:[#allocation7 + $0x2c] ss:$16 sps:$4 sm:$0xff]   ;;  %v6472_v60 = vld [vmem:[#allocation7 + $0x20] ss:$16 sps:$4 sm:$0xff]  }
 0x119   :  { %1755 = vmatprep.subr.bf16.mxu0 %v6390_v61  ;;  %1841 = vmatprep.subr.bf16.mxu1 %v6393_v62  ;;  %v6475_v61 = vld [vmem:[#allocation7 + $0x28] ss:$16 sps:$4 sm:$0xff]   ;;  %v6478_v62 = vld [vmem:[#allocation7 + $0x40] ss:$16 sps:$4 sm:$0xff]  }
 0x11c   :  { %1756 = vmatpush1.bf16.msra.mxu0 %v6388_v63  ;;  %1842 = vmatpush1.bf16.msra.mxu1 %v6391_v0  ;;  %v6481_v63 = vld [vmem:[#allocation7 + $0x48] ss:$16 sps:$4 sm:$0xff]   ;;  %v6486_v0 = vld [vmem:[#allocation7 + $0x64] ss:$16 sps:$4 sm:$0xff]  }
 0x11d   :  { %1757 = vmatprep.subr.bf16.mxu0 %v6396_v1  ;;  %1843 = vmatprep.subr.bf16.mxu1 %v6399_v2  ;;  %v6489_v1 = vld [vmem:[#allocation7 + $0x6c] ss:$16 sps:$4 sm:$0xff]   ;;  %v6484_v2 = vld [vmem:[#allocation7 + $0x60] ss:$16 sps:$4 sm:$0xff]  }
 0x120   :  { %1758 = vmatpush1.bf16.msra.mxu0 %v6394_v3  ;;  %1844 = vmatpush1.bf16.msra.mxu1 %v6397_v4  ;;  %v6487_v3 = vld [vmem:[#allocation7 + $0x68] ss:$16 sps:$4 sm:$0xff]   ;;  %v6492_v4 = vld [vmem:[#allocation7 + $0x84] ss:$16 sps:$4 sm:$0xff]  }
 0x121   :  { %1759 = vmatprep.subr.bf16.mxu0 %v6402_v5  ;;  %1845 = vmatprep.subr.bf16.mxu1 %v6405_v6  ;;  %v6495_v5 = vld [vmem:[#allocation7 + $0x8c] ss:$16 sps:$4 sm:$0xff]   ;;  %v6490_v6 = vld [vmem:[#allocation7 + $0x80] ss:$16 sps:$4 sm:$0xff]  }
 0x124   :  { %1760 = vmatpush1.bf16.msra.mxu0 %v6400_v7  ;;  %1846 = vmatpush1.bf16.msra.mxu1 %v6403_v8  ;;  %v6498_v7 = vld [vmem:[#allocation7 + $0xa4] ss:$16 sps:$4 sm:$0xff]   ;;  %v6501_v8 = vld [vmem:[#allocation7 + $0xac] ss:$16 sps:$4 sm:$0xff]  }
 0x125   :  { %1761 = vmatprep.subr.bf16.mxu0 %v6408_v9  ;;  %1847 = vmatprep.subr.bf16.mxu1 %v6411_v10  ;;  %v6496_v9 = vld [vmem:[#allocation7 + $0xa0] ss:$16 sps:$4 sm:$0xff]   ;;  %v6499_v10 = vld [vmem:[#allocation7 + $0xa8] ss:$16 sps:$4 sm:$0xff]  }
 0x128   :  { %1762 = vmatpush1.bf16.msra.mxu0 %v6406_v11  ;;  %1848 = vmatpush1.bf16.msra.mxu1 %v6409_v12  ;;  %v6504_v11 = vld [vmem:[#allocation7 + $0xc4] ss:$16 sps:$4 sm:$0xff]   ;;  %v6507_v12 = vld [vmem:[#allocation7 + $0xcc] ss:$16 sps:$4 sm:$0xff]  }
 0x129   :  { %1763 = vmatprep.subr.bf16.mxu0 %v6414_v13  ;;  %1849 = vmatprep.subr.bf16.mxu1 %v6417_v14  ;;  %v6502_v13 = vld [vmem:[#allocation7 + $0xc0] ss:$16 sps:$4 sm:$0xff]   ;;  %v6505_v14 = vld [vmem:[#allocation7 + $0xc8] ss:$16 sps:$4 sm:$0xff]  }
 0x12c   :  { %1764 = vmatpush1.bf16.msra.mxu0 %v6412_v16  ;;  %1850 = vmatpush1.bf16.msra.mxu1 %v6415_v17  ;;  %v6510_v16 = vld [vmem:[#allocation7 + $0xe4] ss:$16 sps:$4 sm:$0xff]   ;;  %v6513_v17 = vld [vmem:[#allocation7 + $0xec] ss:$16 sps:$4 sm:$0xff]  }
 0x12d   :  { %1765 = vmatprep.subr.bf16.mxu0 %v6420_v18  ;;  %1851 = vmatprep.subr.bf16.mxu1 %v6423_v19  ;;  %v6508_v18 = vld [vmem:[#allocation7 + $0xe0] ss:$16 sps:$4 sm:$0xff]   ;;  %v6511_v19 = vld [vmem:[#allocation7 + $0xe8] ss:$16 sps:$4 sm:$0xff]  }
 0x130   :  { %1766 = vmatpush1.bf16.msra.mxu0 %v6418_v20  ;;  %1852 = vmatpush1.bf16.msra.mxu1 %v6421_v21  ;;  %v6516_v20 = vld [vmem:[#allocation7 + $0x104] ss:$16 sps:$4 sm:$0xff]   ;;  %v6519_v21 = vld [vmem:[#allocation7 + $0x10c] ss:$16 sps:$4 sm:$0xff]  }
 0x131   :  { %1767 = vmatprep.subr.bf16.mxu0 %v6426_v22  ;;  %1853 = vmatprep.subr.bf16.mxu1 %v6429_v23  ;;  %v6514_v22 = vld [vmem:[#allocation7 + $0x100] ss:$16 sps:$4 sm:$0xff]   ;;  %v6517_v23 = vld [vmem:[#allocation7 + $0x108] ss:$16 sps:$4 sm:$0xff]  }
 0x134   :  { %1768 = vmatpush1.bf16.msra.mxu0 %v6424_v24  ;;  %1854 = vmatpush1.bf16.msra.mxu1 %v6427_v25  ;;  %v6522_v24 = vld [vmem:[#allocation7 + $0x124] ss:$16 sps:$4 sm:$0xff]   ;;  %v6525_v25 = vld [vmem:[#allocation7 + $0x12c] ss:$16 sps:$4 sm:$0xff]  }
 0x135   :  { %1769 = vmatprep.subr.bf16.mxu0 %v6432_v26  ;;  %1855 = vmatprep.subr.bf16.mxu1 %v6435_v27  ;;  %v6520_v26 = vld [vmem:[#allocation7 + $0x120] ss:$16 sps:$4 sm:$0xff]   ;;  %v6523_v27 = vld [vmem:[#allocation7 + $0x128] ss:$16 sps:$4 sm:$0xff]  }
 0x138   :  { %1770 = vmatpush1.bf16.msra.mxu0 %v6430_v28  ;;  %1856 = vmatpush1.bf16.msra.mxu1 %v6433_v29  ;;  %v6528_v28 = vld [vmem:[#allocation7 + $0x144] ss:$16 sps:$4 sm:$0xff]   ;;  %v6531_v29 = vld [vmem:[#allocation7 + $0x14c] ss:$16 sps:$4 sm:$0xff]  }
 0x139   :  { %1771 = vmatprep.subr.bf16.mxu0 %v6438_v30  ;;  %1857 = vmatprep.subr.bf16.mxu1 %v6441_v31  ;;  %v6526_v30 = vld [vmem:[#allocation7 + $0x140] ss:$16 sps:$4 sm:$0xff]   ;;  %v6529_v31 = vld [vmem:[#allocation7 + $0x148] ss:$16 sps:$4 sm:$0xff]  }
 0x13c   :  { %1772 = vmatpush1.bf16.msra.mxu0 %v6436_v32  ;;  %1858 = vmatpush1.bf16.msra.mxu1 %v6439_v33  ;;  %v6534_v32 = vld [vmem:[#allocation7 + $0x164] ss:$16 sps:$4 sm:$0xff]   ;;  %v6537_v33 = vld [vmem:[#allocation7 + $0x16c] ss:$16 sps:$4 sm:$0xff]  }
 0x13d   :  { %1773 = vmatprep.subr.bf16.mxu0 %v6444_v34  ;;  %1859 = vmatprep.subr.bf16.mxu1 %v6447_v35  ;;  %v6532_v34 = vld [vmem:[#allocation7 + $0x160] ss:$16 sps:$4 sm:$0xff]   ;;  %v6535_v35 = vld [vmem:[#allocation7 + $0x168] ss:$16 sps:$4 sm:$0xff]  }
 0x140   :  { %1774 = vmatpush1.bf16.msra.mxu0 %v6442_v36  ;;  %1860 = vmatpush1.bf16.msra.mxu1 %v6445_v37  ;;  %v6540_v36 = vld [vmem:[#allocation7 + $0x184] ss:$16 sps:$4 sm:$0xff]   ;;  %v6543_v37 = vld [vmem:[#allocation7 + $0x18c] ss:$16 sps:$4 sm:$0xff]  }
 0x141   :  { %1775 = vmatprep.subr.bf16.mxu0 %v6450_v38  ;;  %1861 = vmatprep.subr.bf16.mxu1 %v6453_v39  ;;  %v6538_v38 = vld [vmem:[#allocation7 + $0x180] ss:$16 sps:$4 sm:$0xff]   ;;  %v6541_v39 = vld [vmem:[#allocation7 + $0x188] ss:$16 sps:$4 sm:$0xff]  }
 0x144   :  { %1776 = vmatpush1.bf16.msra.mxu0 %v6448_v40  ;;  %1862 = vmatpush1.bf16.msra.mxu1 %v6451_v41  ;;  %v6546_v40 = vld [vmem:[#allocation7 + $0x1a4] ss:$16 sps:$4 sm:$0xff]   ;;  %v6549_v41 = vld [vmem:[#allocation7 + $0x1ac] ss:$16 sps:$4 sm:$0xff]  }
 0x145   :  { %1777 = vmatprep.subr.bf16.mxu0 %v6456_v42  ;;  %1863 = vmatprep.subr.bf16.mxu1 %v6459_v43  ;;  %v6544_v42 = vld [vmem:[#allocation7 + $0x1a0] ss:$16 sps:$4 sm:$0xff]   ;;  %v6547_v43 = vld [vmem:[#allocation7 + $0x1a8] ss:$16 sps:$4 sm:$0xff]  }
 0x148   :  { %1778 = vmatpush1.bf16.msra.mxu0 %v6454_v44  ;;  %1864 = vmatpush1.bf16.msra.mxu1 %v6457_v45  ;;  %v6552_v44 = vld [vmem:[#allocation7 + $0x1c4] ss:$16 sps:$4 sm:$0xff]   ;;  %v6555_v45 = vld [vmem:[#allocation7 + $0x1cc] ss:$16 sps:$4 sm:$0xff]  }
 0x149   :  { %1779 = vmatprep.subr.bf16.mxu0 %v6462_v46  ;;  %1865 = vmatprep.subr.bf16.mxu1 %v6465_v47  ;;  %v6550_v46 = vld [vmem:[#allocation7 + $0x1c0] ss:$16 sps:$4 sm:$0xff]   ;;  %v6553_v47 = vld [vmem:[#allocation7 + $0x1c8] ss:$16 sps:$4 sm:$0xff]  }
 0x14c   :  { %1780 = vmatpush1.bf16.msra.mxu0 %v6460_v48  ;;  %1866 = vmatpush1.bf16.msra.mxu1 %v6463_v49  ;;  %v6558_v48 = vld [vmem:[#allocation7 + $0x1e4] ss:$16 sps:$4 sm:$0xff]   ;;  %v6561_v49 = vld [vmem:[#allocation7 + $0x1ec] ss:$16 sps:$4 sm:$0xff]  }
 0x14d   :  { %2680 = vmatprep.subr.bf16.mxu0 %v6468_v52  ;;  %2766 = vmatprep.subr.bf16.mxu1 %v6471_v53  ;;  %v6556_v52 = vld [vmem:[#allocation7 + $0x1e0] ss:$16 sps:$4 sm:$0xff]   ;;  %v6559_v53 = vld [vmem:[#allocation7 + $0x1e8] ss:$16 sps:$4 sm:$0xff]  }
 0x14f   :  { %1782 = vmatmul.mubr.bf16.vlgmr.msra.gmra.mrb[4].mxu0 %v7478_v55  ;;  %1868 = vmatmul.mubr.bf16.vlgmr.msra.gmra.mrb[4].mxu1 %v7478_v55 }
 0x150   :  { %2681 = vmatpush1.bf16.msra.mxu0 %v6466_v56  ;;  %2767 = vmatpush1.bf16.msra.mxu1 %v6469_v57  ;;  %v6564_v56 = vld [vmem:[#allocation7 + $0x204] ss:$16 sps:$4 sm:$0xff]   ;;  %v6567_v57 = vld [vmem:[#allocation7 + $0x20c] ss:$16 sps:$4 sm:$0xff]  }
 0x151   :  { %2682 = vmatprep.subr.bf16.mxu0 %v6474_v58  ;;  %2768 = vmatprep.subr.bf16.mxu1 %v6477_v59  ;;  %v7487_v58 = vld [vmem:[%s7663_s0 + $0x14] sm:$0xff] }
 0x152   :  { %2712 = vmatprep.mubr.bf16.mxu0 %v7472_v54  ;;  %2798 = vmatprep.mubr.bf16.mxu1 %v7472_v54  ;;  %v6493_v54 = vld [vmem:[#allocation7 + $0x88] ss:$16 sps:$4 sm:$0xff]  }
 0x153   :  { %v7492_v59 = vld [vmem:[%s7663_s0 + $0x34] sm:$0xff] }
 0x154   :  { %2683 = vmatpush1.bf16.msra.mxu0 %v6472_v60  ;;  %2769 = vmatpush1.bf16.msra.mxu1 %v6475_v61  ;;  %v6562_v60 = vld [vmem:[#allocation7 + $0x200] ss:$16 sps:$4 sm:$0xff]   ;;  %v6565_v61 = vld [vmem:[#allocation7 + $0x208] ss:$16 sps:$4 sm:$0xff]  }
 0x155   :  { %2684 = vmatprep.subr.bf16.mxu0 %v6480_v50  ;;  %2770 = vmatprep.subr.bf16.mxu1 %v6483_v51  ;;  %v6570_v50 = vld [vmem:[#allocation7 + $0x224] ss:$16 sps:$4 sm:$0xff]   ;;  %v6573_v51 = vld [vmem:[#allocation7 + $0x22c] ss:$16 sps:$4 sm:$0xff]  }
 0x158   :  { %2685 = vmatpush1.bf16.msra.mxu0 %v6478_v62  ;;  %2771 = vmatpush1.bf16.msra.mxu1 %v6481_v63  ;;  %v7496_v62 = vcombine.high %v7487_v58, %v7492_v59  ;;  %v6568_v63 = vld [vmem:[#allocation7 + $0x220] ss:$16 sps:$4 sm:$0xff]  }
 0x159   :  { %2686 = vmatprep.subr.bf16.mxu0 %v6486_v0  ;;  %2772 = vmatprep.subr.bf16.mxu1 %v6489_v1  ;;  %v6571_v0 = vld [vmem:[#allocation7 + $0x228] ss:$16 sps:$4 sm:$0xff]   ;;  %v6576_v1 = vld [vmem:[#allocation7 + $0x244] ss:$16 sps:$4 sm:$0xff]  }
 0x15c   :  { %2687 = vmatpush1.bf16.msra.mxu0 %v6484_v2  ;;  %2773 = vmatpush1.bf16.msra.mxu1 %v6487_v3  ;;  %v6579_v2 = vld [vmem:[#allocation7 + $0x24c] ss:$16 sps:$4 sm:$0xff]   ;;  %v6574_v3 = vld [vmem:[#allocation7 + $0x240] ss:$16 sps:$4 sm:$0xff]  }
 0x15d   :  { %2688 = vmatprep.subr.bf16.mxu0 %v6492_v4  ;;  %2774 = vmatprep.subr.bf16.mxu1 %v6495_v5  ;;  %v6577_v4 = vld [vmem:[#allocation7 + $0x248] ss:$16 sps:$4 sm:$0xff]   ;;  %v6582_v5 = vld [vmem:[#allocation7 + $0x264] ss:$16 sps:$4 sm:$0xff]  }
 0x160   :  { %2689 = vmatpush1.bf16.msra.mxu0 %v6490_v6  ;;  %2775 = vmatpush1.bf16.msra.mxu1 %v6493_v54  ;;  %v6580_v6 = vld [vmem:[#allocation7 + $0x260] ss:$16 sps:$4 sm:$0xff]   ;;  %v6583_v54 = vld [vmem:[#allocation7 + $0x268] ss:$16 sps:$4 sm:$0xff]  }
 0x161   :  { %2690 = vmatprep.subr.bf16.mxu0 %v6498_v7  ;;  %2776 = vmatprep.subr.bf16.mxu1 %v6501_v8  ;;  %v6588_v7 = vld [vmem:[#allocation7 + $0x284] ss:$16 sps:$4 sm:$0xff]   ;;  %v6591_v8 = vld [vmem:[#allocation7 + $0x28c] ss:$16 sps:$4 sm:$0xff]  }
 0x164   :  { %2691 = vmatpush1.bf16.msra.mxu0 %v6496_v9  ;;  %2777 = vmatpush1.bf16.msra.mxu1 %v6499_v10  ;;  %v6586_v9 = vld [vmem:[#allocation7 + $0x280] ss:$16 sps:$4 sm:$0xff]   ;;  %v6589_v10 = vld [vmem:[#allocation7 + $0x288] ss:$16 sps:$4 sm:$0xff]  }
 0x165   :  { %2692 = vmatprep.subr.bf16.mxu0 %v6504_v11  ;;  %2778 = vmatprep.subr.bf16.mxu1 %v6507_v12  ;;  %v6594_v11 = vld [vmem:[#allocation7 + $0x2a4] ss:$16 sps:$4 sm:$0xff]   ;;  %v6597_v12 = vld [vmem:[#allocation7 + $0x2ac] ss:$16 sps:$4 sm:$0xff]  }
 0x168   :  { %2693 = vmatpush1.bf16.msra.mxu0 %v6502_v13  ;;  %2779 = vmatpush1.bf16.msra.mxu1 %v6505_v14  ;;  %v6592_v13 = vld [vmem:[#allocation7 + $0x2a0] ss:$16 sps:$4 sm:$0xff]   ;;  %v6595_v14 = vld [vmem:[#allocation7 + $0x2a8] ss:$16 sps:$4 sm:$0xff]  }
 0x169   :  { %2694 = vmatprep.subr.bf16.mxu0 %v6510_v16  ;;  %2780 = vmatprep.subr.bf16.mxu1 %v6513_v17  ;;  %v6600_v16 = vld [vmem:[#allocation7 + $0x2c4] ss:$16 sps:$4 sm:$0xff]   ;;  %v6603_v17 = vld [vmem:[#allocation7 + $0x2cc] ss:$16 sps:$4 sm:$0xff]  }
 0x16c   :  { %2695 = vmatpush1.bf16.msra.mxu0 %v6508_v18  ;;  %2781 = vmatpush1.bf16.msra.mxu1 %v6511_v19 }
 0x16d   :  { %2696 = vmatprep.subr.bf16.mxu0 %v6516_v20  ;;  %2782 = vmatprep.subr.bf16.mxu1 %v6519_v21  ;;  %v6598_v20 = vld [vmem:[#allocation7 + $0x2c0] ss:$16 sps:$4 sm:$0xff]   ;;  %v6601_v21 = vld [vmem:[#allocation7 + $0x2c8] ss:$16 sps:$4 sm:$0xff]  }
 0x170   :  { %2697 = vmatpush1.bf16.msra.mxu0 %v6514_v22  ;;  %2783 = vmatpush1.bf16.msra.mxu1 %v6517_v23  ;;  %v7505_v23 = vld [vmem:[%s7668_s5] ss:$0 sm:$0xff] }
 0x171   :  { %2698 = vmatprep.subr.bf16.mxu0 %v6522_v24  ;;  %2784 = vmatprep.subr.bf16.mxu1 %v6525_v25 }
 0x174   :  { %2699 = vmatpush1.bf16.msra.mxu0 %v6520_v26  ;;  %2785 = vmatpush1.bf16.msra.mxu1 %v6523_v27 }
 0x175   :  { %2700 = vmatprep.subr.bf16.mxu0 %v6528_v28  ;;  %2786 = vmatprep.subr.bf16.mxu1 %v6531_v29 }
 0x178   :  { %2701 = vmatpush1.bf16.msra.mxu0 %v6526_v30  ;;  %2787 = vmatpush1.bf16.msra.mxu1 %v6529_v31  ;;  %v6606_v31 = vld [vmem:[#allocation7 + $0x2e4] ss:$16 sps:$4 sm:$0xff]  }
 0x179   :  { %2702 = vmatprep.subr.bf16.mxu0 %v6534_v32  ;;  %2788 = vmatprep.subr.bf16.mxu1 %v6537_v33  ;;  %v6609_v32 = vld [vmem:[#allocation7 + $0x2ec] ss:$16 sps:$4 sm:$0xff]  }
 0x17c   :  { %2703 = vmatpush1.bf16.msra.mxu0 %v6532_v34  ;;  %2789 = vmatpush1.bf16.msra.mxu1 %v6535_v35 }
 0x17d   :  { %2704 = vmatprep.subr.bf16.mxu0 %v6540_v36  ;;  %2790 = vmatprep.subr.bf16.mxu1 %v6543_v37  ;;  %v6604_v36 = vld [vmem:[#allocation7 + $0x2e0] ss:$16 sps:$4 sm:$0xff]   ;;  %v6607_v37 = vld [vmem:[#allocation7 + $0x2e8] ss:$16 sps:$4 sm:$0xff]  }
 0x180   :  { %2705 = vmatpush1.bf16.msra.mxu0 %v6538_v38  ;;  %2791 = vmatpush1.bf16.msra.mxu1 %v6541_v39 }
 0x181   :  { %2706 = vmatprep.subr.bf16.mxu0 %v6546_v40  ;;  %2792 = vmatprep.subr.bf16.mxu1 %v6549_v41  ;;  %v6612_v40 = vld [vmem:[#allocation7 + $0x304] ss:$16 sps:$4 sm:$0xff]   ;;  %v6615_v41 = vld [vmem:[#allocation7 + $0x30c] ss:$16 sps:$4 sm:$0xff]  }
 0x184   :  { %2707 = vmatpush1.bf16.msra.mxu0 %v6544_v42  ;;  %2793 = vmatpush1.bf16.msra.mxu1 %v6547_v43  ;;  %v6610_v43 = vld [vmem:[#allocation7 + $0x300] ss:$16 sps:$4 sm:$0xff]  }
 0x185   :  { %2708 = vmatprep.subr.bf16.mxu0 %v6552_v44  ;;  %2794 = vmatprep.subr.bf16.mxu1 %v6555_v45 }
 0x188   :  { %2709 = vmatpush1.bf16.msra.mxu0 %v6550_v46  ;;  %2795 = vmatpush1.bf16.msra.mxu1 %v6553_v47  ;;  %v6613_v46 = vld [vmem:[#allocation7 + $0x308] ss:$16 sps:$4 sm:$0xff]   ;;  %v6618_v47 = vld [vmem:[#allocation7 + $0x324] ss:$16 sps:$4 sm:$0xff]  }
 0x189   :  { %2710 = vmatprep.subr.bf16.mxu0 %v6558_v48  ;;  %2796 = vmatprep.subr.bf16.mxu1 %v6561_v49  ;;  %v6621_v48 = vld [vmem:[#allocation7 + $0x32c] ss:$16 sps:$4 sm:$0xff]  }
 0x18c   :  { %2711 = vmatpush1.bf16.msra.mxu0 %v6556_v52  ;;  %2797 = vmatpush1.bf16.msra.mxu1 %v6559_v53  ;;  %v6616_v52 = vld [vmem:[#allocation7 + $0x320] ss:$16 sps:$4 sm:$0xff]   ;;  %v6619_v53 = vld [vmem:[#allocation7 + $0x328] ss:$16 sps:$4 sm:$0xff]  }
 0x18d   :  { %2723 = vmatprep.subr.bf16.mxu0 %v6564_v56  ;;  %2809 = vmatprep.subr.bf16.mxu1 %v6567_v57  ;;  %v6624_v56 = vld [vmem:[#allocation7 + $0x344] ss:$16 sps:$4 sm:$0xff]   ;;  %v6627_v57 = vld [vmem:[#allocation7 + $0x34c] ss:$16 sps:$4 sm:$0xff]  }
 0x18f   :  { %2713 = vmatmul.mubr.bf16.vlgmr.msra.gmra.mrb[8].mxu0 %v7478_v55  ;;  %2799 = vmatmul.mubr.bf16.vlgmr.msra.gmra.mrb[8].mxu1 %v7478_v55  ;;  %v6585_v55 = vld [vmem:[#allocation7 + $0x26c] ss:$16 sps:$4 sm:$0xff]  }
 0x190   :  { %2724 = vmatpush1.bf16.msra.mxu0 %v6562_v60  ;;  %2810 = vmatpush1.bf16.msra.mxu1 %v6565_v61  ;;  %v6622_v60 = vld [vmem:[#allocation7 + $0x340] ss:$16 sps:$4 sm:$0xff]   ;;  %v6625_v61 = vld [vmem:[#allocation7 + $0x348] ss:$16 sps:$4 sm:$0xff]  }
 0x191   :  { %2725 = vmatprep.subr.bf16.mxu0 %v6570_v50  ;;  %2811 = vmatprep.subr.bf16.mxu1 %v6573_v51  ;;  %v6630_v50 = vld [vmem:[#allocation7 + $0x364] ss:$16 sps:$4 sm:$0xff]   ;;  %v6633_v51 = vld [vmem:[#allocation7 + $0x36c] ss:$16 sps:$4 sm:$0xff]  }
 0x192   :  { %2755 = vmatprep.mubr.bf16.mxu0 %v7496_v62  ;;  %2841 = vmatprep.mubr.bf16.mxu1 %v7496_v62 }
 0x194   :  { %2726 = vmatpush1.bf16.msra.mxu0 %v6568_v63  ;;  %2812 = vmatpush1.bf16.msra.mxu1 %v6571_v0  ;;  %v6628_v63 = vld [vmem:[#allocation7 + $0x360] ss:$16 sps:$4 sm:$0xff]   ;;  %v6631_v0 = vld [vmem:[#allocation7 + $0x368] ss:$16 sps:$4 sm:$0xff]  }
 0x195   :  { %2727 = vmatprep.subr.bf16.mxu0 %v6576_v1  ;;  %2813 = vmatprep.subr.bf16.mxu1 %v6579_v2  ;;  %v6636_v1 = vld [vmem:[#allocation7 + $0x384] ss:$16 sps:$4 sm:$0xff]   ;;  %v6639_v2 = vld [vmem:[#allocation7 + $0x38c] ss:$16 sps:$4 sm:$0xff]  }
 0x198   :  { %2728 = vmatpush1.bf16.msra.mxu0 %v6574_v3  ;;  %2814 = vmatpush1.bf16.msra.mxu1 %v6577_v4  ;;  %v6634_v3 = vld [vmem:[#allocation7 + $0x380] ss:$16 sps:$4 sm:$0xff]   ;;  %v6637_v4 = vld [vmem:[#allocation7 + $0x388] ss:$16 sps:$4 sm:$0xff]  }
 0x199   :  { %2729 = vmatprep.subr.bf16.mxu0 %v6582_v5  ;;  %2815 = vmatprep.subr.bf16.mxu1 %v6585_v55  ;;  %v6642_v5 = vld [vmem:[#allocation7 + $0x3a4] ss:$16 sps:$4 sm:$0xff]   ;;  %v6645_v55 = vld [vmem:[#allocation7 + $0x3ac] ss:$16 sps:$4 sm:$0xff]  }
 0x19c   :  { %2730 = vmatpush1.bf16.msra.mxu0 %v6580_v6  ;;  %2816 = vmatpush1.bf16.msra.mxu1 %v6583_v54  ;;  %v6640_v6 = vld [vmem:[#allocation7 + $0x3a0] ss:$16 sps:$4 sm:$0xff]   ;;  %v6643_v54 = vld [vmem:[#allocation7 + $0x3a8] ss:$16 sps:$4 sm:$0xff]  }
 0x19d   :  { %2731 = vmatprep.subr.bf16.mxu0 %v6588_v7  ;;  %2817 = vmatprep.subr.bf16.mxu1 %v6591_v8  ;;  %v6648_v7 = vld [vmem:[#allocation7 + $0x3c4] ss:$16 sps:$4 sm:$0xff]   ;;  %v6651_v8 = vld [vmem:[#allocation7 + $0x3cc] ss:$16 sps:$4 sm:$0xff]  }
 0x1a0   :  { %2732 = vmatpush1.bf16.msra.mxu0 %v6586_v9  ;;  %2818 = vmatpush1.bf16.msra.mxu1 %v6589_v10  ;;  %v6646_v9 = vld [vmem:[#allocation7 + $0x3c0] ss:$16 sps:$4 sm:$0xff]   ;;  %v6649_v10 = vld [vmem:[#allocation7 + $0x3c8] ss:$16 sps:$4 sm:$0xff]  }
 0x1a1   :  { %2733 = vmatprep.subr.bf16.mxu0 %v6594_v11  ;;  %2819 = vmatprep.subr.bf16.mxu1 %v6597_v12  ;;  %v6654_v11 = vld [vmem:[#allocation7 + $0x3e4] ss:$16 sps:$4 sm:$0xff]   ;;  %v6657_v12 = vld [vmem:[#allocation7 + $0x3ec] ss:$16 sps:$4 sm:$0xff]  }
 0x1a2   :  { %v803_v18 = vpop.f32.mrb[0].mxu0  ;;  %v889_v19 = vpop.f32.mrb[0].mxu1 }
 0x1a3   :  { %v805_v22 = vpop.f32.mrb[1].mxu0  ;;  %v891_v24 = vpop.f32.mrb[1].mxu1 }
 0x1a4   :  { %v898_v25 = vmax.f32 %v803_v18, %v805_v22  ;;  %v900_v26 = vmax.f32 %v889_v19, %v891_v24  ;;  %v807_v27 = vpop.f32.mrb[2].mxu0  ;;  %v893_v28 = vpop.f32.mrb[2].mxu1  ;;  %2734 = vmatpush1.bf16.msra.mxu0 %v6592_v13  ;;  %2820 = vmatpush1.bf16.msra.mxu1 %v6595_v14  ;;  %v6652_v13 = vld [vmem:[#allocation7 + $0x3e0] ss:$16 sps:$4 sm:$0xff]   ;;  %v6655_v14 = vld [vmem:[#allocation7 + $0x3e8] ss:$16 sps:$4 sm:$0xff]  }
 0x1a5   :  { %v809_v29 = vpop.f32.mrb[3].mxu0  ;;  %v895_v30 = vpop.f32.mrb[3].mxu1  ;;  %2735 = vmatprep.subr.bf16.mxu0 %v6600_v16  ;;  %2821 = vmatprep.subr.bf16.mxu1 %v6603_v17  ;;  %v6660_v16 = vld [vmem:[#allocation8 + $0x4] ss:$16 sps:$4 sm:$0xff]   ;;  %v6663_v17 = vld [vmem:[#allocation8 + $0xc] ss:$16 sps:$4 sm:$0xff]  }
 0x1a6   :  { %v902_v33 = vmax.f32 %v898_v25, %v900_v26  ;;  %v899_v34 = vmax.f32 %v807_v27, %v809_v29  ;;  %v901_v35 = vmax.f32 %v893_v28, %v895_v30  ;;  %v6658_v18 = vld [vmem:[#allocation8] ss:$16 sps:$4 sm:$0xff]   ;;  %v6661_v19 = vld [vmem:[#allocation8 + $0x8] ss:$16 sps:$4 sm:$0xff]   ;;  %v6669_v22 = vld [vmem:[#allocation8 + $0x2c] ss:$16 sps:$4 sm:$0xff]  }
 0x1a7   :  { %v6664_v24 = vld [vmem:[#allocation8 + $0x20] ss:$16 sps:$4 sm:$0xff]   ;;  %v6667_v25 = vld [vmem:[#allocation8 + $0x28] ss:$16 sps:$4 sm:$0xff]   ;;  %v6672_v26 = vld [vmem:[#allocation8 + $0x44] ss:$16 sps:$4 sm:$0xff]  }
 0x1a8   :  { %v910_v38 = vadd.f32 %v7505_v23, %v902_v33  ;;  %v903_v39 = vmax.f32 %v899_v34, %v901_v35  ;;  %2736 = vmatpush1.bf16.msra.mxu0 %v6598_v20  ;;  %2822 = vmatpush1.bf16.msra.mxu1 %v6601_v21  ;;  %v7513_v20 = vcombine.low %v7487_v58, %v7492_v59  ;;  %v6666_v21 = vld [vmem:[#allocation8 + $0x24] ss:$16 sps:$4 sm:$0xff]   ;;  %v6675_v27 = vld [vmem:[#allocation8 + $0x4c] ss:$16 sps:$4 sm:$0xff]   ;;  %v6670_v58 = vld [vmem:[#allocation8 + $0x40] ss:$16 sps:$4 sm:$0xff]  }
 0x1a9   :  { %2737 = vmatprep.subr.bf16.mxu0 %v6606_v31  ;;  %2823 = vmatprep.subr.bf16.mxu1 %v6609_v32  ;;  %v6673_v59 = vld [vmem:[#allocation8 + $0x48] ss:$16 sps:$4 sm:$0xff]   ;;  %v6678_v28 = vld [vmem:[#allocation8 + $0x64] ss:$16 sps:$4 sm:$0xff]   ;;  %v6681_v29 = vld [vmem:[#allocation8 + $0x6c] ss:$16 sps:$4 sm:$0xff]  }
 0x1aa   :  { %v911_v42 = vadd.f32 %v7505_v23, %v903_v39  ;;  %v912_v44 = vmax.f32 %v910_v38, 0.0  ;;  %v6676_v30 = vld [vmem:[#allocation8 + $0x60] ss:$16 sps:$4 sm:$0xff]   ;;  %v6679_v31 = vld [vmem:[#allocation8 + $0x68] ss:$16 sps:$4 sm:$0xff]  }
 0x1ab   :  { %v6684_v32 = vld [vmem:[#allocation8 + $0x84] ss:$16 sps:$4 sm:$0xff]   ;;  %v6687_v33 = vld [vmem:[#allocation8 + $0x8c] ss:$16 sps:$4 sm:$0xff]   ;;  %v6682_v34 = vld [vmem:[#allocation8 + $0x80] ss:$16 sps:$4 sm:$0xff]  }
 0x1ac   :  { %v913_v45 = vmax.f32 %v911_v42, 0.0  ;;  %2738 = vmatpush1.bf16.msra.mxu0 %v6604_v36  ;;  %2824 = vmatpush1.bf16.msra.mxu1 %v6607_v37  ;;  %v6685_v35 = vld [vmem:[#allocation8 + $0x88] ss:$16 sps:$4 sm:$0xff]   ;;  %v6693_v36 = vld [vmem:[#allocation8 + $0xac] ss:$16 sps:$4 sm:$0xff]  }
 0x1ad   :  { %2739 = vmatprep.subr.bf16.mxu0 %v6612_v40  ;;  %2825 = vmatprep.subr.bf16.mxu1 %v6615_v41  ;;  %v6688_v37 = vld [vmem:[#allocation8 + $0xa0] ss:$16 sps:$4 sm:$0xff]   ;;  %v6691_v38 = vld [vmem:[#allocation8 + $0xa8] ss:$16 sps:$4 sm:$0xff]   ;;  %v6696_v39 = vld [vmem:[#allocation8 + $0xc4] ss:$16 sps:$4 sm:$0xff]  }
 0x1ae   :  { %v7509_v49 = vpack.c.bf16 %v913_v45, %v912_v44  ;;  %v6699_v40 = vld [vmem:[#allocation8 + $0xcc] ss:$16 sps:$4 sm:$0xff]   ;;  %v6694_v41 = vld [vmem:[#allocation8 + $0xc0] ss:$16 sps:$4 sm:$0xff]   ;;  %v6697_v42 = vld [vmem:[#allocation8 + $0xc8] ss:$16 sps:$4 sm:$0xff]  }
 0x1af   :  { %v6705_v44 = vld [vmem:[#allocation8 + $0xec] ss:$16 sps:$4 sm:$0xff]   ;;  %v6700_v45 = vld [vmem:[#allocation8 + $0xe0] ss:$16 sps:$4 sm:$0xff]  }
 0x1b0   :  { %2740 = vmatpush1.bf16.msra.mxu0 %v6610_v43  ;;  %2826 = vmatpush1.bf16.msra.mxu1 %v6613_v46  ;;  %v6702_v43 = vld [vmem:[#allocation8 + $0xe4] ss:$16 sps:$4 sm:$0xff]   ;;  %v6703_v46 = vld [vmem:[#allocation8 + $0xe8] ss:$16 sps:$4 sm:$0xff]  }
 0x1b1   :  { %2741 = vmatprep.subr.bf16.mxu0 %v6618_v47  ;;  %2827 = vmatprep.subr.bf16.mxu1 %v6621_v48  ;;  %v6708_v47 = vld [vmem:[#allocation8 + $0x104] ss:$16 sps:$4 sm:$0xff]   ;;  %v6711_v48 = vld [vmem:[#allocation8 + $0x10c] ss:$16 sps:$4 sm:$0xff]  }
 0x1b4   :  { %2742 = vmatpush1.bf16.msra.mxu0 %v6616_v52  ;;  %2828 = vmatpush1.bf16.msra.mxu1 %v6619_v53  ;;  %v6706_v52 = vld [vmem:[#allocation8 + $0x100] ss:$16 sps:$4 sm:$0xff]   ;;  %v6709_v53 = vld [vmem:[#allocation8 + $0x108] ss:$16 sps:$4 sm:$0xff]  }
 0x1b5   :  { %2743 = vmatprep.subr.bf16.mxu0 %v6624_v56  ;;  %2829 = vmatprep.subr.bf16.mxu1 %v6627_v57  ;;  %v6714_v56 = vld [vmem:[#allocation8 + $0x124] ss:$16 sps:$4 sm:$0xff]   ;;  %v6717_v57 = vld [vmem:[#allocation8 + $0x12c] ss:$16 sps:$4 sm:$0xff]  }
 0x1b8   :  { %2744 = vmatpush1.bf16.msra.mxu0 %v6622_v60  ;;  %2830 = vmatpush1.bf16.msra.mxu1 %v6625_v61  ;;  %v6712_v60 = vld [vmem:[#allocation8 + $0x120] ss:$16 sps:$4 sm:$0xff]   ;;  %v6715_v61 = vld [vmem:[#allocation8 + $0x128] ss:$16 sps:$4 sm:$0xff]  }
 0x1b9   :  { %2745 = vmatprep.subr.bf16.mxu0 %v6630_v50  ;;  %2831 = vmatprep.subr.bf16.mxu1 %v6633_v51  ;;  %v6720_v50 = vld [vmem:[#allocation8 + $0x144] ss:$16 sps:$4 sm:$0xff]   ;;  %v6723_v51 = vld [vmem:[#allocation8 + $0x14c] ss:$16 sps:$4 sm:$0xff]  }
 0x1bc   :  { %2746 = vmatpush1.bf16.msra.mxu0 %v6628_v63  ;;  %2832 = vmatpush1.bf16.msra.mxu1 %v6631_v0  ;;  %v6718_v63 = vld [vmem:[#allocation8 + $0x140] ss:$16 sps:$4 sm:$0xff]   ;;  %v6721_v0 = vld [vmem:[#allocation8 + $0x148] ss:$16 sps:$4 sm:$0xff]  }
 0x1bd   :  { %2747 = vmatprep.subr.bf16.mxu0 %v6636_v1  ;;  %2833 = vmatprep.subr.bf16.mxu1 %v6639_v2  ;;  %v6726_v1 = vld [vmem:[#allocation8 + $0x164] ss:$16 sps:$4 sm:$0xff]   ;;  %v6729_v2 = vld [vmem:[#allocation8 + $0x16c] ss:$16 sps:$4 sm:$0xff]  }
 0x1c0   :  { %2748 = vmatpush1.bf16.msra.mxu0 %v6634_v3  ;;  %2834 = vmatpush1.bf16.msra.mxu1 %v6637_v4  ;;  %v6724_v3 = vld [vmem:[#allocation8 + $0x160] ss:$16 sps:$4 sm:$0xff]   ;;  %v6727_v4 = vld [vmem:[#allocation8 + $0x168] ss:$16 sps:$4 sm:$0xff]  }
 0x1c1   :  { %2749 = vmatprep.subr.bf16.mxu0 %v6642_v5  ;;  %2835 = vmatprep.subr.bf16.mxu1 %v6645_v55  ;;  %v6732_v5 = vld [vmem:[#allocation8 + $0x184] ss:$16 sps:$4 sm:$0xff]   ;;  %v6735_v55 = vld [vmem:[#allocation8 + $0x18c] ss:$16 sps:$4 sm:$0xff]  }
 0x1c4   :  { %2750 = vmatpush1.bf16.msra.mxu0 %v6640_v6  ;;  %2836 = vmatpush1.bf16.msra.mxu1 %v6643_v54  ;;  %v6730_v6 = vld [vmem:[#allocation8 + $0x180] ss:$16 sps:$4 sm:$0xff]   ;;  %v6733_v54 = vld [vmem:[#allocation8 + $0x188] ss:$16 sps:$4 sm:$0xff]  }
 0x1c5   :  { %2751 = vmatprep.subr.bf16.mxu0 %v6648_v7  ;;  %2837 = vmatprep.subr.bf16.mxu1 %v6651_v8  ;;  %v6738_v7 = vld [vmem:[#allocation8 + $0x1a4] ss:$16 sps:$4 sm:$0xff]   ;;  %v6741_v8 = vld [vmem:[#allocation8 + $0x1ac] ss:$16 sps:$4 sm:$0xff]  }
 0x1c8   :  { %2752 = vmatpush1.bf16.msra.mxu0 %v6646_v9  ;;  %2838 = vmatpush1.bf16.msra.mxu1 %v6649_v10  ;;  %v6736_v9 = vld [vmem:[#allocation8 + $0x1a0] ss:$16 sps:$4 sm:$0xff]   ;;  %v6739_v10 = vld [vmem:[#allocation8 + $0x1a8] ss:$16 sps:$4 sm:$0xff]  }
 0x1c9   :  { %2753 = vmatprep.subr.bf16.mxu0 %v6654_v11  ;;  %2839 = vmatprep.subr.bf16.mxu1 %v6657_v12  ;;  %v6744_v11 = vld [vmem:[#allocation8 + $0x1c4] ss:$16 sps:$4 sm:$0xff]   ;;  %v6747_v12 = vld [vmem:[#allocation8 + $0x1cc] ss:$16 sps:$4 sm:$0xff]  }
 0x1cc   :  { %2754 = vmatpush1.bf16.msra.mxu0 %v6652_v13  ;;  %2840 = vmatpush1.bf16.msra.mxu1 %v6655_v14  ;;  %v6742_v13 = vld [vmem:[#allocation8 + $0x1c0] ss:$16 sps:$4 sm:$0xff]   ;;  %v6745_v14 = vld [vmem:[#allocation8 + $0x1c8] ss:$16 sps:$4 sm:$0xff]  }
 0x1cd   :  { %3458 = vmatprep.subr.bf16.mxu0 %v6660_v16  ;;  %3544 = vmatprep.subr.bf16.mxu1 %v6663_v17  ;;  %v6750_v16 = vld [vmem:[#allocation8 + $0x1e4] ss:$16 sps:$4 sm:$0xff]   ;;  %v6753_v17 = vld [vmem:[#allocation8 + $0x1ec] ss:$16 sps:$4 sm:$0xff]  }
 0x1cf   :  { %2756 = vmatmul.mubr.bf16.vlgmr.msra.gmra.mrb[8].mxu0 %v7513_v20  ;;  %2842 = vmatmul.mubr.bf16.vlgmr.msra.gmra.mrb[8].mxu1 %v7513_v20 }
 0x1d0   :  { %3459 = vmatpush1.bf16.msra.mxu0 %v6658_v18  ;;  %3545 = vmatpush1.bf16.msra.mxu1 %v6661_v19  ;;  %v6748_v18 = vld [vmem:[#allocation8 + $0x1e0] ss:$16 sps:$4 sm:$0xff]   ;;  %v6751_v19 = vld [vmem:[#allocation8 + $0x1e8] ss:$16 sps:$4 sm:$0xff]  }
 0x1d1   :  { %3460 = vmatprep.subr.bf16.mxu0 %v6666_v21  ;;  %3546 = vmatprep.subr.bf16.mxu1 %v6669_v22  ;;  %v6756_v21 = vld [vmem:[#allocation8 + $0x204] ss:$16 sps:$4 sm:$0xff]   ;;  %v6759_v22 = vld [vmem:[#allocation8 + $0x20c] ss:$16 sps:$4 sm:$0xff]  }
 0x1d2   :  { %3490 = vmatprep.mubr.bf16.mxu0 %v7496_v62  ;;  %3576 = vmatprep.mubr.bf16.mxu1 %v7496_v62  ;;  %v6690_v62 = vld [vmem:[#allocation8 + $0xa4] ss:$16 sps:$4 sm:$0xff]  }
 0x1d4   :  { %3461 = vmatpush1.bf16.msra.mxu0 %v6664_v24  ;;  %3547 = vmatpush1.bf16.msra.mxu1 %v6667_v25  ;;  %v6754_v24 = vld [vmem:[#allocation8 + $0x200] ss:$16 sps:$4 sm:$0xff]   ;;  %v6757_v25 = vld [vmem:[#allocation8 + $0x208] ss:$16 sps:$4 sm:$0xff]  }
 0x1d5   :  { %3462 = vmatprep.subr.bf16.mxu0 %v6672_v26  ;;  %3548 = vmatprep.subr.bf16.mxu1 %v6675_v27  ;;  %v6762_v26 = vld [vmem:[#allocation8 + $0x224] ss:$16 sps:$4 sm:$0xff]   ;;  %v6765_v27 = vld [vmem:[#allocation8 + $0x22c] ss:$16 sps:$4 sm:$0xff]  }
 0x1d8   :  { %3463 = vmatpush1.bf16.msra.mxu0 %v6670_v58  ;;  %3549 = vmatpush1.bf16.msra.mxu1 %v6673_v59  ;;  %v6760_v58 = vld [vmem:[#allocation8 + $0x220] ss:$16 sps:$4 sm:$0xff]   ;;  %v6763_v59 = vld [vmem:[#allocation8 + $0x228] ss:$16 sps:$4 sm:$0xff]  }
 0x1d9   :  { %3464 = vmatprep.subr.bf16.mxu0 %v6678_v28  ;;  %3550 = vmatprep.subr.bf16.mxu1 %v6681_v29  ;;  %v6768_v28 = vld [vmem:[#allocation8 + $0x244] ss:$16 sps:$4 sm:$0xff]   ;;  %v6771_v29 = vld [vmem:[#allocation8 + $0x24c] ss:$16 sps:$4 sm:$0xff]  }
 0x1dc   :  { %3465 = vmatpush1.bf16.msra.mxu0 %v6676_v30  ;;  %3551 = vmatpush1.bf16.msra.mxu1 %v6679_v31  ;;  %v6766_v30 = vld [vmem:[#allocation8 + $0x240] ss:$16 sps:$4 sm:$0xff]   ;;  %v6769_v31 = vld [vmem:[#allocation8 + $0x248] ss:$16 sps:$4 sm:$0xff]  }
 0x1dd   :  { %3466 = vmatprep.subr.bf16.mxu0 %v6684_v32  ;;  %3552 = vmatprep.subr.bf16.mxu1 %v6687_v33  ;;  %v6774_v32 = vld [vmem:[#allocation8 + $0x264] ss:$16 sps:$4 sm:$0xff]   ;;  %v6772_v33 = vld [vmem:[#allocation8 + $0x260] ss:$16 sps:$4 sm:$0xff]  }
 0x1e0   :  { %3467 = vmatpush1.bf16.msra.mxu0 %v6682_v34  ;;  %3553 = vmatpush1.bf16.msra.mxu1 %v6685_v35  ;;  %v6775_v34 = vld [vmem:[#allocation8 + $0x268] ss:$16 sps:$4 sm:$0xff]   ;;  %v6780_v35 = vld [vmem:[#allocation8 + $0x284] ss:$16 sps:$4 sm:$0xff]  }
 0x1e1   :  { %3468 = vmatprep.subr.bf16.mxu0 %v6690_v62  ;;  %3554 = vmatprep.subr.bf16.mxu1 %v6693_v36  ;;  %v6783_v62 = vld [vmem:[#allocation8 + $0x28c] ss:$16 sps:$4 sm:$0xff]   ;;  %v6778_v36 = vld [vmem:[#allocation8 + $0x280] ss:$16 sps:$4 sm:$0xff]  }
 0x1e4   :  { %3469 = vmatpush1.bf16.msra.mxu0 %v6688_v37  ;;  %3555 = vmatpush1.bf16.msra.mxu1 %v6691_v38  ;;  %v6781_v37 = vld [vmem:[#allocation8 + $0x288] ss:$16 sps:$4 sm:$0xff]   ;;  %v6786_v38 = vld [vmem:[#allocation8 + $0x2a4] ss:$16 sps:$4 sm:$0xff]  }
 0x1e5   :  { %3470 = vmatprep.subr.bf16.mxu0 %v6696_v39  ;;  %3556 = vmatprep.subr.bf16.mxu1 %v6699_v40  ;;  %v6789_v39 = vld [vmem:[#allocation8 + $0x2ac] ss:$16 sps:$4 sm:$0xff]   ;;  %v6784_v40 = vld [vmem:[#allocation8 + $0x2a0] ss:$16 sps:$4 sm:$0xff]  }
 0x1e8   :  { %3471 = vmatpush1.bf16.msra.mxu0 %v6694_v41  ;;  %3557 = vmatpush1.bf16.msra.mxu1 %v6697_v42  ;;  %v6787_v41 = vld [vmem:[#allocation8 + $0x2a8] ss:$16 sps:$4 sm:$0xff]   ;;  %v6792_v42 = vld [vmem:[#allocation8 + $0x2c4] ss:$16 sps:$4 sm:$0xff]  }
 0x1e9   :  { %3472 = vmatprep.subr.bf16.mxu0 %v6702_v43  ;;  %3558 = vmatprep.subr.bf16.mxu1 %v6705_v44  ;;  %v6795_v43 = vld [vmem:[#allocation8 + $0x2cc] ss:$16 sps:$4 sm:$0xff]  }
 0x1ec   :  { %3473 = vmatpush1.bf16.msra.mxu0 %v6700_v45  ;;  %3559 = vmatpush1.bf16.msra.mxu1 %v6703_v46 }
 0x1ed   :  { %3474 = vmatprep.subr.bf16.mxu0 %v6708_v47  ;;  %3560 = vmatprep.subr.bf16.mxu1 %v6711_v48 }
 0x1f0   :  { %3475 = vmatpush1.bf16.msra.mxu0 %v6706_v52  ;;  %3561 = vmatpush1.bf16.msra.mxu1 %v6709_v53 }
 0x1f1   :  { %3476 = vmatprep.subr.bf16.mxu0 %v6714_v56  ;;  %3562 = vmatprep.subr.bf16.mxu1 %v6717_v57  ;;  %v6790_v57 = vld [vmem:[#allocation8 + $0x2c0] ss:$16 sps:$4 sm:$0xff]  }
 0x1f4   :  { %3477 = vmatpush1.bf16.msra.mxu0 %v6712_v60  ;;  %3563 = vmatpush1.bf16.msra.mxu1 %v6715_v61  ;;  %v6793_v60 = vld [vmem:[#allocation8 + $0x2c8] ss:$16 sps:$4 sm:$0xff]  }
 0x1f5   :  { %3478 = vmatprep.subr.bf16.mxu0 %v6720_v50  ;;  %3564 = vmatprep.subr.bf16.mxu1 %v6723_v51  ;;  %v6798_v51 = vld [vmem:[#allocation8 + $0x2e4] ss:$16 sps:$4 sm:$0xff]  }
 0x1f8   :  { %3479 = vmatpush1.bf16.msra.mxu0 %v6718_v63  ;;  %3565 = vmatpush1.bf16.msra.mxu1 %v6721_v0  ;;  %v6801_v63 = vld [vmem:[#allocation8 + $0x2ec] ss:$16 sps:$4 sm:$0xff]  }
 0x1f9   :  { %3480 = vmatprep.subr.bf16.mxu0 %v6726_v1  ;;  %3566 = vmatprep.subr.bf16.mxu1 %v6729_v2 }
 0x1fc   :  { %3481 = vmatpush1.bf16.msra.mxu0 %v6724_v3  ;;  %3567 = vmatpush1.bf16.msra.mxu1 %v6727_v4  ;;  %v6796_v3 = vld [vmem:[#allocation8 + $0x2e0] ss:$16 sps:$4 sm:$0xff]  }
 0x1fd   :  { %3482 = vmatprep.subr.bf16.mxu0 %v6732_v5  ;;  %3568 = vmatprep.subr.bf16.mxu1 %v6735_v55  ;;  %v6799_v55 = vld [vmem:[#allocation8 + $0x2e8] ss:$16 sps:$4 sm:$0xff]  }
 0x200   :  { %3483 = vmatpush1.bf16.msra.mxu0 %v6730_v6  ;;  %3569 = vmatpush1.bf16.msra.mxu1 %v6733_v54  ;;  %v2863_v6 = vld [vmem:[%s7663_s0 + $0x1c] sm:$0xf] }
 0x201   :  { %3484 = vmatprep.subr.bf16.mxu0 %v6738_v7  ;;  %3570 = vmatprep.subr.bf16.mxu1 %v6741_v8  ;;  %v2865_v54 = vld [vmem:[%s7663_s0 + $0x3c] sm:$0xf]  ;;  %v6804_v7 = vld [vmem:[#allocation10 + $0x4] ss:$16 sps:$4 sm:$0xff]  }
 0x202   :  { %v6807_v8 = vld [vmem:[#allocation10 + $0xc] ss:$16 sps:$4 sm:$0xff]  }
 0x204   :  { %3485 = vmatpush1.bf16.msra.mxu0 %v6736_v9  ;;  %3571 = vmatpush1.bf16.msra.mxu1 %v6739_v10  ;;  %v5694_v10 = vcombine.low %v2863_v6, %v2865_v54  ;;  %v6883_v6 = vld [vmem:[#allocation10 + $0x1a8] ss:$16 sps:$4 sm:$0xff]   ;;  %v6888_v54 = vld [vmem:[#allocation10 + $0x1c4] ss:$16 sps:$4 sm:$0xff]  }
 0x205   :  { %3486 = vmatprep.subr.bf16.mxu0 %v6744_v11  ;;  %3572 = vmatprep.subr.bf16.mxu1 %v6747_v12 }
 0x208   :  { %3487 = vmatpush1.bf16.msra.mxu0 %v6742_v13  ;;  %3573 = vmatpush1.bf16.msra.mxu1 %v6745_v14  ;;  %v6802_v13 = vld [vmem:[#allocation10] ss:$16 sps:$4 sm:$0xff]   ;;  %v6805_v14 = vld [vmem:[#allocation10 + $0x8] ss:$16 sps:$4 sm:$0xff]  }
 0x209   :  { %3488 = vmatprep.subr.bf16.mxu0 %v6750_v16  ;;  %3574 = vmatprep.subr.bf16.mxu1 %v6753_v17  ;;  %v6810_v17 = vld [vmem:[#allocation10 + $0x24] ss:$16 sps:$4 sm:$0xff]  }
 0x20c   :  { %3489 = vmatpush1.bf16.msra.mxu0 %v6748_v18  ;;  %3575 = vmatpush1.bf16.msra.mxu1 %v6751_v19  ;;  %v6813_v18 = vld [vmem:[#allocation10 + $0x2c] ss:$16 sps:$4 sm:$0xff]   ;;  %v6808_v19 = vld [vmem:[#allocation10 + $0x20] ss:$16 sps:$4 sm:$0xff]  }
 0x20d   :  { %3501 = vmatprep.subr.bf16.mxu0 %v6756_v21  ;;  %3587 = vmatprep.subr.bf16.mxu1 %v6759_v22  ;;  %v6816_v21 = vld [vmem:[#allocation10 + $0x44] ss:$16 sps:$4 sm:$0xff]   ;;  %v6819_v22 = vld [vmem:[#allocation10 + $0x4c] ss:$16 sps:$4 sm:$0xff]  }
 0x20f   :  { %3491 = vmatmul.mubr.bf16.vlgmr.msra.gmra.mrb[12].mxu0 %v7513_v20  ;;  %3577 = vmatmul.mubr.bf16.vlgmr.msra.gmra.mrb[12].mxu1 %v7513_v20  ;;  %v6777_v20 = vld [vmem:[#allocation8 + $0x26c] ss:$16 sps:$4 sm:$0xff]  }
 0x210   :  { %3502 = vmatpush1.bf16.msra.mxu0 %v6754_v24  ;;  %3588 = vmatpush1.bf16.msra.mxu1 %v6757_v25  ;;  %v6814_v24 = vld [vmem:[#allocation10 + $0x40] ss:$16 sps:$4 sm:$0xff]   ;;  %v6817_v25 = vld [vmem:[#allocation10 + $0x48] ss:$16 sps:$4 sm:$0xff]  }
 0x211   :  { %3503 = vmatprep.subr.bf16.mxu0 %v6762_v26  ;;  %3589 = vmatprep.subr.bf16.mxu1 %v6765_v27  ;;  %v6822_v26 = vld [vmem:[#allocation10 + $0x64] ss:$16 sps:$4 sm:$0xff]   ;;  %v6825_v27 = vld [vmem:[#allocation10 + $0x6c] ss:$16 sps:$4 sm:$0xff]  }
 0x212   :  { %3533 = vmatprep.mubr.bf16.mxu0 %v7247_v15  ;;  %3619 = vmatprep.mubr.bf16.mxu1 %v7247_v15 }
 0x214   :  { %3504 = vmatpush1.bf16.msra.mxu0 %v6760_v58  ;;  %3590 = vmatpush1.bf16.msra.mxu1 %v6763_v59  ;;  %v6820_v58 = vld [vmem:[#allocation10 + $0x60] ss:$16 sps:$4 sm:$0xff]   ;;  %v6823_v59 = vld [vmem:[#allocation10 + $0x68] ss:$16 sps:$4 sm:$0xff]  }
 0x215   :  { %3505 = vmatprep.subr.bf16.mxu0 %v6768_v28  ;;  %3591 = vmatprep.subr.bf16.mxu1 %v6771_v29  ;;  %v6828_v28 = vld [vmem:[#allocation10 + $0x84] ss:$16 sps:$4 sm:$0xff]   ;;  %v6831_v29 = vld [vmem:[#allocation10 + $0x8c] ss:$16 sps:$4 sm:$0xff]  }
 0x218   :  { %3506 = vmatpush1.bf16.msra.mxu0 %v6766_v30  ;;  %3592 = vmatpush1.bf16.msra.mxu1 %v6769_v31  ;;  %v6826_v30 = vld [vmem:[#allocation10 + $0x80] ss:$16 sps:$4 sm:$0xff]   ;;  %v6829_v31 = vld [vmem:[#allocation10 + $0x88] ss:$16 sps:$4 sm:$0xff]  }
 0x219   :  { %3507 = vmatprep.subr.bf16.mxu0 %v6774_v32  ;;  %3593 = vmatprep.subr.bf16.mxu1 %v6777_v20  ;;  %v6834_v32 = vld [vmem:[#allocation10 + $0xa4] ss:$16 sps:$4 sm:$0xff]   ;;  %v6837_v20 = vld [vmem:[#allocation10 + $0xac] ss:$16 sps:$4 sm:$0xff]  }
 0x21c   :  { %3508 = vmatpush1.bf16.msra.mxu0 %v6772_v33  ;;  %3594 = vmatpush1.bf16.msra.mxu1 %v6775_v34  ;;  %v6832_v33 = vld [vmem:[#allocation10 + $0xa0] ss:$16 sps:$4 sm:$0xff]   ;;  %v6835_v34 = vld [vmem:[#allocation10 + $0xa8] ss:$16 sps:$4 sm:$0xff]  }
 0x21d   :  { %3509 = vmatprep.subr.bf16.mxu0 %v6780_v35  ;;  %3595 = vmatprep.subr.bf16.mxu1 %v6783_v62  ;;  %v6840_v35 = vld [vmem:[#allocation10 + $0xc4] ss:$16 sps:$4 sm:$0xff]   ;;  %v6843_v62 = vld [vmem:[#allocation10 + $0xcc] ss:$16 sps:$4 sm:$0xff]  }
 0x220   :  { %3510 = vmatpush1.bf16.msra.mxu0 %v6778_v36  ;;  %3596 = vmatpush1.bf16.msra.mxu1 %v6781_v37  ;;  %v6838_v36 = vld [vmem:[#allocation10 + $0xc0] ss:$16 sps:$4 sm:$0xff]   ;;  %v6841_v37 = vld [vmem:[#allocation10 + $0xc8] ss:$16 sps:$4 sm:$0xff]  }
 0x221   :  { %3511 = vmatprep.subr.bf16.mxu0 %v6786_v38  ;;  %3597 = vmatprep.subr.bf16.mxu1 %v6789_v39  ;;  %v6846_v38 = vld [vmem:[#allocation10 + $0xe4] ss:$16 sps:$4 sm:$0xff]   ;;  %v6849_v39 = vld [vmem:[#allocation10 + $0xec] ss:$16 sps:$4 sm:$0xff]  }
 0x222   :  { %v1783_v44 = vpop.f32.mrb[4].mxu0  ;;  %v1869_v45 = vpop.f32.mrb[4].mxu1 }
 0x223   :  { %v1785_v46 = vpop.f32.mrb[5].mxu0  ;;  %v1871_v47 = vpop.f32.mrb[5].mxu1 }
 0x224   :  { %v1878_v48 = vmax.f32 %v1783_v44, %v1785_v46  ;;  %v1880_v52 = vmax.f32 %v1869_v45, %v1871_v47  ;;  %v1787_v53 = vpop.f32.mrb[6].mxu0  ;;  %v1873_v56 = vpop.f32.mrb[6].mxu1  ;;  %3512 = vmatpush1.bf16.msra.mxu0 %v6784_v40  ;;  %3598 = vmatpush1.bf16.msra.mxu1 %v6787_v41  ;;  %v6844_v40 = vld [vmem:[#allocation10 + $0xe0] ss:$16 sps:$4 sm:$0xff]   ;;  %v6847_v41 = vld [vmem:[#allocation10 + $0xe8] ss:$16 sps:$4 sm:$0xff]  }
 0x225   :  { %v1789_v61 = vpop.f32.mrb[7].mxu0  ;;  %v1875_v50 = vpop.f32.mrb[7].mxu1  ;;  %3513 = vmatprep.subr.bf16.mxu0 %v6792_v42  ;;  %3599 = vmatprep.subr.bf16.mxu1 %v6795_v43  ;;  %v6852_v42 = vld [vmem:[#allocation10 + $0x104] ss:$16 sps:$4 sm:$0xff]   ;;  %v6855_v43 = vld [vmem:[#allocation10 + $0x10c] ss:$16 sps:$4 sm:$0xff]  }
 0x226   :  { %v1882_v0 = vmax.f32 %v1878_v48, %v1880_v52  ;;  %v1879_v1 = vmax.f32 %v1787_v53, %v1789_v61  ;;  %v1881_v2 = vmax.f32 %v1873_v56, %v1875_v50  ;;  %v6850_v44 = vld [vmem:[#allocation10 + $0x100] ss:$16 sps:$4 sm:$0xff]   ;;  %v6853_v45 = vld [vmem:[#allocation10 + $0x108] ss:$16 sps:$4 sm:$0xff]   ;;  %v6858_v46 = vld [vmem:[#allocation10 + $0x124] ss:$16 sps:$4 sm:$0xff]  }
 0x227   :  { %v6861_v47 = vld [vmem:[#allocation10 + $0x12c] ss:$16 sps:$4 sm:$0xff]   ;;  %v6856_v48 = vld [vmem:[#allocation10 + $0x120] ss:$16 sps:$4 sm:$0xff]   ;;  %v6859_v52 = vld [vmem:[#allocation10 + $0x128] ss:$16 sps:$4 sm:$0xff]  }
 0x228   :  { %v1884_v4 = vadd.f32 %v7505_v23, %v1882_v0  ;;  %v1883_v5 = vmax.f32 %v1879_v1, %v1881_v2  ;;  %3514 = vmatpush1.bf16.msra.mxu0 %v6790_v57  ;;  %3600 = vmatpush1.bf16.msra.mxu1 %v6793_v60  ;;  %v6864_v53 = vld [vmem:[#allocation10 + $0x144] ss:$16 sps:$4 sm:$0xff]   ;;  %v6867_v56 = vld [vmem:[#allocation10 + $0x14c] ss:$16 sps:$4 sm:$0xff]   ;;  %v6862_v57 = vld [vmem:[#allocation10 + $0x140] ss:$16 sps:$4 sm:$0xff]  }
 0x229   :  { %3515 = vmatprep.subr.bf16.mxu0 %v6798_v51  ;;  %3601 = vmatprep.subr.bf16.mxu1 %v6801_v63  ;;  %v6865_v60 = vld [vmem:[#allocation10 + $0x148] ss:$16 sps:$4 sm:$0xff]   ;;  %v6870_v61 = vld [vmem:[#allocation10 + $0x164] ss:$16 sps:$4 sm:$0xff]   ;;  %v6873_v50 = vld [vmem:[#allocation10 + $0x16c] ss:$16 sps:$4 sm:$0xff]  }
 0x22a   :  { %v1885_v9 = vadd.f32 %v7505_v23, %v1883_v5  ;;  %v1886_v11 = vmax.f32 %v1884_v4, 0.0  ;;  %v6811_v23 = vld [vmem:[#allocation10 + $0x28] ss:$16 sps:$4 sm:$0xff]   ;;  %v6868_v51 = vld [vmem:[#allocation10 + $0x160] ss:$16 sps:$4 sm:$0xff]  }
 0x22b   :  { %v6871_v63 = vld [vmem:[#allocation10 + $0x168] ss:$16 sps:$4 sm:$0xff]   ;;  %v6876_v0 = vld [vmem:[#allocation10 + $0x184] ss:$16 sps:$4 sm:$0xff]   ;;  %v6879_v1 = vld [vmem:[#allocation10 + $0x18c] ss:$16 sps:$4 sm:$0xff]  }
 0x22c   :  { %v1887_v12 = vmax.f32 %v1885_v9, 0.0  ;;  %3516 = vmatpush1.bf16.msra.mxu0 %v6796_v3  ;;  %3602 = vmatpush1.bf16.msra.mxu1 %v6799_v55  ;;  %v6874_v2 = vld [vmem:[#allocation10 + $0x180] ss:$16 sps:$4 sm:$0xff]   ;;  %v6877_v3 = vld [vmem:[#allocation10 + $0x188] ss:$16 sps:$4 sm:$0xff]  }
 0x22d   :  { %4221 = vmatprep.subr.bf16.mxu0 %v6804_v7  ;;  %4307 = vmatprep.subr.bf16.mxu1 %v6807_v8  ;;  %v6882_v4 = vld [vmem:[#allocation10 + $0x1a4] ss:$16 sps:$4 sm:$0xff]   ;;  %v6885_v5 = vld [vmem:[#allocation10 + $0x1ac] ss:$16 sps:$4 sm:$0xff]   ;;  %v6880_v55 = vld [vmem:[#allocation10 + $0x1a0] ss:$16 sps:$4 sm:$0xff]  }
 0x22e   :  { %v7531_v16 = vpack.c.bf16 %v1887_v12, %v1886_v11  ;;  %v6891_v7 = vld [vmem:[#allocation10 + $0x1cc] ss:$16 sps:$4 sm:$0xff]   ;;  %v6886_v8 = vld [vmem:[#allocation10 + $0x1c0] ss:$16 sps:$4 sm:$0xff]   ;;  %v6889_v9 = vld [vmem:[#allocation10 + $0x1c8] ss:$16 sps:$4 sm:$0xff]  }
 0x22f   :  { %3534 = vmatmul.mubr.bf16.vlgmr.msra.gmra.mrb[12].mxu0 %v5694_v10  ;;  %3620 = vmatmul.mubr.bf16.vlgmr.msra.gmra.mrb[12].mxu1 %v5694_v10  ;;  %v6894_v10 = vld [vmem:[#allocation10 + $0x1e4] ss:$16 sps:$4 sm:$0xff]   ;;  %v6897_v11 = vld [vmem:[#allocation10 + $0x1ec] ss:$16 sps:$4 sm:$0xff]   ;;  %v6892_v12 = vld [vmem:[#allocation10 + $0x1e0] ss:$16 sps:$4 sm:$0xff]  }
 0x230   :  { %4222 = vmatpush1.bf16.msra.mxu0 %v6802_v13  ;;  %4253 = vmatprep.mubr.bf16.mxu0 %v7531_v16  ;;  %v6895_v13 = vld [vmem:[#allocation10 + $0x1e8] ss:$16 sps:$4 sm:$0xff]  }
 0x231   :  { %4308 = vmatpush1.bf16.msra.mxu1 %v6805_v14  ;;  %4339 = vmatprep.mubr.bf16.mxu1 %v7531_v16  ;;  %v6900_v14 = vld [vmem:[#allocation10 + $0x204] ss:$16 sps:$4 sm:$0xff]  }
 0x232   :  { %4223 = vmatprep.subr.bf16.mxu0 %v6810_v17  ;;  %4309 = vmatprep.subr.bf16.mxu1 %v6813_v18  ;;  %v6903_v17 = vld [vmem:[#allocation10 + $0x20c] ss:$16 sps:$4 sm:$0xff]   ;;  %v6898_v18 = vld [vmem:[#allocation10 + $0x200] ss:$16 sps:$4 sm:$0xff]  }
 0x234   :  { %4224 = vmatpush1.bf16.msra.mxu0 %v6808_v19  ;;  %v6901_v19 = vld [vmem:[#allocation10 + $0x208] ss:$16 sps:$4 sm:$0xff]  }
 0x235   :  { %4310 = vmatpush1.bf16.msra.mxu1 %v6811_v23  ;;  %4225 = vmatprep.subr.bf16.mxu0 %v6816_v21  ;;  %v6906_v23 = vld [vmem:[#allocation10 + $0x224] ss:$16 sps:$4 sm:$0xff]   ;;  %v6909_v21 = vld [vmem:[#allocation10 + $0x22c] ss:$16 sps:$4 sm:$0xff]  }
 0x236   :  { %4311 = vmatprep.subr.bf16.mxu1 %v6819_v22  ;;  %v6904_v22 = vld [vmem:[#allocation10 + $0x220] ss:$16 sps:$4 sm:$0xff]  }
 0x238   :  { %4226 = vmatpush1.bf16.msra.mxu0 %v6814_v24  ;;  %v6907_v24 = vld [vmem:[#allocation10 + $0x228] ss:$16 sps:$4 sm:$0xff]  }
 0x239   :  { %4312 = vmatpush1.bf16.msra.mxu1 %v6817_v25  ;;  %4227 = vmatprep.subr.bf16.mxu0 %v6822_v26  ;;  %v6912_v25 = vld [vmem:[#allocation10 + $0x244] ss:$16 sps:$4 sm:$0xff]   ;;  %v6915_v26 = vld [vmem:[#allocation10 + $0x24c] ss:$16 sps:$4 sm:$0xff]  }
 0x23a   :  { %4313 = vmatprep.subr.bf16.mxu1 %v6825_v27  ;;  %v6910_v27 = vld [vmem:[#allocation10 + $0x240] ss:$16 sps:$4 sm:$0xff]  }
 0x23c   :  { %4228 = vmatpush1.bf16.msra.mxu0 %v6820_v58  ;;  %v6913_v58 = vld [vmem:[#allocation10 + $0x248] ss:$16 sps:$4 sm:$0xff]  }
 0x23d   :  { %4314 = vmatpush1.bf16.msra.mxu1 %v6823_v59  ;;  %4229 = vmatprep.subr.bf16.mxu0 %v6828_v28  ;;  %v6918_v59 = vld [vmem:[#allocation10 + $0x264] ss:$16 sps:$4 sm:$0xff]   ;;  %v6916_v28 = vld [vmem:[#allocation10 + $0x260] ss:$16 sps:$4 sm:$0xff]  }
 0x23e   :  { %4315 = vmatprep.subr.bf16.mxu1 %v6831_v29  ;;  %v6919_v29 = vld [vmem:[#allocation10 + $0x268] ss:$16 sps:$4 sm:$0xff]  }
 0x240   :  { %4230 = vmatpush1.bf16.msra.mxu0 %v6826_v30  ;;  %v6924_v30 = vld [vmem:[#allocation10 + $0x284] ss:$16 sps:$4 sm:$0xff]  }
 0x241   :  { %4316 = vmatpush1.bf16.msra.mxu1 %v6829_v31  ;;  %4231 = vmatprep.subr.bf16.mxu0 %v6834_v32  ;;  %v6927_v31 = vld [vmem:[#allocation10 + $0x28c] ss:$16 sps:$4 sm:$0xff]   ;;  %v6922_v32 = vld [vmem:[#allocation10 + $0x280] ss:$16 sps:$4 sm:$0xff]  }
 0x242   :  { %4317 = vmatprep.subr.bf16.mxu1 %v6837_v20  ;;  %v6925_v20 = vld [vmem:[#allocation10 + $0x288] ss:$16 sps:$4 sm:$0xff]  }
 0x244   :  { %4232 = vmatpush1.bf16.msra.mxu0 %v6832_v33  ;;  %v6930_v33 = vld [vmem:[#allocation10 + $0x2a4] ss:$16 sps:$4 sm:$0xff]  }
 0x245   :  { %4318 = vmatpush1.bf16.msra.mxu1 %v6835_v34  ;;  %4233 = vmatprep.subr.bf16.mxu0 %v6840_v35  ;;  %v6933_v34 = vld [vmem:[#allocation10 + $0x2ac] ss:$16 sps:$4 sm:$0xff]   ;;  %v6928_v35 = vld [vmem:[#allocation10 + $0x2a0] ss:$16 sps:$4 sm:$0xff]  }
 0x246   :  { %4319 = vmatprep.subr.bf16.mxu1 %v6843_v62  ;;  %v6931_v62 = vld [vmem:[#allocation10 + $0x2a8] ss:$16 sps:$4 sm:$0xff]  }
 0x248   :  { %4234 = vmatpush1.bf16.msra.mxu0 %v6838_v36  ;;  %v6936_v36 = vld [vmem:[#allocation10 + $0x2c4] ss:$16 sps:$4 sm:$0xff]  }
 0x249   :  { %4320 = vmatpush1.bf16.msra.mxu1 %v6841_v37  ;;  %4235 = vmatprep.subr.bf16.mxu0 %v6846_v38  ;;  %v6939_v37 = vld [vmem:[#allocation10 + $0x2cc] ss:$16 sps:$4 sm:$0xff]   ;;  %v6934_v38 = vld [vmem:[#allocation10 + $0x2c0] ss:$16 sps:$4 sm:$0xff]  }
 0x24a   :  { %4321 = vmatprep.subr.bf16.mxu1 %v6849_v39  ;;  %v6937_v39 = vld [vmem:[#allocation10 + $0x2c8] ss:$16 sps:$4 sm:$0xff]  }
 0x24c   :  { %4236 = vmatpush1.bf16.msra.mxu0 %v6844_v40  ;;  %v6942_v40 = vld [vmem:[#allocation10 + $0x2e4] ss:$16 sps:$4 sm:$0xff]  }
 0x24d   :  { %4322 = vmatpush1.bf16.msra.mxu1 %v6847_v41  ;;  %4237 = vmatprep.subr.bf16.mxu0 %v6852_v42  ;;  %v6945_v41 = vld [vmem:[#allocation10 + $0x2ec] ss:$16 sps:$4 sm:$0xff]   ;;  %v6940_v42 = vld [vmem:[#allocation10 + $0x2e0] ss:$16 sps:$4 sm:$0xff]  }
 0x24e   :  { %4323 = vmatprep.subr.bf16.mxu1 %v6855_v43  ;;  %v6943_v43 = vld [vmem:[#allocation10 + $0x2e8] ss:$16 sps:$4 sm:$0xff]  }
 0x250   :  { %4238 = vmatpush1.bf16.msra.mxu0 %v6850_v44  ;;  %v6948_v44 = vld [vmem:[#allocation11 + $0x4] ss:$16 sps:$4 sm:$0xff]  }
 0x251   :  { %4324 = vmatpush1.bf16.msra.mxu1 %v6853_v45  ;;  %4239 = vmatprep.subr.bf16.mxu0 %v6858_v46  ;;  %v6951_v45 = vld [vmem:[#allocation11 + $0xc] ss:$16 sps:$4 sm:$0xff]  }
 0x252   :  { %4325 = vmatprep.subr.bf16.mxu1 %v6861_v47 }
 0x254   :  { %4240 = vmatpush1.bf16.msra.mxu0 %v6856_v48 }
 0x255   :  { %4326 = vmatpush1.bf16.msra.mxu1 %v6859_v52  ;;  %4241 = vmatprep.subr.bf16.mxu0 %v6864_v53 }
 0x256   :  { %4327 = vmatprep.subr.bf16.mxu1 %v6867_v56 }
 0x258   :  { %4242 = vmatpush1.bf16.msra.mxu0 %v6862_v57 }
 0x259   :  { %4328 = vmatpush1.bf16.msra.mxu1 %v6865_v60  ;;  %4243 = vmatprep.subr.bf16.mxu0 %v6870_v61 }
 0x25a   :  { %4329 = vmatprep.subr.bf16.mxu1 %v6873_v50 }
 0x25c   :  { %4244 = vmatpush1.bf16.msra.mxu0 %v6868_v51 }
 0x25d   :  { %4330 = vmatpush1.bf16.msra.mxu1 %v6871_v63  ;;  %4245 = vmatprep.subr.bf16.mxu0 %v6876_v0 }
 0x25e   :  { %4331 = vmatprep.subr.bf16.mxu1 %v6879_v1  ;;  %v7542_v1 = vld [vmem:[%s7668_s5] ss:$0 sm:$0xff] }
 0x260   :  { %4246 = vmatpush1.bf16.msra.mxu0 %v6874_v2 }
 0x261   :  { %4332 = vmatpush1.bf16.msra.mxu1 %v6877_v3  ;;  %4247 = vmatprep.subr.bf16.mxu0 %v6882_v4 }
 0x262   :  { %4333 = vmatprep.subr.bf16.mxu1 %v6885_v5 }
 0x264   :  { %4248 = vmatpush1.bf16.msra.mxu0 %v6880_v55 }
 0x265   :  { %4334 = vmatpush1.bf16.msra.mxu1 %v6883_v6  ;;  %4249 = vmatprep.subr.bf16.mxu0 %v6888_v54  ;;  %v6946_v6 = vld [vmem:[#allocation11] ss:$16 sps:$4 sm:$0xff]   ;;  %v6949_v54 = vld [vmem:[#allocation11 + $0x8] ss:$16 sps:$4 sm:$0xff]  }
 0x266   :  { %4335 = vmatprep.subr.bf16.mxu1 %v6891_v7 }
 0x268   :  { %4250 = vmatpush1.bf16.msra.mxu0 %v6886_v8  ;;  %v6954_v8 = vld [vmem:[#allocation11 + $0x24] ss:$16 sps:$4 sm:$0xff]  }
 0x269   :  { %4336 = vmatpush1.bf16.msra.mxu1 %v6889_v9  ;;  %4251 = vmatprep.subr.bf16.mxu0 %v6894_v10  ;;  %v6957_v9 = vld [vmem:[#allocation11 + $0x2c] ss:$16 sps:$4 sm:$0xff]   ;;  %v6952_v10 = vld [vmem:[#allocation11 + $0x20] ss:$16 sps:$4 sm:$0xff]  }
 0x26a   :  { %4337 = vmatprep.subr.bf16.mxu1 %v6897_v11  ;;  %v6955_v11 = vld [vmem:[#allocation11 + $0x28] ss:$16 sps:$4 sm:$0xff]  }
 0x26c   :  { %4252 = vmatpush1.bf16.msra.mxu0 %v6892_v12  ;;  %v6960_v12 = vld [vmem:[#allocation11 + $0x44] ss:$16 sps:$4 sm:$0xff]  }
 0x26d   :  { %4338 = vmatpush1.bf16.msra.mxu1 %v6895_v13  ;;  %4264 = vmatprep.subr.bf16.mxu0 %v6900_v14  ;;  %v6963_v13 = vld [vmem:[#allocation11 + $0x4c] ss:$16 sps:$4 sm:$0xff]   ;;  %v6958_v14 = vld [vmem:[#allocation11 + $0x40] ss:$16 sps:$4 sm:$0xff]  }
 0x26e   :  { %4350 = vmatprep.subr.bf16.mxu1 %v6903_v17  ;;  %v6961_v17 = vld [vmem:[#allocation11 + $0x48] ss:$16 sps:$4 sm:$0xff]  }
 0x26f   :  { %4254 = vmatmul.mubr.bf16.vlgmr.msra.gmra.mrb[16].mxu0 %v7509_v49 }
 0x270   :  { %4340 = vmatmul.mubr.bf16.vlgmr.msra.gmra.mrb[16].mxu1 %v7509_v49  ;;  %4265 = vmatpush1.bf16.msra.mxu0 %v6898_v18  ;;  %v6921_v49 = vld [vmem:[#allocation10 + $0x26c] ss:$16 sps:$4 sm:$0xff]   ;;  %v6966_v18 = vld [vmem:[#allocation11 + $0x64] ss:$16 sps:$4 sm:$0xff]  }
 0x271   :  { %4351 = vmatpush1.bf16.msra.mxu1 %v6901_v19  ;;  %4266 = vmatprep.subr.bf16.mxu0 %v6906_v23  ;;  %v6969_v19 = vld [vmem:[#allocation11 + $0x6c] ss:$16 sps:$4 sm:$0xff]   ;;  %v6964_v23 = vld [vmem:[#allocation11 + $0x60] ss:$16 sps:$4 sm:$0xff]  }
 0x272   :  { %4352 = vmatprep.subr.bf16.mxu1 %v6909_v21  ;;  %4296 = vmatprep.mubr.bf16.mxu0 %v7247_v15  ;;  %v6967_v21 = vld [vmem:[#allocation11 + $0x68] ss:$16 sps:$4 sm:$0xff]  }
 0x273   :  { %4382 = vmatprep.mubr.bf16.mxu1 %v7247_v15 }
 0x274   :  { %4267 = vmatpush1.bf16.msra.mxu0 %v6904_v22  ;;  %v6972_v22 = vld [vmem:[#allocation11 + $0x84] ss:$16 sps:$4 sm:$0xff]  }
 0x275   :  { %4353 = vmatpush1.bf16.msra.mxu1 %v6907_v24  ;;  %4268 = vmatprep.subr.bf16.mxu0 %v6912_v25  ;;  %v6975_v24 = vld [vmem:[#allocation11 + $0x8c] ss:$16 sps:$4 sm:$0xff]   ;;  %v6970_v25 = vld [vmem:[#allocation11 + $0x80] ss:$16 sps:$4 sm:$0xff]  }
 0x276   :  { %4354 = vmatprep.subr.bf16.mxu1 %v6915_v26  ;;  %v6973_v26 = vld [vmem:[#allocation11 + $0x88] ss:$16 sps:$4 sm:$0xff]  }
 0x278   :  { %4269 = vmatpush1.bf16.msra.mxu0 %v6910_v27  ;;  %v6978_v27 = vld [vmem:[#allocation11 + $0xa4] ss:$16 sps:$4 sm:$0xff]  }
 0x279   :  { %4355 = vmatpush1.bf16.msra.mxu1 %v6913_v58  ;;  %4270 = vmatprep.subr.bf16.mxu0 %v6918_v59  ;;  %v6981_v58 = vld [vmem:[#allocation11 + $0xac] ss:$16 sps:$4 sm:$0xff]   ;;  %v6976_v59 = vld [vmem:[#allocation11 + $0xa0] ss:$16 sps:$4 sm:$0xff]  }
 0x27a   :  { %4356 = vmatprep.subr.bf16.mxu1 %v6921_v49  ;;  %v6979_v49 = vld [vmem:[#allocation11 + $0xa8] ss:$16 sps:$4 sm:$0xff]  }
 0x27c   :  { %4271 = vmatpush1.bf16.msra.mxu0 %v6916_v28  ;;  %v6984_v28 = vld [vmem:[#allocation11 + $0xc4] ss:$16 sps:$4 sm:$0xff]  }
 0x27d   :  { %4357 = vmatpush1.bf16.msra.mxu1 %v6919_v29  ;;  %4272 = vmatprep.subr.bf16.mxu0 %v6924_v30  ;;  %v6987_v29 = vld [vmem:[#allocation11 + $0xcc] ss:$16 sps:$4 sm:$0xff]   ;;  %v6982_v30 = vld [vmem:[#allocation11 + $0xc0] ss:$16 sps:$4 sm:$0xff]  }
 0x27e   :  { %4358 = vmatprep.subr.bf16.mxu1 %v6927_v31  ;;  %v6985_v31 = vld [vmem:[#allocation11 + $0xc8] ss:$16 sps:$4 sm:$0xff]  }
 0x280   :  { %4273 = vmatpush1.bf16.msra.mxu0 %v6922_v32  ;;  %v6990_v32 = vld [vmem:[#allocation11 + $0xe4] ss:$16 sps:$4 sm:$0xff]  }
 0x281   :  { %4359 = vmatpush1.bf16.msra.mxu1 %v6925_v20  ;;  %4274 = vmatprep.subr.bf16.mxu0 %v6930_v33  ;;  %v6993_v20 = vld [vmem:[#allocation11 + $0xec] ss:$16 sps:$4 sm:$0xff]   ;;  %v6988_v33 = vld [vmem:[#allocation11 + $0xe0] ss:$16 sps:$4 sm:$0xff]  }
 0x282   :  { %4360 = vmatprep.subr.bf16.mxu1 %v6933_v34  ;;  %v6991_v34 = vld [vmem:[#allocation11 + $0xe8] ss:$16 sps:$4 sm:$0xff]  }
 0x284   :  { %4275 = vmatpush1.bf16.msra.mxu0 %v6928_v35  ;;  %v6996_v35 = vld [vmem:[#allocation11 + $0x104] ss:$16 sps:$4 sm:$0xff]  }
 0x285   :  { %4361 = vmatpush1.bf16.msra.mxu1 %v6931_v62  ;;  %4276 = vmatprep.subr.bf16.mxu0 %v6936_v36  ;;  %v6999_v62 = vld [vmem:[#allocation11 + $0x10c] ss:$16 sps:$4 sm:$0xff]   ;;  %v6994_v36 = vld [vmem:[#allocation11 + $0x100] ss:$16 sps:$4 sm:$0xff]  }
 0x286   :  { %4362 = vmatprep.subr.bf16.mxu1 %v6939_v37  ;;  %v6997_v37 = vld [vmem:[#allocation11 + $0x108] ss:$16 sps:$4 sm:$0xff]  }
 0x288   :  { %4277 = vmatpush1.bf16.msra.mxu0 %v6934_v38  ;;  %v7002_v38 = vld [vmem:[#allocation11 + $0x124] ss:$16 sps:$4 sm:$0xff]  }
 0x289   :  { %4363 = vmatpush1.bf16.msra.mxu1 %v6937_v39  ;;  %4278 = vmatprep.subr.bf16.mxu0 %v6942_v40  ;;  %v7005_v39 = vld [vmem:[#allocation11 + $0x12c] ss:$16 sps:$4 sm:$0xff]   ;;  %v7000_v40 = vld [vmem:[#allocation11 + $0x120] ss:$16 sps:$4 sm:$0xff]  }
 0x28a   :  { %4364 = vmatprep.subr.bf16.mxu1 %v6945_v41  ;;  %v7003_v41 = vld [vmem:[#allocation11 + $0x128] ss:$16 sps:$4 sm:$0xff]  }
 0x28c   :  { %4279 = vmatpush1.bf16.msra.mxu0 %v6940_v42  ;;  %v7008_v42 = vld [vmem:[#allocation11 + $0x144] ss:$16 sps:$4 sm:$0xff]  }
 0x28d   :  { %4365 = vmatpush1.bf16.msra.mxu1 %v6943_v43  ;;  %4985 = vmatprep.subr.bf16.mxu0 %v6948_v44  ;;  %v7011_v43 = vld [vmem:[#allocation11 + $0x14c] ss:$16 sps:$4 sm:$0xff]   ;;  %v7006_v44 = vld [vmem:[#allocation11 + $0x140] ss:$16 sps:$4 sm:$0xff]  }
 0x28e   :  { %5071 = vmatprep.subr.bf16.mxu1 %v6951_v45  ;;  %v7009_v45 = vld [vmem:[#allocation11 + $0x148] ss:$16 sps:$4 sm:$0xff]  }
 0x2a2   :  { %v2757_v46 = vpop.f32.mrb[8].mxu0  ;;  %v2843_v47 = vpop.f32.mrb[8].mxu1 }
 0x2a3   :  { %v2759_v48 = vpop.f32.mrb[9].mxu0  ;;  %v2845_v52 = vpop.f32.mrb[9].mxu1 }
 0x2a4   :  { %v2852_v53 = vmax.f32 %v2757_v46, %v2759_v48  ;;  %v2854_v56 = vmax.f32 %v2843_v47, %v2845_v52  ;;  %v2761_v57 = vpop.f32.mrb[10].mxu0  ;;  %v2847_v60 = vpop.f32.mrb[10].mxu1  ;;  %v7014_v46 = vld [vmem:[#allocation11 + $0x164] ss:$16 sps:$4 sm:$0xff]   ;;  %v7017_v47 = vld [vmem:[#allocation11 + $0x16c] ss:$16 sps:$4 sm:$0xff]  }
 0x2a5   :  { %v2763_v61 = vpop.f32.mrb[11].mxu0  ;;  %v2849_v50 = vpop.f32.mrb[11].mxu1  ;;  %v7012_v48 = vld [vmem:[#allocation11 + $0x160] ss:$16 sps:$4 sm:$0xff]   ;;  %v7015_v52 = vld [vmem:[#allocation11 + $0x168] ss:$16 sps:$4 sm:$0xff]  }
 0x2a6   :  { %v2856_v51 = vmax.f32 %v2852_v53, %v2854_v56  ;;  %v2853_v63 = vmax.f32 %v2761_v57, %v2763_v61  ;;  %v2855_v0 = vmax.f32 %v2847_v60, %v2849_v50  ;;  %v7020_v53 = vld [vmem:[#allocation11 + $0x184] ss:$16 sps:$4 sm:$0xff]   ;;  %v7023_v56 = vld [vmem:[#allocation11 + $0x18c] ss:$16 sps:$4 sm:$0xff]   ;;  %v7018_v57 = vld [vmem:[#allocation11 + $0x180] ss:$16 sps:$4 sm:$0xff]  }
 0x2a7   :  { %v7021_v60 = vld [vmem:[#allocation11 + $0x188] ss:$16 sps:$4 sm:$0xff]   ;;  %v7026_v61 = vld [vmem:[#allocation11 + $0x1a4] ss:$16 sps:$4 sm:$0xff]   ;;  %v7029_v50 = vld [vmem:[#allocation11 + $0x1ac] ss:$16 sps:$4 sm:$0xff]  }
 0x2a8   :  { %v2858_v2 = vadd.f32 %v7542_v1, %v2856_v51  ;;  %v2857_v3 = vmax.f32 %v2853_v63, %v2855_v0  ;;  %v7024_v51 = vld [vmem:[#allocation11 + $0x1a0] ss:$16 sps:$4 sm:$0xff]   ;;  %v7027_v63 = vld [vmem:[#allocation11 + $0x1a8] ss:$16 sps:$4 sm:$0xff]   ;;  %v7032_v0 = vld [vmem:[#allocation11 + $0x1c4] ss:$16 sps:$4 sm:$0xff]  }
 0x2aa   :  { %v2859_v4 = vadd.f32 %v7542_v1, %v2857_v3  ;;  %v2860_v5 = vmax.f32 %v2858_v2, 0.0  ;;  %v7035_v2 = vld [vmem:[#allocation11 + $0x1cc] ss:$16 sps:$4 sm:$0xff]   ;;  %v7030_v3 = vld [vmem:[#allocation11 + $0x1c0] ss:$16 sps:$4 sm:$0xff]  }
 0x2ac   :  { %v2861_v55 = vmax.f32 %v2859_v4, 0.0  ;;  %v7033_v4 = vld [vmem:[#allocation11 + $0x1c8] ss:$16 sps:$4 sm:$0xff]  }
 0x2ae   :  { %v3642_v7 = vpack.c.bf16 %v2861_v55, %v2860_v5  ;;  %v7038_v5 = vld [vmem:[#allocation11 + $0x1e4] ss:$16 sps:$4 sm:$0xff]   ;;  %v7041_v55 = vld [vmem:[#allocation11 + $0x1ec] ss:$16 sps:$4 sm:$0xff]  }
 0x2b0   :  { %4297 = vmatmul.mubr.bf16.vlgmr.msra.gmra.mrb[16].mxu0 %v3642_v7  ;;  %4383 = vmatmul.mubr.bf16.vlgmr.msra.gmra.mrb[16].mxu1 %v3642_v7 }
 0x2b1   :  { %4986 = vmatpush1.bf16.msra.mxu0 %v6946_v6  ;;  %5072 = vmatpush1.bf16.msra.mxu1 %v6949_v54  ;;  %v7036_v6 = vld [vmem:[#allocation11 + $0x1e0] ss:$16 sps:$4 sm:$0xff]   ;;  %v7039_v54 = vld [vmem:[#allocation11 + $0x1e8] ss:$16 sps:$4 sm:$0xff]  }
 0x2b2   :  { %5017 = vmatprep.mubr.bf16.mxu0 %v3642_v7  ;;  %5103 = vmatprep.mubr.bf16.mxu1 %v3642_v7  ;;  %v7044_v7 = vld [vmem:[#allocation11 + $0x204] ss:$16 sps:$4 sm:$0xff]  }
 0x2b3   :  { %4987 = vmatprep.subr.bf16.mxu0 %v6954_v8  ;;  %5073 = vmatprep.subr.bf16.mxu1 %v6957_v9  ;;  %v7047_v8 = vld [vmem:[#allocation11 + $0x20c] ss:$16 sps:$4 sm:$0xff]   ;;  %v7042_v9 = vld [vmem:[#allocation11 + $0x200] ss:$16 sps:$4 sm:$0xff]  }
 0x2b5   :  { %4988 = vmatpush1.bf16.msra.mxu0 %v6952_v10  ;;  %5074 = vmatpush1.bf16.msra.mxu1 %v6955_v11  ;;  %v7045_v10 = vld [vmem:[#allocation11 + $0x208] ss:$16 sps:$4 sm:$0xff]   ;;  %v7050_v11 = vld [vmem:[#allocation11 + $0x224] ss:$16 sps:$4 sm:$0xff]  }
 0x2b6   :  { %4989 = vmatprep.subr.bf16.mxu0 %v6960_v12  ;;  %5075 = vmatprep.subr.bf16.mxu1 %v6963_v13  ;;  %v7053_v12 = vld [vmem:[#allocation11 + $0x22c] ss:$16 sps:$4 sm:$0xff]   ;;  %v7048_v13 = vld [vmem:[#allocation11 + $0x220] ss:$16 sps:$4 sm:$0xff]  }
 0x2b9   :  { %4990 = vmatpush1.bf16.msra.mxu0 %v6958_v14  ;;  %5076 = vmatpush1.bf16.msra.mxu1 %v6961_v17  ;;  %v7051_v14 = vld [vmem:[#allocation11 + $0x228] ss:$16 sps:$4 sm:$0xff]   ;;  %v7056_v17 = vld [vmem:[#allocation11 + $0x244] ss:$16 sps:$4 sm:$0xff]  }
 0x2ba   :  { %4991 = vmatprep.subr.bf16.mxu0 %v6966_v18  ;;  %5077 = vmatprep.subr.bf16.mxu1 %v6969_v19  ;;  %v7059_v18 = vld [vmem:[#allocation11 + $0x24c] ss:$16 sps:$4 sm:$0xff]   ;;  %v7054_v19 = vld [vmem:[#allocation11 + $0x240] ss:$16 sps:$4 sm:$0xff]  }
 0x2bd   :  { %4992 = vmatpush1.bf16.msra.mxu0 %v6964_v23  ;;  %5078 = vmatpush1.bf16.msra.mxu1 %v6967_v21  ;;  %v7057_v23 = vld [vmem:[#allocation11 + $0x248] ss:$16 sps:$4 sm:$0xff]   ;;  %v7062_v21 = vld [vmem:[#allocation11 + $0x264] ss:$16 sps:$4 sm:$0xff]  }
 0x2be   :  { %4993 = vmatprep.subr.bf16.mxu0 %v6972_v22  ;;  %5079 = vmatprep.subr.bf16.mxu1 %v6975_v24  ;;  %v7060_v22 = vld [vmem:[#allocation11 + $0x260] ss:$16 sps:$4 sm:$0xff]   ;;  %v7063_v24 = vld [vmem:[#allocation11 + $0x268] ss:$16 sps:$4 sm:$0xff]  }
 0x2c1   :  { %4994 = vmatpush1.bf16.msra.mxu0 %v6970_v25  ;;  %5080 = vmatpush1.bf16.msra.mxu1 %v6973_v26  ;;  %v7068_v25 = vld [vmem:[#allocation11 + $0x284] ss:$16 sps:$4 sm:$0xff]   ;;  %v7071_v26 = vld [vmem:[#allocation11 + $0x28c] ss:$16 sps:$4 sm:$0xff]  }
 0x2c2   :  { %4995 = vmatprep.subr.bf16.mxu0 %v6978_v27  ;;  %5081 = vmatprep.subr.bf16.mxu1 %v6981_v58  ;;  %v7066_v27 = vld [vmem:[#allocation11 + $0x280] ss:$16 sps:$4 sm:$0xff]   ;;  %v7074_v58 = vld [vmem:[#allocation11 + $0x2a4] ss:$16 sps:$4 sm:$0xff]  }
 0x2c5   :  { %4996 = vmatpush1.bf16.msra.mxu0 %v6976_v59  ;;  %5082 = vmatpush1.bf16.msra.mxu1 %v6979_v49  ;;  %v7077_v59 = vld [vmem:[#allocation11 + $0x2ac] ss:$16 sps:$4 sm:$0xff]   ;;  %v7072_v49 = vld [vmem:[#allocation11 + $0x2a0] ss:$16 sps:$4 sm:$0xff]  }
 0x2c6   :  { %4997 = vmatprep.subr.bf16.mxu0 %v6984_v28  ;;  %5083 = vmatprep.subr.bf16.mxu1 %v6987_v29  ;;  %v7075_v28 = vld [vmem:[#allocation11 + $0x2a8] ss:$16 sps:$4 sm:$0xff]  }
 0x2c9   :  { %4998 = vmatpush1.bf16.msra.mxu0 %v6982_v30  ;;  %5084 = vmatpush1.bf16.msra.mxu1 %v6985_v31  ;;  %v7080_v31 = vld [vmem:[#allocation11 + $0x2c4] ss:$16 sps:$4 sm:$0xff]  }
 0x2ca   :  { %4999 = vmatprep.subr.bf16.mxu0 %v6990_v32  ;;  %5085 = vmatprep.subr.bf16.mxu1 %v6993_v20  ;;  %v7083_v32 = vld [vmem:[#allocation11 + $0x2cc] ss:$16 sps:$4 sm:$0xff]  }
 0x2cd   :  { %5000 = vmatpush1.bf16.msra.mxu0 %v6988_v33  ;;  %5086 = vmatpush1.bf16.msra.mxu1 %v6991_v34 }
 0x2ce   :  { %5001 = vmatprep.subr.bf16.mxu0 %v6996_v35  ;;  %5087 = vmatprep.subr.bf16.mxu1 %v6999_v62 }
 0x2d1   :  { %5002 = vmatpush1.bf16.msra.mxu0 %v6994_v36  ;;  %5088 = vmatpush1.bf16.msra.mxu1 %v6997_v37 }
 0x2d2   :  { %5003 = vmatprep.subr.bf16.mxu0 %v7002_v38  ;;  %5089 = vmatprep.subr.bf16.mxu1 %v7005_v39  ;;  %v7078_v39 = vld [vmem:[#allocation11 + $0x2c0] ss:$16 sps:$4 sm:$0xff]  }
 0x2d5   :  { %5004 = vmatpush1.bf16.msra.mxu0 %v7000_v40  ;;  %5090 = vmatpush1.bf16.msra.mxu1 %v7003_v41  ;;  %v7081_v40 = vld [vmem:[#allocation11 + $0x2c8] ss:$16 sps:$4 sm:$0xff]  }
 0x2d6   :  { %5005 = vmatprep.subr.bf16.mxu0 %v7008_v42  ;;  %5091 = vmatprep.subr.bf16.mxu1 %v7011_v43 }
 0x2d9   :  { %5006 = vmatpush1.bf16.msra.mxu0 %v7006_v44  ;;  %5092 = vmatpush1.bf16.msra.mxu1 %v7009_v45  ;;  %v7086_v44 = vld [vmem:[#allocation11 + $0x2e4] ss:$16 sps:$4 sm:$0xff]   ;;  %v7089_v45 = vld [vmem:[#allocation11 + $0x2ec] ss:$16 sps:$4 sm:$0xff]  }
 0x2da   :  { %5007 = vmatprep.subr.bf16.mxu0 %v7014_v46  ;;  %5093 = vmatprep.subr.bf16.mxu1 %v7017_v47 }
 0x2dd   :  { %5008 = vmatpush1.bf16.msra.mxu0 %v7012_v48  ;;  %5094 = vmatpush1.bf16.msra.mxu1 %v7015_v52  ;;  %v7084_v48 = vld [vmem:[#allocation11 + $0x2e0] ss:$16 sps:$4 sm:$0xff]   ;;  %v7087_v52 = vld [vmem:[#allocation11 + $0x2e8] ss:$16 sps:$4 sm:$0xff]  }
 0x2de   :  { %5009 = vmatprep.subr.bf16.mxu0 %v7020_v53  ;;  %5095 = vmatprep.subr.bf16.mxu1 %v7023_v56 }
 0x2e1   :  { %5010 = vmatpush1.bf16.msra.mxu0 %v7018_v57  ;;  %5096 = vmatpush1.bf16.msra.mxu1 %v7021_v60  ;;  %v5183_v60 = vld [vmem:[%s7672_s9 + $0x80] sm:$0xff] }
 0x2e2   :  { %5011 = vmatprep.subr.bf16.mxu0 %v7026_v61  ;;  %5097 = vmatprep.subr.bf16.mxu1 %v7029_v50  ;;  %v5184_v61 = vld [vmem:[%s7672_s9 + $0x88] sm:$0xff]  ;;  %v5167_v50 = vld [vmem:[%s7672_s9] sm:$0xff] }
 0x2e5   :  { %5012 = vmatpush1.bf16.msra.mxu0 %v7024_v51  ;;  %5098 = vmatpush1.bf16.msra.mxu1 %v7027_v63  ;;  %v5168_v63 = vld [vmem:[%s7672_s9 + $0x8] sm:$0xff] }
 0x2e6   :  { %5013 = vmatprep.subr.bf16.mxu0 %v7032_v0  ;;  %5099 = vmatprep.subr.bf16.mxu1 %v7035_v2  ;;  %v5185_v0 = vld [vmem:[%s7672_s9 + $0x90] sm:$0xff]  ;;  %v5186_v2 = vld [vmem:[%s7672_s9 + $0x98] sm:$0xff] }
 0x2e9   :  { %5014 = vmatpush1.bf16.msra.mxu0 %v7030_v3  ;;  %5100 = vmatpush1.bf16.msra.mxu1 %v7033_v4  ;;  %v6027_v3 = vpack.c.bf16 %v5168_v63, %v5167_v50  ;;  %v6029_v4 = vpack.c.bf16 %v5186_v2, %v5185_v0 }
 0x2ea   :  { %5015 = vmatprep.subr.bf16.mxu0 %v7038_v5  ;;  %5101 = vmatprep.subr.bf16.mxu1 %v7041_v55  ;;  %v5169_v5 = vld [vmem:[%s7672_s9 + $0x10] sm:$0xff]  ;;  %v5170_v55 = vld [vmem:[%s7672_s9 + $0x18] sm:$0xff] }
 0x2ed   :  { %5016 = vmatpush1.bf16.msra.mxu0 %v7036_v6  ;;  %5102 = vmatpush1.bf16.msra.mxu1 %v7039_v54  ;;  %v5187_v6 = vld [vmem:[%s7672_s9 + $0xa0] sm:$0xff]  ;;  %v5188_v54 = vld [vmem:[%s7672_s9 + $0xa8] sm:$0xff] }
 0x2ee   :  { %5028 = vmatprep.subr.bf16.mxu0 %v7044_v7  ;;  %5114 = vmatprep.subr.bf16.mxu1 %v7047_v8  ;;  %v6031_v7 = vpack.c.bf16 %v5170_v55, %v5169_v5  ;;  %v6033_v8 = vpack.c.bf16 %v5188_v54, %v5187_v6 }
 0x2f0   :  { %5018 = vmatmul.mubr.bf16.vlgmr.msra.gmra.mrb[20].mxu0 %v7531_v16  ;;  %5104 = vmatmul.mubr.bf16.vlgmr.msra.gmra.mrb[20].mxu1 %v7531_v16  ;;  %v7065_v16 = vld [vmem:[#allocation11 + $0x26c] ss:$16 sps:$4 sm:$0xff]  }
 0x2f1   :  { %5029 = vmatpush1.bf16.msra.mxu0 %v7042_v9  ;;  %5115 = vmatpush1.bf16.msra.mxu1 %v7045_v10  ;;  %v5171_v9 = vld [vmem:[%s7672_s9 + $0x20] sm:$0xff]  ;;  %v5172_v10 = vld [vmem:[%s7672_s9 + $0x28] sm:$0xff] }
 0x2f2   :  { %5030 = vmatprep.subr.bf16.mxu0 %v7050_v11  ;;  %5116 = vmatprep.subr.bf16.mxu1 %v7053_v12  ;;  %v5189_v11 = vld [vmem:[%s7672_s9 + $0xb0] sm:$0xff]  ;;  %v5190_v12 = vld [vmem:[%s7672_s9 + $0xb8] sm:$0xff] }
 0x2f3   :  { %5060 = vmatprep.mubr.bf16.mxu0 %v7247_v15  ;;  %5146 = vmatprep.mubr.bf16.mxu1 %v7247_v15  ;;  %v7069_v15 = vld [vmem:[#allocation11 + $0x288] ss:$16 sps:$4 sm:$0xff]  }
 0x2f5   :  { %5031 = vmatpush1.bf16.msra.mxu0 %v7048_v13  ;;  %5117 = vmatpush1.bf16.msra.mxu1 %v7051_v14  ;;  %v6035_v13 = vpack.c.bf16 %v5172_v10, %v5171_v9  ;;  %v6037_v14 = vpack.c.bf16 %v5190_v12, %v5189_v11 }
 0x2f6   :  { %5032 = vmatprep.subr.bf16.mxu0 %v7056_v17  ;;  %5118 = vmatprep.subr.bf16.mxu1 %v7059_v18  ;;  %v5173_v17 = vld [vmem:[%s7672_s9 + $0x30] sm:$0xff]  ;;  %v5174_v18 = vld [vmem:[%s7672_s9 + $0x38] sm:$0xff] }
 0x2f9   :  { %5033 = vmatpush1.bf16.msra.mxu0 %v7054_v19  ;;  %5119 = vmatpush1.bf16.msra.mxu1 %v7057_v23  ;;  %v5191_v19 = vld [vmem:[%s7672_s9 + $0xc0] sm:$0xff]  ;;  %v5192_v23 = vld [vmem:[%s7672_s9 + $0xc8] sm:$0xff] }
 0x2fa   :  { %5034 = vmatprep.subr.bf16.mxu0 %v7062_v21  ;;  %5120 = vmatprep.subr.bf16.mxu1 %v7065_v16  ;;  %v6039_v21 = vpack.c.bf16 %v5174_v18, %v5173_v17  ;;  %v6041_v16 = vpack.c.bf16 %v5192_v23, %v5191_v19  ;;  %v5984_v19 = vld [vmem:[%s7673_s10] ss:$0 sm:$0xff] }
 0x2fd   :  { %5035 = vmatpush1.bf16.msra.mxu0 %v7060_v22  ;;  %5121 = vmatpush1.bf16.msra.mxu1 %v7063_v24  ;;  %v5175_v22 = vld [vmem:[%s7672_s9 + $0x40] sm:$0xff]  ;;  %v5176_v24 = vld [vmem:[%s7672_s9 + $0x48] sm:$0xff] }
 0x2fe   :  { %5036 = vmatprep.subr.bf16.mxu0 %v7068_v25  ;;  %5122 = vmatprep.subr.bf16.mxu1 %v7071_v26  ;;  %v5193_v25 = vld [vmem:[%s7672_s9 + $0xd0] sm:$0xff]  ;;  %v5194_v26 = vld [vmem:[%s7672_s9 + $0xd8] sm:$0xff] }
 0x301   :  { %5037 = vmatpush1.bf16.msra.mxu0 %v7066_v27  ;;  %5123 = vmatpush1.bf16.msra.mxu1 %v7069_v15  ;;  %v6043_v27 = vpack.c.bf16 %v5176_v24, %v5175_v22  ;;  %v6045_v15 = vpack.c.bf16 %v5194_v26, %v5193_v25  ;;  %v5985_v25 = vld [vmem:[%s7674_s11] ss:$0 sm:$0xff] }
 0x302   :  { %v3535_v29 = vpop.f32.mrb[12].mxu0  ;;  %v3621_v30 = vpop.f32.mrb[12].mxu1  ;;  %5038 = vmatprep.subr.bf16.mxu0 %v7074_v58  ;;  %5124 = vmatprep.subr.bf16.mxu1 %v7077_v59  ;;  %v5177_v58 = vld [vmem:[%s7672_s9 + $0x50] sm:$0xff]  ;;  %v5178_v59 = vld [vmem:[%s7672_s9 + $0x58] sm:$0xff] }
 0x303   :  { %v3537_v20 = vpop.f32.mrb[13].mxu0  ;;  %v3623_v33 = vpop.f32.mrb[13].mxu1 }
 0x304   :  { %v3630_v34 = vmax.f32 %v3535_v29, %v3537_v20  ;;  %v3632_v35 = vmax.f32 %v3621_v30, %v3623_v33  ;;  %v3539_v62 = vpop.f32.mrb[14].mxu0  ;;  %v3625_v36 = vpop.f32.mrb[14].mxu1  ;;  %v5196_v29 = vld [vmem:[%s7672_s9 + $0xe8] sm:$0xff]  ;;  %v5197_v33 = vld [vmem:[%s7672_s9 + $0xf0] sm:$0xff] }
 0x305   :  { %v3541_v37 = vpop.f32.mrb[15].mxu0  ;;  %v3627_v38 = vpop.f32.mrb[15].mxu1  ;;  %5039 = vmatpush1.bf16.msra.mxu0 %v7072_v49  ;;  %5125 = vmatpush1.bf16.msra.mxu1 %v7075_v28  ;;  %v6047_v49 = vpack.c.bf16 %v5178_v59, %v5177_v58  ;;  %v5195_v28 = vld [vmem:[%s7672_s9 + $0xe0] sm:$0xff] }
 0x306   :  { %v3634_v41 = vmax.f32 %v3630_v34, %v3632_v35  ;;  %v3631_v42 = vmax.f32 %v3539_v62, %v3541_v37  ;;  %v3633_v43 = vmax.f32 %v3625_v36, %v3627_v38  ;;  %5040 = vmatprep.subr.bf16.mxu0 %v7080_v31  ;;  %5126 = vmatprep.subr.bf16.mxu1 %v7083_v32  ;;  %v5179_v31 = vld [vmem:[%s7672_s9 + $0x60] sm:$0xff]  ;;  %v5180_v32 = vld [vmem:[%s7672_s9 + $0x68] sm:$0xff]  ;;  %v5198_v34 = vld [vmem:[%s7672_s9 + $0xf8] sm:$0xff] }
 0x307   :  { %v6049_v30 = vpack.c.bf16 %v5196_v29, %v5195_v28  ;;  %v6051_v20 = vpack.c.bf16 %v5180_v32, %v5179_v31  ;;  %v6053_v35 = vpack.c.bf16 %v5198_v34, %v5197_v33  ;;  %v5181_v62 = vld [vmem:[%s7672_s9 + $0x70] sm:$0xff]  ;;  %v5182_v36 = vld [vmem:[%s7672_s9 + $0x78] sm:$0xff] }
 0x308   :  { %v3636_v46 = vadd.f32 %v7542_v1, %v3634_v41  ;;  %v3635_v47 = vmax.f32 %v3631_v42, %v3633_v43  ;;  %v6055_v37 = vpack.c.bf16 %v5182_v36, %v5181_v62 }
 0x309   :  { %5041 = vmatpush1.bf16.msra.mxu0 %v7078_v39  ;;  %5127 = vmatpush1.bf16.msra.mxu1 %v7081_v40 }
 0x30a   :  { %v3637_v53 = vadd.f32 %v7542_v1, %v3635_v47  ;;  %5042 = vmatprep.subr.bf16.mxu0 %v7086_v44  ;;  %5128 = vmatprep.subr.bf16.mxu1 %v7089_v45  ;;  %v3638_v56 = vmax.f32 %v3636_v46, 0.0  ;;  %v6025_v1 = vpack.c.bf16 %v5184_v61, %v5183_v60 }
 0x30c   :  { %v3639_v57 = vmax.f32 %v3637_v53, 0.0 }
 0x30d   :  { %5043 = vmatpush1.bf16.msra.mxu0 %v7084_v48  ;;  %5129 = vmatpush1.bf16.msra.mxu1 %v7087_v52 }
 0x30e   :  { %v3643_v51 = vpack.c.bf16 %v3639_v57, %v3638_v56  ;;  %6026 = vmatprep.subr.bf16.mxu0 %v6025_v1  ;;  %6057 = vmatprep.subr.bf16.mxu1 %v6025_v1 }
 0x310   :  { %5061 = vmatmul.mubr.bf16.vlgmr.msra.gmra.mrb[20].mxu0 %v3643_v51  ;;  %5147 = vmatmul.mubr.bf16.vlgmr.msra.gmra.mrb[20].mxu1 %v3643_v51  ;;  %v5887_v51 = vld [vmem:[%s7671_s8] ss:$0 sm:$0xff] }
 0x311   :  { %6028 = vmatpush3.bf16.msra.mxu0 %v6027_v3  ;;  %6065 = vmatpush3.bf16.msra.mxu1 %v6027_v3 }
 0x312   :  { %6030 = vmatprep.subr.bf16.mxu0 %v6029_v4  ;;  %6058 = vmatprep.subr.bf16.mxu1 %v6029_v4 }
 0x315   :  { %6032 = vmatpush3.bf16.msra.mxu0 %v6031_v7  ;;  %6066 = vmatpush3.bf16.msra.mxu1 %v6031_v7 }
 0x316   :  { %6034 = vmatprep.subr.bf16.mxu0 %v6033_v8  ;;  %6059 = vmatprep.subr.bf16.mxu1 %v6033_v8 }
 0x319   :  { %6036 = vmatpush3.bf16.msra.mxu0 %v6035_v13  ;;  %6067 = vmatpush3.bf16.msra.mxu1 %v6035_v13 }
 0x31a   :  { %6038 = vmatprep.subr.bf16.mxu0 %v6037_v14  ;;  %6060 = vmatprep.subr.bf16.mxu1 %v6037_v14 }
 0x31d   :  { %6040 = vmatpush3.bf16.msra.mxu0 %v6039_v21  ;;  %6068 = vmatpush3.bf16.msra.mxu1 %v6039_v21 }
 0x31e   :  { %6042 = vmatprep.subr.bf16.mxu0 %v6041_v16  ;;  %6061 = vmatprep.subr.bf16.mxu1 %v6041_v16 }
 0x321   :  { %6044 = vmatpush3.bf16.msra.mxu0 %v6043_v27  ;;  %6069 = vmatpush3.bf16.msra.mxu1 %v6043_v27 }
 0x322   :  { %6046 = vmatprep.subr.bf16.mxu0 %v6045_v15  ;;  %6062 = vmatprep.subr.bf16.mxu1 %v6045_v15 }
 0x325   :  { %6048 = vmatpush3.bf16.msra.mxu0 %v6047_v49  ;;  %6070 = vmatpush3.bf16.msra.mxu1 %v6047_v49  ;;  %v5986_v49 = vld [vmem:[#allocation2] ss:$0 sm:$0xff] }
 0x326   :  { %6050 = vmatprep.subr.bf16.mxu0 %v6049_v30  ;;  %6063 = vmatprep.subr.bf16.mxu1 %v6049_v30 }
 0x329   :  { %6052 = vmatpush3.bf16.msra.mxu0 %v6051_v20  ;;  %6071 = vmatpush3.bf16.msra.mxu1 %v6051_v20 }
 0x32a   :  { %6054 = vmatprep.subr.bf16.mxu0 %v6053_v35  ;;  %6064 = vmatprep.subr.bf16.mxu1 %v6053_v35 }
 0x32d   :  { %6056 = vmatpush3.bf16.msra.mxu0 %v6055_v37  ;;  %6072 = vmatpush3.bf16.msra.mxu1 %v6055_v37 }
 0x383   :  { %v4298_v38 = vpop.f32.mrb[16].mxu0  ;;  %v4384_v39 = vpop.f32.mrb[16].mxu1 }
 0x384   :  { %v4300_v40 = vpop.f32.mrb[17].mxu0  ;;  %v4386_v41 = vpop.f32.mrb[17].mxu1 }
 0x385   :  { %v4393_v42 = vmax.f32 %v4298_v38, %v4300_v40  ;;  %v4395_v43 = vmax.f32 %v4384_v39, %v4386_v41  ;;  %v4302_v44 = vpop.f32.mrb[18].mxu0  ;;  %v4388_v45 = vpop.f32.mrb[18].mxu1 }
 0x386   :  { %v4304_v46 = vpop.f32.mrb[19].mxu0  ;;  %v4390_v47 = vpop.f32.mrb[19].mxu1 }
 0x387   :  { %v4397_v48 = vmax.f32 %v4393_v42, %v4395_v43  ;;  %v4394_v52 = vmax.f32 %v4302_v44, %v4304_v46  ;;  %v4396_v53 = vmax.f32 %v4388_v45, %v4390_v47 }
 0x389   :  { %v4398_v56 = vmax.f32 %v4394_v52, %v4396_v53  ;;  %v4405_v54 = vadd.f32 %v5887_v51, %v4397_v48 }
 0x38b   :  { %v4406_v9 = vadd.f32 %v5887_v51, %v4398_v56  ;;  %v4407_v12 = vmax.f32 %v4405_v54, 0.0 }
 0x38d   :  { %v4408_v14 = vmax.f32 %v4406_v9, 0.0 }
 0x3e3   :  { %v5062_v57 = vpop.f32.mrb[20].mxu0  ;;  %v5148_v60 = vpop.f32.mrb[20].mxu1 }
 0x3e4   :  { %v5064_v61 = vpop.f32.mrb[21].mxu0  ;;  %v5150_v50 = vpop.f32.mrb[21].mxu1 }
 0x3e5   :  { %v5157_v1 = vmax.f32 %v5062_v57, %v5064_v61  ;;  %v5159_v63 = vmax.f32 %v5148_v60, %v5150_v50  ;;  %v5066_v0 = vpop.f32.mrb[22].mxu0  ;;  %v5152_v2 = vpop.f32.mrb[22].mxu1 }
 0x3e6   :  { %v5068_v3 = vpop.f32.mrb[23].mxu0  ;;  %v5154_v4 = vpop.f32.mrb[23].mxu1 }
 0x3e7   :  { %v5161_v5 = vmax.f32 %v5157_v1, %v5159_v63  ;;  %v5158_v55 = vmax.f32 %v5066_v0, %v5068_v3  ;;  %v5160_v6 = vmax.f32 %v5152_v2, %v5154_v4 }
 0x3e9   :  { %v5162_v7 = vmax.f32 %v5158_v55, %v5160_v6  ;;  %v5163_v8 = vadd.f32 %v5887_v51, %v5161_v5 }
 0x3eb   :  { %v5165_v10 = vmax.f32 %v5163_v8, 0.0  ;;  %v5164_v11 = vadd.f32 %v5887_v51, %v5162_v7 }
 0x3ed   :  { %5270 = vmatprep.mubr.f32.mxu0 %v5165_v10  ;;  %v5166_v13 = vmax.f32 %v5164_v11, 0.0 }
 0x3ee   :  { %5271 = vmatmul.mubr.f32.vlgmr.msra.gmra.mrb[24].mxu0 %v4407_v12 }
 0x3ef   :  { %5275 = vmatprep.mubr.f32.mxu1 %v5166_v13 }
 0x3f0   :  { %5276 = vmatmul.mubr.f32.vlgmr.msra.gmra.mrb[24].mxu1 %v4408_v14 }
 0x4c1   :  { %v6019_v17 = vpop.f32.mrb[24].mxu0 }
 0x4c2   :  { %v6020_v18 = vpop.f32.mrb[25].mxu0 }
 0x4c3   :  { %v6021_v23 = vadd.f32 %v6020_v18, %v6019_v17  ;;  %v6022_v21 = vpop.f32.mrb[24].mxu1 }
 0x4c4   :  { %v6023_v16 = vpop.f32.mrb[25].mxu1 }
 0x4c5   :  { %v6024_v22 = vadd.f32 %v6023_v16, %v6022_v21  ;;  %v5273_v24 = vadd.f32 %v6021_v23, %v5984_v19 }
 0x4c7   :  { %v5278_v26 = vadd.f32 %v6024_v22, %v5984_v19  ;;  %v5281_v27 = vmax.f32 %v5273_v24, 0.0 }
 0x4c9   :  { %v5282_v15 = vmax.f32 %v5278_v26, 0.0  ;;  %v5290_v58 = vmul.f32 %v5985_v25, %v5281_v27 }
 0x4cb   :  { %5292 = vadd.xlane.f32.xlu0 %v5290_v58  ;;  %v5291_v59 = vmul.f32 %v5985_v25, %v5282_v15 }
 0x4cf   :  { %5294 = vadd.xlane.f32.xlu0 %v5291_v59 }
 0x558   :  { %v5293_v28 = vpop.xlane.xlu0 %5292 }
 0x559   :  { %v5303_v29 = vadd.f32 %v5986_v49, %v5293_v28 }
 0x55b   :  { %v5305_v30 = vsub.f32 0.0, %v5303_v29 }
 0x55c   :  { %v5295_v31 = vpop.xlane.xlu0 %5294 }
 0x55d   :  { %v5307_v32 = vmul.f32 1.442695, %v5305_v30  ;;  %v5304_v20 = vadd.f32 %v5986_v49, %v5295_v31 }
 0x55f   :  { %7090 = vpow2.f32 %v5307_v32  ;;  %v5306_v33 = vsub.f32 0.0, %v5304_v20 }
 0x561   :  { %v5309_v34 = vmul.f32 1.442695, %v5306_v33 }
 0x563   :  { %7092 = vpow2.f32 %v5309_v34 }
 0x569   :  { %v7091_v35 = vpop.eup %7090 }
 0x56a   :  { %v5311_v62 = vadd.f32 1.0, %v7091_v35 }
 0x56c   :  { %7094 = vrcp.f32 %v5311_v62 }
 0x56d   :  { %v7093_v36 = vpop.eup %7092 }
 0x56e   :  { %v5312_v37 = vadd.f32 1.0, %v7093_v36 }
 0x570   :  { %7096 = vrcp.f32 %v5312_v37 }
 0x576   :  { %v7095_v38 = vpop.eup %7094 }
 0x577   :  { %5318 = vst.msk [vmem:[%s7676_s13] sm:$0xff] %vm5317_vm0, %v7095_v38 }
 0x57a   :  { %v7097_v39 = vpop.eup %7096 }
 0x57b   :  { %5319 = vst.msk [vmem:[%s7676_s13 + $0x8] sm:$0xff] %vm5317_vm0, %v7097_v39 }
 0x57c   :  { %5324 = vsyncpa [#allocation4], 1 }
 0x57d   :  { %5325 = vsyncpa [#allocation6], 1 }
 0x57e   :  { %5326 = vsyncpa [#allocation9], 1 }
 0x57f   :  { %5327 = vsyncpa [#allocation12], 1 }

</bundles_post_ra>
